<compile_context>
chip_gen: v7x
topology: tpu7x:2x2x1
jax: 0.10.0
libtpu: 0.0.40
codegen_flags: <defaults>
</compile_context>

<pallas_src>
import functools

import jax
import jax.numpy as jnp
from jax.experimental import pallas as pl
from jax.experimental.pallas import tpu as pltpu


# ----------------------------------------------------------------------------
# Pallas kernels
# ----------------------------------------------------------------------------
def _conv_lrelu_kernel(x_ref, w_ref, o_ref):
    """(Cout,K) @ (K,Mblk) im2col matmul + LeakyReLU(0.2)."""
    y = jnp.dot(w_ref[...], x_ref[...], preferred_element_type=jnp.float32)
    o_ref[...] = jnp.where(y > 0, y, 0.2 * y).astype(o_ref.dtype)


def _conv_bn_lrelu_kernel(x_ref, w_ref, g_ref, b_ref, o_ref, *, inv_count):
    """(Cblk,K) @ (K,M) im2col matmul + train-mode BatchNorm + LeakyReLU(0.2).

    BN statistics are per output channel, so a channel-blocked grid needs no
    cross-block reduction.  Two-pass mean/variance in f32, biased variance.
    """
    y = jnp.dot(w_ref[...], x_ref[...], preferred_element_type=jnp.float32)
    mean = jnp.sum(y, axis=1, keepdims=True) * inv_count          # (Cblk, 1)
    d = y - mean
    var = jnp.sum(d * d, axis=1, keepdims=True) * inv_count       # (Cblk, 1)
    scale = g_ref[...] * jax.lax.rsqrt(var + 1e-5)
    y = d * scale + b_ref[...]
    o_ref[...] = jnp.where(y > 0, y, 0.2 * y).astype(o_ref.dtype)


def _tail_kernel(x_ref, w_ref, g_ref, b_ref, w5_ref, sel_ref, o_ref, *,
                 inv_count):
    """Fused tail: conv4 + BN + LeakyReLU -> final 4x4 dense -> Sigmoid.

    x_ref  : (K4, N*16)  bf16  im2col patches of the layer-3 output
    w_ref  : (C4, K4)    bf16  layer-4 conv weights
    g/b_ref: (C4, 1)     f32   BN affine
    w5_ref : (C4, N*16)  f32   final conv weight, tiled over the N images
    sel_ref: (N*16, N)   f32   block-diagonal ones (sums each image's 16 lanes)
    o_ref  : (1, N)      f32   probabilities
    """
    y = jnp.dot(w_ref[...], x_ref[...], preferred_element_type=jnp.float32)
    mean = jnp.sum(y, axis=1, keepdims=True) * inv_count
    d = y - mean
    var = jnp.sum(d * d, axis=1, keepdims=True) * inv_count
    scale = g_ref[...] * jax.lax.rsqrt(var + 1e-5)
    y = d * scale + b_ref[...]
    y = jnp.where(y > 0, y, 0.2 * y)                               # (C4, N*16)
    # Final 4x4 valid conv on a 4x4 map == dense over (C4, 4, 4):
    # per-lane channel contraction, then sum each image's 16 spatial lanes.
    col = jnp.sum(y * w5_ref[...], axis=0, keepdims=True)          # (1, N*16)
    logits = jnp.dot(col, sel_ref[...],
                     preferred_element_type=jnp.float32)           # (1, N)
    o_ref[...] = 1.0 / (1.0 + jnp.exp(-logits))


# ----------------------------------------------------------------------------
# Layer wrappers
# ----------------------------------------------------------------------------
def _im2col_4x4_s2_p1(x_cnhw):
    """Channel-major im2col for a 4x4 / stride-2 / pad-1 convolution.

    (C, N, H, W) -> (16*C, N*(H//2)*(W//2)) bf16.  Row index is
    ((kh*4 + kw)*C + c), matching w_hwio.reshape(16*C, Cout).
    """
    c, n, h, w = x_cnhw.shape
    oh, ow = h // 2, w // 2
    xp = jnp.pad(x_cnhw, ((0, 0), (0, 0), (1, 1), (1, 1)))
    cols = [xp[:, :, kh:kh + 2 * oh:2, kw:kw + 2 * ow:2]
            for kh in range(4) for kw in range(4)]
    patches = jnp.concatenate(cols, axis=0).reshape(16 * c, n * oh * ow)
    return patches.astype(jnp.bfloat16), oh, ow


def conv4x4_s2_layer(x_cnhw, w_hwio, gamma, beta):
    """Conv2d(4,4,stride=2,pad=1,bias=False) [+ BatchNorm2d] + LeakyReLU(0.2).

    Activations are channel-major (C, N, H, W); kernel output (Cout, N*OH*OW)
    reshapes straight into the next layer's input layout (no transposes).
    """
    cin, n, h, w = x_cnhw.shape
    cout = w_hwio.shape[-1]
    patches, oh, ow = _im2col_4x4_s2_p1(x_cnhw)                    # (K, M)
    k, m = patches.shape
    wk = jnp.transpose(w_hwio.reshape(k, cout)).astype(jnp.bfloat16)  # (Cout,K)
    out_shape = jax.ShapeDtypeStruct((cout, m), jnp.bfloat16)

    if gamma is None:
        # No BN -> output columns are independent: split the lane axis so both
        # v7x TensorCores get a block (one extra ~0.35us step on v5e/v6e).
        mblk = m // 2 if m % 256 == 0 else m
        out = pl.pallas_call(
            _conv_lrelu_kernel,
            out_shape=out_shape,
            grid=(m // mblk,),
            in_specs=[pl.BlockSpec((k, mblk), lambda i: (0, i)),
                      pl.BlockSpec((cout, k), lambda i: (0, 0))],
            out_specs=pl.BlockSpec((cout, mblk), lambda i: (0, i)),
            compiler_params=pltpu.CompilerParams(
                dimension_semantics=("parallel",)),
        )(patches, wk)
    else:
        # BN needs full-(N,H,W) statistics, but stats are per channel ->
        # split the output-channel axis across a parallel grid whenever the
        # block stays sublane-aligned (Cout/2 a multiple of 8).
        cblk = cout // 2 if cout % 16 == 0 else cout
        out = pl.pallas_call(
            functools.partial(_conv_bn_lrelu_kernel, inv_count=1.0 / m),
            out_shape=out_shape,
            grid=(cout // cblk,),
            in_specs=[pl.BlockSpec((k, m), lambda i: (0, 0)),
                      pl.BlockSpec((cblk, k), lambda i: (i, 0)),
                      pl.BlockSpec((cblk, 1), lambda i: (i, 0)),
                      pl.BlockSpec((cblk, 1), lambda i: (i, 0))],
            out_specs=pl.BlockSpec((cblk, m), lambda i: (i, 0)),
            compiler_params=pltpu.CompilerParams(
                dimension_semantics=("parallel",)),
        )(patches, wk, gamma.reshape(cout, 1), beta.reshape(cout, 1))

    return out.reshape(cout, n, oh, ow)


def tail_layer(x_cnhw, w4_hwio, gamma4, beta4, w5_hwio):
    """Fused: Conv(4,4,s2,p1)+BN+LReLU (layer 4) -> Conv(4,4,s1,p0) -> Sigmoid."""
    cin, n, h, w = x_cnhw.shape
    c4 = w4_hwio.shape[-1]
    patches, oh, ow = _im2col_4x4_s2_p1(x_cnhw)                    # (K4, N*16)
    assert oh == 4 and ow == 4, "final conv expects a 4x4 feature map"
    k, m = patches.shape
    wk = jnp.transpose(w4_hwio.reshape(k, c4)).astype(jnp.bfloat16)   # (C4, K4)
    # final weight (4,4,C4,1) -> (C4, 16), tiled along lanes over the N images
    # so it aligns with y's flattened (image, i, j) column layout.
    w5c = jnp.transpose(w5_hwio.reshape(oh * ow, c4)).astype(jnp.float32)
    w5t = jnp.tile(w5c, (1, n))                                        # (C4, m)
    sel = (jnp.arange(m)[:, None] // (oh * ow)
           == jnp.arange(n)[None, :]).astype(jnp.float32)              # (m, N)

    out = pl.pallas_call(
        functools.partial(_tail_kernel, inv_count=1.0 / m),
        out_shape=jax.ShapeDtypeStruct((1, n), jnp.float32),
        grid=(1,),
        in_specs=[pl.BlockSpec((k, m), lambda i: (0, 0)),
                  pl.BlockSpec((c4, k), lambda i: (0, 0)),
                  pl.BlockSpec((c4, 1), lambda i: (0, 0)),
                  pl.BlockSpec((c4, 1), lambda i: (0, 0)),
                  pl.BlockSpec((c4, m), lambda i: (0, 0)),
                  pl.BlockSpec((m, n), lambda i: (0, 0))],
        out_specs=pl.BlockSpec((1, n), lambda i: (0, 0)),
        compiler_params=pltpu.CompilerParams(
            dimension_semantics=("arbitrary",)),
    )(patches, wk, gamma4.reshape(c4, 1), beta4.reshape(c4, 1), w5t, sel)
    return out.reshape(n, 1, 1, 1)


# ----------------------------------------------------------------------------
# Discriminator
# ----------------------------------------------------------------------------
def init_params(key, nc, ndf):
    chans = [nc, ndf // 2, ndf, ndf * 2, ndf * 4, ndf * 8, 1]
    params = []
    for li in range(6):
        key, wk = jax.random.split(key)
        w = 0.02 * jax.random.normal(wk, (4, 4, chans[li], chans[li + 1]),
                                     jnp.float32)
        has_bn = li in (1, 2, 3, 4)   # convs 2..5 are followed by BatchNorm2d
        gamma = jnp.ones((chans[li + 1],), jnp.float32) if has_bn else None
        beta = jnp.zeros((chans[li + 1],), jnp.float32) if has_bn else None
        params.append((w, gamma, beta))
    return params


def discriminator_forward(x_nchw, params):
    x = jnp.transpose(x_nchw, (1, 0, 2, 3))       # channel-major (C, N, H, W)
    for li in range(4):
        w, gamma, beta = params[li]
        x = conv4x4_s2_layer(x, w, gamma, beta)
    w4, g4, b4 = params[4]
    w5, _, _ = params[5]
    return tail_layer(x, w4, g4, b4, w5)


# Pure-JAX reference (self-check against the PyTorch semantics).
def reference_forward(x, params):
    y = x
    strides = [2, 2, 2, 2, 2, 1]
    pads = [1, 1, 1, 1, 1, 0]
    for li, (w, gamma, beta) in enumerate(params):
        y = jax.lax.conv_general_dilated(
            y, w, window_strides=(strides[li], strides[li]),
            padding=[(pads[li], pads[li])] * 2,
            dimension_numbers=("NCHW", "HWIO", "NCHW"))
        if gamma is not None:
            mean = jnp.mean(y, axis=(0, 2, 3), keepdims=True)
            var = jnp.mean((y - mean) ** 2, axis=(0, 2, 3), keepdims=True)
            y = (y - mean) * jax.lax.rsqrt(var + 1e-5)
            y = y * gamma.reshape(1, -1, 1, 1) + beta.reshape(1, -1, 1, 1)
        if li < 5:
            y = jnp.where(y > 0, y, 0.2 * y)
        else:
            y = jax.nn.sigmoid(y)
    return y


if __name__ == "__main__":
    nc, ndf = 3, 8
    batch, spatial = 2, 128   # DCGAN-D with 6 convs needs 128x128 -> 1x1 output
    key = jax.random.PRNGKey(0)
    key, xk = jax.random.split(key)
    x = jax.random.normal(xk, (batch, nc, spatial, spatial), jnp.float32)
    params = init_params(key, nc, ndf)

    fwd = jax.jit(lambda inp: discriminator_forward(inp, params))
    out = jax.block_until_ready(fwd(x))

    assert out.shape == (batch, 1, 1, 1), out.shape
    assert bool(jnp.all((out >= 0.0) & (out <= 1.0)))

    ref = jax.jit(lambda inp: reference_forward(inp, params))(x)
    err = float(jnp.max(jnp.abs(out - ref)))
    assert err < 5e-2, f"max abs diff vs reference = {err}"
    print("KERNEL_OK")
</pallas_src>

<mosaic_0001>
module attributes {stable_mosaic.version = 11 : i64} {
  func.func @_conv_lrelu_kernel(%arg0: i32, %arg1: memref<48x4096xbf16, #tpu.memory_space<vmem>>, %arg2: memref<4x48xbf16, #tpu.memory_space<vmem>>, %arg3: memref<4x4096xbf16, #tpu.memory_space<vmem>>) attributes {dimension_semantics = [#tpu.dimension_semantics<parallel>], iteration_bounds = array<i64: 2>, scalar_prefetch = 0 : i64, scratch_operands = 0 : i64, tpu.core_type = #tpu.core_type<tc>, window_params = [{transform_indices = @transform_0, window_bounds = array<i64: 48, 4096>}, {pipeline_mode = #tpu.pipeline_mode<synchronous>, transform_indices = @transform_1, window_bounds = array<i64: 4, 48>}, {transform_indices = @transform_2, window_bounds = array<i64: 4, 4096>}]} {
    %c0 = arith.constant 0 : index
    %c0_0 = arith.constant 0 : index
    %0 = vector.load %arg2[%c0, %c0_0] : memref<4x48xbf16, #tpu.memory_space<vmem>>, vector<4x48xbf16>
    %c0_1 = arith.constant 0 : index
    %c0_2 = arith.constant 0 : index
    %1 = vector.load %arg1[%c0_1, %c0_2] : memref<48x4096xbf16, #tpu.memory_space<vmem>>, vector<48x4096xbf16>
    %cst = arith.constant dense<0.000000e+00> : vector<4x4096xf32>
    %2 = tpu.matmul %0, %1, %cst {dimension_numbers = #tpu.dot_dimension_numbers<[1], [0], [0], [1], [0, 0, 1, 1], [], []>} : vector<4x48xbf16>, vector<48x4096xbf16>, vector<4x4096xf32> -> vector<4x4096xf32>
    %cst_3 = arith.constant 0.000000e+00 : f32
    %3 = vector.broadcast %cst_3 : f32 to vector<4x4096xf32>
    %4 = arith.cmpf ogt, %2, %3 : vector<4x4096xf32>
    %cst_4 = arith.constant 2.000000e-01 : f32
    %5 = vector.broadcast %cst_4 : f32 to vector<4x4096xf32>
    %6 = arith.mulf %5, %2 : vector<4x4096xf32>
    %7 = arith.select %4, %2, %6 : vector<4x4096xi1>, vector<4x4096xf32>
    %8 = arith.truncf %7 : vector<4x4096xf32> to vector<4x4096xbf16>
    %c0_5 = arith.constant 0 : index
    %c0_6 = arith.constant 0 : index
    %9 = vector.load %arg3[%c0_5, %c0_6] : memref<4x4096xbf16, #tpu.memory_space<vmem>>, vector<4x4096xbf16>
    tpu.vector_store %arg3[%c0_5, %c0_6], %8 {strides = array<i32>} : memref<4x4096xbf16, #tpu.memory_space<vmem>>, vector<4x4096xbf16>,
    return
  }
  func.func @transform_0(%arg0: i32) -> (i32, i32) {
    %c0_i32 = arith.constant 0 : i32
    %c0_i32_0 = arith.constant 0 : i32
    return %c0_i32, %arg0 : i32, i32
  }
  func.func @transform_1(%arg0: i32) -> (i32, i32) {
    %c0_i32 = arith.constant 0 : i32
    %c0_i32_0 = arith.constant 0 : i32
    %c0_i32_1 = arith.constant 0 : i32
    return %c0_i32, %c0_i32_0 : i32, i32
  }
  func.func @transform_2(%arg0: i32) -> (i32, i32) {
    %c0_i32 = arith.constant 0 : i32
    %c0_i32_0 = arith.constant 0 : i32
    return %c0_i32, %arg0 : i32, i32
  }
}

module attributes {stable_mosaic.version = 11 : i64} {
  func.func @_conv_bn_lrelu_kernel(%arg0: i32, %arg1: memref<64x2048xbf16, #tpu.memory_space<vmem>>, %arg2: memref<8x64xbf16, #tpu.memory_space<vmem>>, %arg3: memref<8x1xf32, #tpu.memory_space<vmem>>, %arg4: memref<8x1xf32, #tpu.memory_space<vmem>>, %arg5: memref<8x2048xbf16, #tpu.memory_space<vmem>>) attributes {dimension_semantics = [#tpu.dimension_semantics<parallel>], iteration_bounds = array<i64: 1>, scalar_prefetch = 0 : i64, scratch_operands = 0 : i64, tpu.core_type = #tpu.core_type<tc>, window_params = [{pipeline_mode = #tpu.pipeline_mode<synchronous>, transform_indices = @transform_0, window_bounds = array<i64: 64, 2048>}, {transform_indices = @transform_1, window_bounds = array<i64: 8, 64>}, {transform_indices = @transform_2, window_bounds = array<i64: 8, 1>}, {transform_indices = @transform_3, window_bounds = array<i64: 8, 1>}, {transform_indices = @transform_4, window_bounds = array<i64: 8, 2048>}]} {
    %c0 = arith.constant 0 : index
    %c0_0 = arith.constant 0 : index
    %0 = vector.load %arg2[%c0, %c0_0] : memref<8x64xbf16, #tpu.memory_space<vmem>>, vector<8x64xbf16>
    %c0_1 = arith.constant 0 : index
    %c0_2 = arith.constant 0 : index
    %1 = vector.load %arg1[%c0_1, %c0_2] : memref<64x2048xbf16, #tpu.memory_space<vmem>>, vector<64x2048xbf16>
    %cst = arith.constant dense<0.000000e+00> : vector<8x2048xf32>
    %2 = tpu.matmul %0, %1, %cst {dimension_numbers = #tpu.dot_dimension_numbers<[1], [0], [0], [1], [0, 0, 1, 1], [], []>} : vector<8x64xbf16>, vector<64x2048xbf16>, vector<8x2048xf32> -> vector<8x2048xf32>
    %cst_3 = arith.constant dense<0.000000e+00> : vector<8xf32>
    %3 = vector.multi_reduction <add>, %2, %cst_3 [1] : vector<8x2048xf32> to vector<8xf32>
    %4 = vector.shape_cast %3 : vector<8xf32> to vector<8x1xf32>
    %cst_4 = arith.constant 4.8828125E-4 : f32
    %5 = vector.broadcast %cst_4 : f32 to vector<8x1xf32>
    %6 = arith.mulf %4, %5 : vector<8x1xf32>
    %7 = vector.broadcast %6 : vector<8x1xf32> to vector<8x2048xf32>
    %8 = arith.subf %2, %7 : vector<8x2048xf32>
    %9 = arith.mulf %8, %8 : vector<8x2048xf32>
    %cst_5 = arith.constant dense<0.000000e+00> : vector<8xf32>
    %10 = vector.multi_reduction <add>, %9, %cst_5 [1] : vector<8x2048xf32> to vector<8xf32>
    %11 = vector.shape_cast %10 : vector<8xf32> to vector<8x1xf32>
    %cst_6 = arith.constant 4.8828125E-4 : f32
    %12 = vector.broadcast %cst_6 : f32 to vector<8x1xf32>
    %13 = arith.mulf %11, %12 : vector<8x1xf32>
    %c0_7 = arith.constant 0 : index
    %c0_8 = arith.constant 0 : index
    %14 = vector.load %arg3[%c0_7, %c0_8] : memref<8x1xf32, #tpu.memory_space<vmem>>, vector<8x1xf32>
    %cst_9 = arith.constant 9.99999974E-6 : f32
    %15 = vector.broadcast %cst_9 : f32 to vector<8x1xf32>
    %16 = arith.addf %13, %15 : vector<8x1xf32>
    %17 = math.rsqrt %16 : vector<8x1xf32>
    %18 = arith.mulf %14, %17 : vector<8x1xf32>
    %19 = vector.broadcast %18 : vector<8x1xf32> to vector<8x2048xf32>
    %20 = arith.mulf %8, %19 : vector<8x2048xf32>
    %c0_10 = arith.constant 0 : index
    %c0_11 = arith.constant 0 : index
    %21 = vector.load %arg4[%c0_10, %c0_11] : memref<8x1xf32, #tpu.memory_space<vmem>>, vector<8x1xf32>
    %22 = vector.broadcast %21 : vector<8x1xf32> to vector<8x2048xf32>
    %23 = arith.addf %20, %22 : vector<8x2048xf32>
    %cst_12 = arith.constant 0.000000e+00 : f32
    %24 = vector.broadcast %cst_12 : f32 to vector<8x2048xf32>
    %25 = arith.cmpf ogt, %23, %24 : vector<8x2048xf32>
    %cst_13 = arith.constant 2.000000e-01 : f32
    %26 = vector.broadcast %cst_13 : f32 to vector<8x2048xf32>
    %27 = arith.mulf %26, %23 : vector<8x2048xf32>
    %28 = arith.select %25, %23, %27 : vector<8x2048xi1>, vector<8x2048xf32>
    %29 = arith.truncf %28 : vector<8x2048xf32> to vector<8x2048xbf16>
    %c0_14 = arith.constant 0 : index
    %c0_15 = arith.constant 0 : index
    %30 = vector.load %arg5[%c0_14, %c0_15] : memref<8x2048xbf16, #tpu.memory_space<vmem>>, vector<8x2048xbf16>
    tpu.vector_store %arg5[%c0_14, %c0_15], %29 {strides = array<i32>} : memref<8x2048xbf16, #tpu.memory_space<vmem>>, vector<8x2048xbf16>,
    return
  }
  func.func @transform_0(%arg0: i32) -> (i32, i32) {
    %c0_i32 = arith.constant 0 : i32
    %c0_i32_0 = arith.constant 0 : i32
    %c0_i32_1 = arith.constant 0 : i32
    return %c0_i32, %c0_i32_0 : i32, i32
  }
  func.func @transform_1(%arg0: i32) -> (i32, i32) {
    %c0_i32 = arith.constant 0 : i32
    %c0_i32_0 = arith.constant 0 : i32
    return %arg0, %c0_i32 : i32, i32
  }
  func.func @transform_2(%arg0: i32) -> (i32, i32) {
    %c0_i32 = arith.constant 0 : i32
    %c0_i32_0 = arith.constant 0 : i32
    return %arg0, %c0_i32 : i32, i32
  }
  func.func @transform_3(%arg0: i32) -> (i32, i32) {
    %c0_i32 = arith.constant 0 : i32
    %c0_i32_0 = arith.constant 0 : i32
    return %arg0, %c0_i32 : i32, i32
  }
  func.func @transform_4(%arg0: i32) -> (i32, i32) {
    %c0_i32 = arith.constant 0 : i32
    %c0_i32_0 = arith.constant 0 : i32
    return %arg0, %c0_i32 : i32, i32
  }
}

module attributes {stable_mosaic.version = 11 : i64} {
  func.func @_conv_bn_lrelu_kernel(%arg0: i32, %arg1: memref<128x512xbf16, #tpu.memory_space<vmem>>, %arg2: memref<8x128xbf16, #tpu.memory_space<vmem>>, %arg3: memref<8x1xf32, #tpu.memory_space<vmem>>, %arg4: memref<8x1xf32, #tpu.memory_space<vmem>>, %arg5: memref<8x512xbf16, #tpu.memory_space<vmem>>) attributes {dimension_semantics = [#tpu.dimension_semantics<parallel>], iteration_bounds = array<i64: 2>, scalar_prefetch = 0 : i64, scratch_operands = 0 : i64, tpu.core_type = #tpu.core_type<tc>, window_params = [{pipeline_mode = #tpu.pipeline_mode<synchronous>, transform_indices = @transform_0, window_bounds = array<i64: 128, 512>}, {transform_indices = @transform_1, window_bounds = array<i64: 8, 128>}, {transform_indices = @transform_2, window_bounds = array<i64: 8, 1>}, {transform_indices = @transform_3, window_bounds = array<i64: 8, 1>}, {transform_indices = @transform_4, window_bounds = array<i64: 8, 512>}]} {
    %c0 = arith.constant 0 : index
    %c0_0 = arith.constant 0 : index
    %0 = vector.load %arg2[%c0, %c0_0] : memref<8x128xbf16, #tpu.memory_space<vmem>>, vector<8x128xbf16>
    %c0_1 = arith.constant 0 : index
    %c0_2 = arith.constant 0 : index
    %1 = vector.load %arg1[%c0_1, %c0_2] : memref<128x512xbf16, #tpu.memory_space<vmem>>, vector<128x512xbf16>
    %cst = arith.constant dense<0.000000e+00> : vector<8x512xf32>
    %2 = tpu.matmul %0, %1, %cst {dimension_numbers = #tpu.dot_dimension_numbers<[1], [0], [0], [1], [0, 0, 1, 1], [], []>} : vector<8x128xbf16>, vector<128x512xbf16>, vector<8x512xf32> -> vector<8x512xf32>
    %cst_3 = arith.constant dense<0.000000e+00> : vector<8xf32>
    %3 = vector.multi_reduction <add>, %2, %cst_3 [1] : vector<8x512xf32> to vector<8xf32>
    %4 = vector.shape_cast %3 : vector<8xf32> to vector<8x1xf32>
    %cst_4 = arith.constant 0.001953125 : f32
    %5 = vector.broadcast %cst_4 : f32 to vector<8x1xf32>
    %6 = arith.mulf %4, %5 : vector<8x1xf32>
    %7 = vector.broadcast %6 : vector<8x1xf32> to vector<8x512xf32>
    %8 = arith.subf %2, %7 : vector<8x512xf32>
    %9 = arith.mulf %8, %8 : vector<8x512xf32>
    %cst_5 = arith.constant dense<0.000000e+00> : vector<8xf32>
    %10 = vector.multi_reduction <add>, %9, %cst_5 [1] : vector<8x512xf32> to vector<8xf32>
    %11 = vector.shape_cast %10 : vector<8xf32> to vector<8x1xf32>
    %cst_6 = arith.constant 0.001953125 : f32
    %12 = vector.broadcast %cst_6 : f32 to vector<8x1xf32>
    %13 = arith.mulf %11, %12 : vector<8x1xf32>
    %c0_7 = arith.constant 0 : index
    %c0_8 = arith.constant 0 : index
    %14 = vector.load %arg3[%c0_7, %c0_8] : memref<8x1xf32, #tpu.memory_space<vmem>>, vector<8x1xf32>
    %cst_9 = arith.constant 9.99999974E-6 : f32
    %15 = vector.broadcast %cst_9 : f32 to vector<8x1xf32>
    %16 = arith.addf %13, %15 : vector<8x1xf32>
    %17 = math.rsqrt %16 : vector<8x1xf32>
    %18 = arith.mulf %14, %17 : vector<8x1xf32>
    %19 = vector.broadcast %18 : vector<8x1xf32> to vector<8x512xf32>
    %20 = arith.mulf %8, %19 : vector<8x512xf32>
    %c0_10 = arith.constant 0 : index
    %c0_11 = arith.constant 0 : index
    %21 = vector.load %arg4[%c0_10, %c0_11] : memref<8x1xf32, #tpu.memory_space<vmem>>, vector<8x1xf32>
    %22 = vector.broadcast %21 : vector<8x1xf32> to vector<8x512xf32>
    %23 = arith.addf %20, %22 : vector<8x512xf32>
    %cst_12 = arith.constant 0.000000e+00 : f32
    %24 = vector.broadcast %cst_12 : f32 to vector<8x512xf32>
    %25 = arith.cmpf ogt, %23, %24 : vector<8x512xf32>
    %cst_13 = arith.constant 2.000000e-01 : f32
    %26 = vector.broadcast %cst_13 : f32 to vector<8x512xf32>
    %27 = arith.mulf %26, %23 : vector<8x512xf32>
    %28 = arith.select %25, %23, %27 : vector<8x512xi1>, vector<8x512xf32>
    %29 = arith.truncf %28 : vector<8x512xf32> to vector<8x512xbf16>
    %c0_14 = arith.constant 0 : index
    %c0_15 = arith.constant 0 : index
    %30 = vector.load %arg5[%c0_14, %c0_15] : memref<8x512xbf16, #tpu.memory_space<vmem>>, vector<8x512xbf16>
    tpu.vector_store %arg5[%c0_14, %c0_15], %29 {strides = array<i32>} : memref<8x512xbf16, #tpu.memory_space<vmem>>, vector<8x512xbf16>,
    return
  }
  func.func @transform_0(%arg0: i32) -> (i32, i32) {
    %c0_i32 = arith.constant 0 : i32
    %c0_i32_0 = arith.constant 0 : i32
    %c0_i32_1 = arith.constant 0 : i32
    return %c0_i32, %c0_i32_0 : i32, i32
  }
  func.func @transform_1(%arg0: i32) -> (i32, i32) {
    %c0_i32 = arith.constant 0 : i32
    %c0_i32_0 = arith.constant 0 : i32
    return %arg0, %c0_i32 : i32, i32
  }
  func.func @transform_2(%arg0: i32) -> (i32, i32) {
    %c0_i32 = arith.constant 0 : i32
    %c0_i32_0 = arith.constant 0 : i32
    return %arg0, %c0_i32 : i32, i32
  }
  func.func @transform_3(%arg0: i32) -> (i32, i32) {
    %c0_i32 = arith.constant 0 : i32
    %c0_i32_0 = arith.constant 0 : i32
    return %arg0, %c0_i32 : i32, i32
  }
  func.func @transform_4(%arg0: i32) -> (i32, i32) {
    %c0_i32 = arith.constant 0 : i32
    %c0_i32_0 = arith.constant 0 : i32
    return %arg0, %c0_i32 : i32, i32
  }
}

module attributes {stable_mosaic.version = 11 : i64} {
  func.func @_conv_bn_lrelu_kernel(%arg0: i32, %arg1: memref<256x128xbf16, #tpu.memory_space<vmem>>, %arg2: memref<16x256xbf16, #tpu.memory_space<vmem>>, %arg3: memref<16x1xf32, #tpu.memory_space<vmem>>, %arg4: memref<16x1xf32, #tpu.memory_space<vmem>>, %arg5: memref<16x128xbf16, #tpu.memory_space<vmem>>) attributes {dimension_semantics = [#tpu.dimension_semantics<parallel>], iteration_bounds = array<i64: 2>, scalar_prefetch = 0 : i64, scratch_operands = 0 : i64, tpu.core_type = #tpu.core_type<tc>, window_params = [{pipeline_mode = #tpu.pipeline_mode<synchronous>, transform_indices = @transform_0, window_bounds = array<i64: 256, 128>}, {transform_indices = @transform_1, window_bounds = array<i64: 16, 256>}, {transform_indices = @transform_2, window_bounds = array<i64: 16, 1>}, {transform_indices = @transform_3, window_bounds = array<i64: 16, 1>}, {transform_indices = @transform_4, window_bounds = array<i64: 16, 128>}]} {
    %c0 = arith.constant 0 : index
    %c0_0 = arith.constant 0 : index
    %0 = vector.load %arg2[%c0, %c0_0] : memref<16x256xbf16, #tpu.memory_space<vmem>>, vector<16x256xbf16>
    %c0_1 = arith.constant 0 : index
    %c0_2 = arith.constant 0 : index
    %1 = vector.load %arg1[%c0_1, %c0_2] : memref<256x128xbf16, #tpu.memory_space<vmem>>, vector<256x128xbf16>
    %cst = arith.constant dense<0.000000e+00> : vector<16x128xf32>
    %2 = tpu.matmul %0, %1, %cst {dimension_numbers = #tpu.dot_dimension_numbers<[1], [0], [0], [1], [0, 0, 1, 1], [], []>} : vector<16x256xbf16>, vector<256x128xbf16>, vector<16x128xf32> -> vector<16x128xf32>
    %cst_3 = arith.constant dense<0.000000e+00> : vector<16xf32>
    %3 = vector.multi_reduction <add>, %2, %cst_3 [1] : vector<16x128xf32> to vector<16xf32>
    %4 = vector.shape_cast %3 : vector<16xf32> to vector<16x1xf32>
    %cst_4 = arith.constant 7.812500e-03 : f32
    %5 = vector.broadcast %cst_4 : f32 to vector<16x1xf32>
    %6 = arith.mulf %4, %5 : vector<16x1xf32>
    %7 = vector.broadcast %6 : vector<16x1xf32> to vector<16x128xf32>
    %8 = arith.subf %2, %7 : vector<16x128xf32>
    %9 = arith.mulf %8, %8 : vector<16x128xf32>
    %cst_5 = arith.constant dense<0.000000e+00> : vector<16xf32>
    %10 = vector.multi_reduction <add>, %9, %cst_5 [1] : vector<16x128xf32> to vector<16xf32>
    %11 = vector.shape_cast %10 : vector<16xf32> to vector<16x1xf32>
    %cst_6 = arith.constant 7.812500e-03 : f32
    %12 = vector.broadcast %cst_6 : f32 to vector<16x1xf32>
    %13 = arith.mulf %11, %12 : vector<16x1xf32>
    %c0_7 = arith.constant 0 : index
    %c0_8 = arith.constant 0 : index
    %14 = vector.load %arg3[%c0_7, %c0_8] : memref<16x1xf32, #tpu.memory_space<vmem>>, vector<16x1xf32>
    %cst_9 = arith.constant 9.99999974E-6 : f32
    %15 = vector.broadcast %cst_9 : f32 to vector<16x1xf32>
    %16 = arith.addf %13, %15 : vector<16x1xf32>
    %17 = math.rsqrt %16 : vector<16x1xf32>
    %18 = arith.mulf %14, %17 : vector<16x1xf32>
    %19 = vector.broadcast %18 : vector<16x1xf32> to vector<16x128xf32>
    %20 = arith.mulf %8, %19 : vector<16x128xf32>
    %c0_10 = arith.constant 0 : index
    %c0_11 = arith.constant 0 : index
    %21 = vector.load %arg4[%c0_10, %c0_11] : memref<16x1xf32, #tpu.memory_space<vmem>>, vector<16x1xf32>
    %22 = vector.broadcast %21 : vector<16x1xf32> to vector<16x128xf32>
    %23 = arith.addf %20, %22 : vector<16x128xf32>
    %cst_12 = arith.constant 0.000000e+00 : f32
    %24 = vector.broadcast %cst_12 : f32 to vector<16x128xf32>
    %25 = arith.cmpf ogt, %23, %24 : vector<16x128xf32>
    %cst_13 = arith.constant 2.000000e-01 : f32
    %26 = vector.broadcast %cst_13 : f32 to vector<16x128xf32>
    %27 = arith.mulf %26, %23 : vector<16x128xf32>
    %28 = arith.select %25, %23, %27 : vector<16x128xi1>, vector<16x128xf32>
    %29 = arith.truncf %28 : vector<16x128xf32> to vector<16x128xbf16>
    %c0_14 = arith.constant 0 : index
    %c0_15 = arith.constant 0 : index
    %30 = vector.load %arg5[%c0_14, %c0_15] : memref<16x128xbf16, #tpu.memory_space<vmem>>, vector<16x128xbf16>
    tpu.vector_store %arg5[%c0_14, %c0_15], %29 {strides = array<i32>} : memref<16x128xbf16, #tpu.memory_space<vmem>>, vector<16x128xbf16>,
    return
  }
  func.func @transform_0(%arg0: i32) -> (i32, i32) {
    %c0_i32 = arith.constant 0 : i32
    %c0_i32_0 = arith.constant 0 : i32
    %c0_i32_1 = arith.constant 0 : i32
    return %c0_i32, %c0_i32_0 : i32, i32
  }
  func.func @transform_1(%arg0: i32) -> (i32, i32) {
    %c0_i32 = arith.constant 0 : i32
    %c0_i32_0 = arith.constant 0 : i32
    return %arg0, %c0_i32 : i32, i32
  }
  func.func @transform_2(%arg0: i32) -> (i32, i32) {
    %c0_i32 = arith.constant 0 : i32
    %c0_i32_0 = arith.constant 0 : i32
    return %arg0, %c0_i32 : i32, i32
  }
  func.func @transform_3(%arg0: i32) -> (i32, i32) {
    %c0_i32 = arith.constant 0 : i32
    %c0_i32_0 = arith.constant 0 : i32
    return %arg0, %c0_i32 : i32, i32
  }
  func.func @transform_4(%arg0: i32) -> (i32, i32) {
    %c0_i32 = arith.constant 0 : i32
    %c0_i32_0 = arith.constant 0 : i32
    return %arg0, %c0_i32 : i32, i32
  }
}

module attributes {stable_mosaic.version = 11 : i64} {
  func.func @_tail_kernel(%arg0: i32, %arg1: memref<512x32xbf16, #tpu.memory_space<vmem>>, %arg2: memref<64x512xbf16, #tpu.memory_space<vmem>>, %arg3: memref<64x1xf32, #tpu.memory_space<vmem>>, %arg4: memref<64x1xf32, #tpu.memory_space<vmem>>, %arg5: memref<64x32xf32, #tpu.memory_space<vmem>>, %arg6: memref<32x2xf32, #tpu.memory_space<vmem>>, %arg7: memref<1x2xf32, #tpu.memory_space<vmem>>) attributes {dimension_semantics = [#tpu.dimension_semantics<arbitrary>], iteration_bounds = array<i64: 1>, scalar_prefetch = 0 : i64, scratch_operands = 0 : i64, tpu.core_type = #tpu.core_type<tc>, window_params = [{pipeline_mode = #tpu.pipeline_mode<synchronous>, transform_indices = @transform_0, window_bounds = array<i64: 512, 32>}, {pipeline_mode = #tpu.pipeline_mode<synchronous>, transform_indices = @transform_1, window_bounds = array<i64: 64, 512>}, {pipeline_mode = #tpu.pipeline_mode<synchronous>, transform_indices = @transform_2, window_bounds = array<i64: 64, 1>}, {pipeline_mode = #tpu.pipeline_mode<synchronous>, transform_indices = @transform_3, window_bounds = array<i64: 64, 1>}, {pipeline_mode = #tpu.pipeline_mode<synchronous>, transform_indices = @transform_4, window_bounds = array<i64: 64, 32>}, {pipeline_mode = #tpu.pipeline_mode<synchronous>, transform_indices = @transform_5, window_bounds = array<i64: 32, 2>}, {pipeline_mode = #tpu.pipeline_mode<synchronous>, transform_indices = @transform_6, window_bounds = array<i64: 1, 2>}]} {
    %c0 = arith.constant 0 : index
    %c0_0 = arith.constant 0 : index
    %0 = vector.load %arg2[%c0, %c0_0] : memref<64x512xbf16, #tpu.memory_space<vmem>>, vector<64x512xbf16>
    %c0_1 = arith.constant 0 : index
    %c0_2 = arith.constant 0 : index
    %1 = vector.load %arg1[%c0_1, %c0_2] : memref<512x32xbf16, #tpu.memory_space<vmem>>, vector<512x32xbf16>
    %cst = arith.constant dense<0.000000e+00> : vector<64x32xf32>
    %2 = tpu.matmul %0, %1, %cst {dimension_numbers = #tpu.dot_dimension_numbers<[1], [0], [0], [1], [0, 0, 1, 1], [], []>} : vector<64x512xbf16>, vector<512x32xbf16>, vector<64x32xf32> -> vector<64x32xf32>
    %cst_3 = arith.constant dense<0.000000e+00> : vector<64xf32>
    %3 = vector.multi_reduction <add>, %2, %cst_3 [1] : vector<64x32xf32> to vector<64xf32>
    %4 = vector.shape_cast %3 : vector<64xf32> to vector<64x1xf32>
    %cst_4 = arith.constant 3.125000e-02 : f32
    %5 = vector.broadcast %cst_4 : f32 to vector<64x1xf32>
    %6 = arith.mulf %4, %5 : vector<64x1xf32>
    %7 = vector.broadcast %6 : vector<64x1xf32> to vector<64x32xf32>
    %8 = arith.subf %2, %7 : vector<64x32xf32>
    %9 = arith.mulf %8, %8 : vector<64x32xf32>
    %cst_5 = arith.constant dense<0.000000e+00> : vector<64xf32>
    %10 = vector.multi_reduction <add>, %9, %cst_5 [1] : vector<64x32xf32> to vector<64xf32>
    %11 = vector.shape_cast %10 : vector<64xf32> to vector<64x1xf32>
    %cst_6 = arith.constant 3.125000e-02 : f32
    %12 = vector.broadcast %cst_6 : f32 to vector<64x1xf32>
    %13 = arith.mulf %11, %12 : vector<64x1xf32>
    %c0_7 = arith.constant 0 : index
    %c0_8 = arith.constant 0 : index
    %14 = vector.load %arg3[%c0_7, %c0_8] : memref<64x1xf32, #tpu.memory_space<vmem>>, vector<64x1xf32>
    %cst_9 = arith.constant 9.99999974E-6 : f32
    %15 = vector.broadcast %cst_9 : f32 to vector<64x1xf32>
    %16 = arith.addf %13, %15 : vector<64x1xf32>
    %17 = math.rsqrt %16 : vector<64x1xf32>
    %18 = arith.mulf %14, %17 : vector<64x1xf32>
    %19 = vector.broadcast %18 : vector<64x1xf32> to vector<64x32xf32>
    %20 = arith.mulf %8, %19 : vector<64x32xf32>
    %c0_10 = arith.constant 0 : index
    %c0_11 = arith.constant 0 : index
    %21 = vector.load %arg4[%c0_10, %c0_11] : memref<64x1xf32, #tpu.memory_space<vmem>>, vector<64x1xf32>
    %22 = vector.broadcast %21 : vector<64x1xf32> to vector<64x32xf32>
    %23 = arith.addf %20, %22 : vector<64x32xf32>
    %cst_12 = arith.constant 0.000000e+00 : f32
    %24 = vector.broadcast %cst_12 : f32 to vector<64x32xf32>
    %25 = arith.cmpf ogt, %23, %24 : vector<64x32xf32>
    %cst_13 = arith.constant 2.000000e-01 : f32
    %26 = vector.broadcast %cst_13 : f32 to vector<64x32xf32>
    %27 = arith.mulf %26, %23 : vector<64x32xf32>
    %28 = arith.select %25, %23, %27 : vector<64x32xi1>, vector<64x32xf32>
    %c0_14 = arith.constant 0 : index
    %c0_15 = arith.constant 0 : index
    %29 = vector.load %arg5[%c0_14, %c0_15] : memref<64x32xf32, #tpu.memory_space<vmem>>, vector<64x32xf32>
    %30 = arith.mulf %28, %29 : vector<64x32xf32>
    %cst_16 = arith.constant dense<0.000000e+00> : vector<32xf32>
    %31 = vector.multi_reduction <add>, %30, %cst_16 [0] : vector<64x32xf32> to vector<32xf32>
    %32 = vector.shape_cast %31 : vector<32xf32> to vector<1x32xf32>
    %c0_17 = arith.constant 0 : index
    %c0_18 = arith.constant 0 : index
    %33 = vector.load %arg6[%c0_17, %c0_18] : memref<32x2xf32, #tpu.memory_space<vmem>>, vector<32x2xf32>
    %cst_19 = arith.constant dense<0.000000e+00> : vector<1x2xf32>
    %34 = tpu.matmul %32, %33, %cst_19 {dimension_numbers = #tpu.dot_dimension_numbers<[1], [0], [0], [1], [0, 0, 1, 1], [], []>} : vector<1x32xf32>, vector<32x2xf32>, vector<1x2xf32> -> vector<1x2xf32>
    %cst_20 = arith.constant 0.000000e+00 : f32
    %35 = vector.broadcast %cst_20 : f32 to vector<1x2xf32>
    %36 = arith.subf %35, %34 : vector<1x2xf32>
    %37 = math.exp %36 : vector<1x2xf32>
    %cst_21 = arith.constant 1.000000e+00 : f32
    %38 = vector.broadcast %cst_21 : f32 to vector<1x2xf32>
    %39 = arith.addf %38, %37 : vector<1x2xf32>
    %cst_22 = arith.constant 1.000000e+00 : f32
    %40 = vector.broadcast %cst_22 : f32 to vector<1x2xf32>
    %41 = arith.divf %40, %39 : vector<1x2xf32>
    %c0_23 = arith.constant 0 : index
    %c0_24 = arith.constant 0 : index
    %42 = vector.load %arg7[%c0_23, %c0_24] : memref<1x2xf32, #tpu.memory_space<vmem>>, vector<1x2xf32>
    tpu.vector_store %arg7[%c0_23, %c0_24], %41 {strides = array<i32>} : memref<1x2xf32, #tpu.memory_space<vmem>>, vector<1x2xf32>,
    return
  }
  func.func @transform_0(%arg0: i32) -> (i32, i32) {
    %c0_i32 = arith.constant 0 : i32
    %c0_i32_0 = arith.constant 0 : i32
    %c0_i32_1 = arith.constant 0 : i32
    return %c0_i32, %c0_i32_0 : i32, i32
  }
  func.func @transform_1(%arg0: i32) -> (i32, i32) {
    %c0_i32 = arith.constant 0 : i32
    %c0_i32_0 = arith.constant 0 : i32
    %c0_i32_1 = arith.constant 0 : i32
    return %c0_i32, %c0_i32_0 : i32, i32
  }
  func.func @transform_2(%arg0: i32) -> (i32, i32) {
    %c0_i32 = arith.constant 0 : i32
    %c0_i32_0 = arith.constant 0 : i32
    %c0_i32_1 = arith.constant 0 : i32
    return %c0_i32, %c0_i32_0 : i32, i32
  }
  func.func @transform_3(%arg0: i32) -> (i32, i32) {
    %c0_i32 = arith.constant 0 : i32
    %c0_i32_0 = arith.constant 0 : i32
    %c0_i32_1 = arith.constant 0 : i32
    return %c0_i32, %c0_i32_0 : i32, i32
  }
  func.func @transform_4(%arg0: i32) -> (i32, i32) {
    %c0_i32 = arith.constant 0 : i32
    %c0_i32_0 = arith.constant 0 : i32
    %c0_i32_1 = arith.constant 0 : i32
    return %c0_i32, %c0_i32_0 : i32, i32
  }
  func.func @transform_5(%arg0: i32) -> (i32, i32) {
    %c0_i32 = arith.constant 0 : i32
    %c0_i32_0 = arith.constant 0 : i32
    %c0_i32_1 = arith.constant 0 : i32
    return %c0_i32, %c0_i32_0 : i32, i32
  }
  func.func @transform_6(%arg0: i32) -> (i32, i32) {
    %c0_i32 = arith.constant 0 : i32
    %c0_i32_0 = arith.constant 0 : i32
    %c0_i32_1 = arith.constant 0 : i32
    return %c0_i32, %c0_i32_0 : i32, i32
  }
}

</mosaic_0001>

<bundles_post_ra>
// kernel: _lambda_.5
= control target key start
LH: loop header
LB: loop body
LE: loop exit
PB: predicated region body
PF: predicated region fallthrough
CT: control target
= control target key end

     0   :  { %s2177_s9 = smov 0   ;;  %s2179_s10 = smov 0   ;;  %s2604_s0 = inlined_call_operand.vmem [shape: bf16[48,8192], index: 0, kind: input, shape index: {}]   ;;  %s2605_s1 = inlined_call_operand.vmem [shape: bf16[4,48], index: 1, kind: input, shape index: {}]   ;;  %s2606_s2 = inlined_call_operand.vmem [shape: bf16[4,8192], index: 2, kind: output, shape index: {}]  }
   0x1   :  { %s2181_s11 = smov 0  }
   0x2 LB: > { %s1968_s12 = sadd.s32 4294967295, %s2158_s11   ;;  %s2194_s13 = sadd.s32 1, %s2158_s11   ;;  %s2158_s11 = sphi %s2181_s11, %s2609_s11   ;;  %s2154_s10 = sphi %s2179_s10, %s2608_s10   ;;  %s2150_s9 = sphi %s2177_s9, %s2607_s9  }
   0x3   : > { %s16_s14 = ssub.s32 %s2158_s11, %s2194_s13  ;;  %s19_s15 = sadd.s32 1, %s2154_s10 }
   0x4   : > { %p17_p0 = scmp.eq.s32.totalorder %s16_s14, 0  ;;  %p26_p1 = scmp.ne.s32.totalorder %s2154_s10, %s2150_s9 }
   0x5   : > { %p27_p2 = scmp.eq.s32.totalorder %s2158_s11, 0  ;;  %p1971_p4 = scmp.ge.s32.totalorder %s2158_s11, 2 }
   0x6   : > { %s2203_s16 = scalar_select %p17_p0, %s2154_s10, %s19_s15  }
   0x7   : > { %p28_p3 = por %p27_p2, %p26_p1  ;;  %102 = sbr.rel (%p1971_p4) target bundleno = 67 (0x43), region = 20 }
   0xe   : > { %105 = sbr.rel (!%p28_p3) target bundleno = 67 (0x43), region = 24  ;;  %s107_s17 = sand.u32 (%p28_p3), 1, %s2154_s10  }
   0xf   : > { %s2107_s18 = sshll.u32 (%p28_p3), %s2158_s11, 7  ;;  %s2108_s19 = smul.u32 (%p28_p3), 768, %s107_s17 }
  0x10   : > { %s2211_s22 = scalar_lea.vmem (%p28_p3), %s2604_s0, %s2107_s18 }
  0x11   : > { %v125_v0 = vld [vmem:[%s2211_s22] sm:$0xff] (%p28_p3)  ;;  %v127_v1 = vld [vmem:[%s2211_s22 + $0x8] sm:$0xff] (%p28_p3)  ;;  %v129_v2 = vld [vmem:[%s2211_s22 + $0x10] sm:$0xff] (%p28_p3)  ;;  %s2219_s23 = scalar_lea.vmem (%p28_p3), [#allocation2], %s2108_s19 }
  0x12   : > { %v131_v3 = vld [vmem:[%s2211_s22 + $0x18] sm:$0xff] (%p28_p3)  ;;  %v133_v4 = vld [vmem:[%s2211_s22 + $0x20] sm:$0xff] (%p28_p3)  ;;  %v135_v5 = vld [vmem:[%s2211_s22 + $0x28] sm:$0xff] (%p28_p3)  ;;  %126 = vst [vmem:[%s2219_s23] sm:$0xff] (%p28_p3), %v125_v0 }
  0x13   : > { %128 = vst [vmem:[%s2219_s23 + $0x8] sm:$0xff] (%p28_p3), %v127_v1  ;;  %130 = vst [vmem:[%s2219_s23 + $0x10] sm:$0xff] (%p28_p3), %v129_v2  ;;  %v137_v6 = vld [vmem:[%s2211_s22 + $0x30] sm:$0xff] (%p28_p3)  ;;  %v139_v7 = vld [vmem:[%s2211_s22 + $0x38] sm:$0xff] (%p28_p3) }
  0x14   : > { %132 = vst [vmem:[%s2219_s23 + $0x18] sm:$0xff] (%p28_p3), %v131_v3  ;;  %134 = vst [vmem:[%s2219_s23 + $0x20] sm:$0xff] (%p28_p3), %v133_v4  ;;  %v141_v8 = vld [vmem:[%s2211_s22 + $0x40] sm:$0xff] (%p28_p3)  ;;  %v143_v9 = vld [vmem:[%s2211_s22 + $0x48] sm:$0xff] (%p28_p3) }
  0x15   : > { %136 = vst [vmem:[%s2219_s23 + $0x28] sm:$0xff] %v135_v5  ;;  %138 = vst [vmem:[%s2219_s23 + $0x30] sm:$0xff] %v137_v6  ;;  %v145_v10 = vld [vmem:[%s2211_s22 + $0x50] sm:$0xff]  ;;  %v147_v11 = vld [vmem:[%s2211_s22 + $0x58] sm:$0xff] }
  0x16   : > { %140 = vst [vmem:[%s2219_s23 + $0x38] sm:$0xff] %v139_v7  ;;  %142 = vst [vmem:[%s2219_s23 + $0x40] sm:$0xff] %v141_v8  ;;  %v149_v12 = vld [vmem:[%s2211_s22 + $0x60] sm:$0xff]  ;;  %v151_v13 = vld [vmem:[%s2211_s22 + $0x68] sm:$0xff] }
  0x17   : > { %144 = vst [vmem:[%s2219_s23 + $0x48] sm:$0xff] %v143_v9  ;;  %146 = vst [vmem:[%s2219_s23 + $0x50] sm:$0xff] %v145_v10  ;;  %v153_v14 = vld [vmem:[%s2211_s22 + $0x70] sm:$0xff]  ;;  %v155_v15 = vld [vmem:[%s2211_s22 + $0x78] sm:$0xff] }
  0x18   : > { %148 = vst [vmem:[%s2219_s23 + $0x58] sm:$0xff] %v147_v11  ;;  %150 = vst [vmem:[%s2219_s23 + $0x60] sm:$0xff] %v149_v12  ;;  %v157_v16 = vld [vmem:[%s2211_s22 + $0x100] sm:$0xff]  ;;  %v159_v17 = vld [vmem:[%s2211_s22 + $0x108] sm:$0xff] }
  0x19   : > { %152 = vst [vmem:[%s2219_s23 + $0x68] sm:$0xff] %v151_v13  ;;  %154 = vst [vmem:[%s2219_s23 + $0x70] sm:$0xff] %v153_v14  ;;  %v161_v18 = vld [vmem:[%s2211_s22 + $0x110] sm:$0xff]  ;;  %v163_v19 = vld [vmem:[%s2211_s22 + $0x118] sm:$0xff] }
  0x1a   : > { %156 = vst [vmem:[%s2219_s23 + $0x78] sm:$0xff] %v155_v15  ;;  %158 = vst [vmem:[%s2219_s23 + $0x80] sm:$0xff] %v157_v16  ;;  %v165_v20 = vld [vmem:[%s2211_s22 + $0x120] sm:$0xff]  ;;  %v167_v21 = vld [vmem:[%s2211_s22 + $0x128] sm:$0xff] }
  0x1b   : > { %160 = vst [vmem:[%s2219_s23 + $0x88] sm:$0xff] %v159_v17  ;;  %162 = vst [vmem:[%s2219_s23 + $0x90] sm:$0xff] %v161_v18  ;;  %v169_v22 = vld [vmem:[%s2211_s22 + $0x130] sm:$0xff]  ;;  %v171_v23 = vld [vmem:[%s2211_s22 + $0x138] sm:$0xff] }
  0x1c   : > { %164 = vst [vmem:[%s2219_s23 + $0x98] sm:$0xff] %v163_v19  ;;  %166 = vst [vmem:[%s2219_s23 + $0xa0] sm:$0xff] %v165_v20  ;;  %v173_v24 = vld [vmem:[%s2211_s22 + $0x140] sm:$0xff]  ;;  %v175_v25 = vld [vmem:[%s2211_s22 + $0x148] sm:$0xff] }
  0x1d   : > { %168 = vst [vmem:[%s2219_s23 + $0xa8] sm:$0xff] %v167_v21  ;;  %170 = vst [vmem:[%s2219_s23 + $0xb0] sm:$0xff] %v169_v22  ;;  %v177_v26 = vld [vmem:[%s2211_s22 + $0x150] sm:$0xff]  ;;  %v179_v27 = vld [vmem:[%s2211_s22 + $0x158] sm:$0xff] }
  0x1e   : > { %172 = vst [vmem:[%s2219_s23 + $0xb8] sm:$0xff] %v171_v23  ;;  %174 = vst [vmem:[%s2219_s23 + $0xc0] sm:$0xff] %v173_v24  ;;  %v181_v28 = vld [vmem:[%s2211_s22 + $0x160] sm:$0xff]  ;;  %v183_v29 = vld [vmem:[%s2211_s22 + $0x168] sm:$0xff] }
  0x1f   : > { %176 = vst [vmem:[%s2219_s23 + $0xc8] sm:$0xff] %v175_v25  ;;  %178 = vst [vmem:[%s2219_s23 + $0xd0] sm:$0xff] %v177_v26  ;;  %v185_v30 = vld [vmem:[%s2211_s22 + $0x170] sm:$0xff]  ;;  %v187_v31 = vld [vmem:[%s2211_s22 + $0x178] sm:$0xff] }
  0x20   : > { %180 = vst [vmem:[%s2219_s23 + $0xd8] sm:$0xff] %v179_v27  ;;  %182 = vst [vmem:[%s2219_s23 + $0xe0] sm:$0xff] %v181_v28  ;;  %v189_v32 = vld [vmem:[%s2211_s22 + $0x200] sm:$0xff]  ;;  %v191_v33 = vld [vmem:[%s2211_s22 + $0x208] sm:$0xff] }
  0x21   : > { %184 = vst [vmem:[%s2219_s23 + $0xe8] sm:$0xff] %v183_v29  ;;  %186 = vst [vmem:[%s2219_s23 + $0xf0] sm:$0xff] %v185_v30  ;;  %v193_v34 = vld [vmem:[%s2211_s22 + $0x210] sm:$0xff]  ;;  %v195_v35 = vld [vmem:[%s2211_s22 + $0x218] sm:$0xff] }
  0x22   : > { %188 = vst [vmem:[%s2219_s23 + $0xf8] sm:$0xff] %v187_v31  ;;  %190 = vst [vmem:[%s2219_s23 + $0x100] sm:$0xff] %v189_v32  ;;  %v197_v36 = vld [vmem:[%s2211_s22 + $0x220] sm:$0xff]  ;;  %v199_v37 = vld [vmem:[%s2211_s22 + $0x228] sm:$0xff] }
  0x23   : > { %192 = vst [vmem:[%s2219_s23 + $0x108] sm:$0xff] %v191_v33  ;;  %194 = vst [vmem:[%s2219_s23 + $0x110] sm:$0xff] %v193_v34  ;;  %v201_v38 = vld [vmem:[%s2211_s22 + $0x230] sm:$0xff]  ;;  %v203_v39 = vld [vmem:[%s2211_s22 + $0x238] sm:$0xff] }
  0x24   : > { %196 = vst [vmem:[%s2219_s23 + $0x118] sm:$0xff] %v195_v35  ;;  %198 = vst [vmem:[%s2219_s23 + $0x120] sm:$0xff] %v197_v36  ;;  %v205_v40 = vld [vmem:[%s2211_s22 + $0x240] sm:$0xff]  ;;  %v207_v41 = vld [vmem:[%s2211_s22 + $0x248] sm:$0xff] }
  0x25   : > { %200 = vst [vmem:[%s2219_s23 + $0x128] sm:$0xff] %v199_v37  ;;  %202 = vst [vmem:[%s2219_s23 + $0x130] sm:$0xff] %v201_v38  ;;  %v209_v42 = vld [vmem:[%s2211_s22 + $0x250] sm:$0xff]  ;;  %v211_v43 = vld [vmem:[%s2211_s22 + $0x258] sm:$0xff] }
  0x26   : > { %204 = vst [vmem:[%s2219_s23 + $0x138] sm:$0xff] %v203_v39  ;;  %206 = vst [vmem:[%s2219_s23 + $0x140] sm:$0xff] %v205_v40  ;;  %v213_v44 = vld [vmem:[%s2211_s22 + $0x260] sm:$0xff]  ;;  %v215_v45 = vld [vmem:[%s2211_s22 + $0x268] sm:$0xff] }
  0x27   : > { %208 = vst [vmem:[%s2219_s23 + $0x148] sm:$0xff] %v207_v41  ;;  %210 = vst [vmem:[%s2219_s23 + $0x150] sm:$0xff] %v209_v42  ;;  %v217_v46 = vld [vmem:[%s2211_s22 + $0x270] sm:$0xff]  ;;  %v219_v47 = vld [vmem:[%s2211_s22 + $0x278] sm:$0xff] }
  0x28   : > { %212 = vst [vmem:[%s2219_s23 + $0x158] sm:$0xff] %v211_v43  ;;  %214 = vst [vmem:[%s2219_s23 + $0x160] sm:$0xff] %v213_v44  ;;  %v221_v48 = vld [vmem:[%s2211_s22 + $0x300] sm:$0xff]  ;;  %v223_v49 = vld [vmem:[%s2211_s22 + $0x308] sm:$0xff] }
  0x29   : > { %216 = vst [vmem:[%s2219_s23 + $0x168] sm:$0xff] %v215_v45  ;;  %218 = vst [vmem:[%s2219_s23 + $0x170] sm:$0xff] %v217_v46  ;;  %v225_v50 = vld [vmem:[%s2211_s22 + $0x310] sm:$0xff]  ;;  %v227_v51 = vld [vmem:[%s2211_s22 + $0x318] sm:$0xff] }
  0x2a   : > { %220 = vst [vmem:[%s2219_s23 + $0x178] sm:$0xff] %v219_v47  ;;  %222 = vst [vmem:[%s2219_s23 + $0x180] sm:$0xff] %v221_v48  ;;  %v229_v52 = vld [vmem:[%s2211_s22 + $0x320] sm:$0xff]  ;;  %v231_v53 = vld [vmem:[%s2211_s22 + $0x328] sm:$0xff] }
  0x2b   : > { %224 = vst [vmem:[%s2219_s23 + $0x188] sm:$0xff] %v223_v49  ;;  %226 = vst [vmem:[%s2219_s23 + $0x190] sm:$0xff] %v225_v50  ;;  %v233_v54 = vld [vmem:[%s2211_s22 + $0x330] sm:$0xff]  ;;  %v235_v55 = vld [vmem:[%s2211_s22 + $0x338] sm:$0xff] }
  0x2c   : > { %228 = vst [vmem:[%s2219_s23 + $0x198] sm:$0xff] %v227_v51  ;;  %230 = vst [vmem:[%s2219_s23 + $0x1a0] sm:$0xff] %v229_v52  ;;  %v237_v56 = vld [vmem:[%s2211_s22 + $0x340] sm:$0xff]  ;;  %v239_v57 = vld [vmem:[%s2211_s22 + $0x348] sm:$0xff] }
  0x2d   : > { %232 = vst [vmem:[%s2219_s23 + $0x1a8] sm:$0xff] %v231_v53  ;;  %234 = vst [vmem:[%s2219_s23 + $0x1b0] sm:$0xff] %v233_v54  ;;  %v241_v58 = vld [vmem:[%s2211_s22 + $0x350] sm:$0xff]  ;;  %v243_v59 = vld [vmem:[%s2211_s22 + $0x358] sm:$0xff] }
  0x2e   : > { %236 = vst [vmem:[%s2219_s23 + $0x1b8] sm:$0xff] %v235_v55  ;;  %238 = vst [vmem:[%s2219_s23 + $0x1c0] sm:$0xff] %v237_v56  ;;  %v245_v60 = vld [vmem:[%s2211_s22 + $0x360] sm:$0xff]  ;;  %v247_v61 = vld [vmem:[%s2211_s22 + $0x368] sm:$0xff] }
  0x2f   : > { %240 = vst [vmem:[%s2219_s23 + $0x1c8] sm:$0xff] %v239_v57  ;;  %242 = vst [vmem:[%s2219_s23 + $0x1d0] sm:$0xff] %v241_v58  ;;  %v249_v62 = vld [vmem:[%s2211_s22 + $0x370] sm:$0xff]  ;;  %v251_v63 = vld [vmem:[%s2211_s22 + $0x378] sm:$0xff] }
  0x30   : > { %244 = vst [vmem:[%s2219_s23 + $0x1d8] sm:$0xff] %v243_v59  ;;  %246 = vst [vmem:[%s2219_s23 + $0x1e0] sm:$0xff] %v245_v60  ;;  %v253_v0 = vld [vmem:[%s2211_s22 + $0x400] sm:$0xff]  ;;  %v255_v1 = vld [vmem:[%s2211_s22 + $0x408] sm:$0xff] }
  0x31   : > { %248 = vst [vmem:[%s2219_s23 + $0x1e8] sm:$0xff] %v247_v61  ;;  %250 = vst [vmem:[%s2219_s23 + $0x1f0] sm:$0xff] %v249_v62  ;;  %v257_v2 = vld [vmem:[%s2211_s22 + $0x410] sm:$0xff]  ;;  %v259_v3 = vld [vmem:[%s2211_s22 + $0x418] sm:$0xff] }
  0x32   : > { %252 = vst [vmem:[%s2219_s23 + $0x1f8] sm:$0xff] %v251_v63  ;;  %254 = vst [vmem:[%s2219_s23 + $0x200] sm:$0xff] %v253_v0  ;;  %v261_v4 = vld [vmem:[%s2211_s22 + $0x420] sm:$0xff]  ;;  %v263_v5 = vld [vmem:[%s2211_s22 + $0x428] sm:$0xff] }
  0x33   : > { %256 = vst [vmem:[%s2219_s23 + $0x208] sm:$0xff] %v255_v1  ;;  %258 = vst [vmem:[%s2219_s23 + $0x210] sm:$0xff] %v257_v2  ;;  %v265_v6 = vld [vmem:[%s2211_s22 + $0x430] sm:$0xff]  ;;  %v267_v7 = vld [vmem:[%s2211_s22 + $0x438] sm:$0xff] }
  0x34   : > { %260 = vst [vmem:[%s2219_s23 + $0x218] sm:$0xff] %v259_v3  ;;  %262 = vst [vmem:[%s2219_s23 + $0x220] sm:$0xff] %v261_v4  ;;  %v269_v8 = vld [vmem:[%s2211_s22 + $0x440] sm:$0xff]  ;;  %v271_v9 = vld [vmem:[%s2211_s22 + $0x448] sm:$0xff] }
  0x35   : > { %264 = vst [vmem:[%s2219_s23 + $0x228] sm:$0xff] %v263_v5  ;;  %266 = vst [vmem:[%s2219_s23 + $0x230] sm:$0xff] %v265_v6  ;;  %v273_v10 = vld [vmem:[%s2211_s22 + $0x450] sm:$0xff]  ;;  %v275_v11 = vld [vmem:[%s2211_s22 + $0x458] sm:$0xff] }
  0x36   : > { %268 = vst [vmem:[%s2219_s23 + $0x238] sm:$0xff] %v267_v7  ;;  %270 = vst [vmem:[%s2219_s23 + $0x240] sm:$0xff] %v269_v8  ;;  %v277_v12 = vld [vmem:[%s2211_s22 + $0x460] sm:$0xff]  ;;  %v279_v13 = vld [vmem:[%s2211_s22 + $0x468] sm:$0xff] }
  0x37   : > { %272 = vst [vmem:[%s2219_s23 + $0x248] sm:$0xff] %v271_v9  ;;  %274 = vst [vmem:[%s2219_s23 + $0x250] sm:$0xff] %v273_v10  ;;  %v281_v14 = vld [vmem:[%s2211_s22 + $0x470] sm:$0xff]  ;;  %v283_v15 = vld [vmem:[%s2211_s22 + $0x478] sm:$0xff] }
  0x38   : > { %276 = vst [vmem:[%s2219_s23 + $0x258] sm:$0xff] %v275_v11  ;;  %278 = vst [vmem:[%s2219_s23 + $0x260] sm:$0xff] %v277_v12  ;;  %v285_v16 = vld [vmem:[%s2211_s22 + $0x500] sm:$0xff]  ;;  %v287_v17 = vld [vmem:[%s2211_s22 + $0x508] sm:$0xff] }
  0x39   : > { %280 = vst [vmem:[%s2219_s23 + $0x268] sm:$0xff] %v279_v13  ;;  %282 = vst [vmem:[%s2219_s23 + $0x270] sm:$0xff] %v281_v14  ;;  %v289_v18 = vld [vmem:[%s2211_s22 + $0x510] sm:$0xff]  ;;  %v291_v19 = vld [vmem:[%s2211_s22 + $0x518] sm:$0xff] }
  0x3a   : > { %284 = vst [vmem:[%s2219_s23 + $0x278] sm:$0xff] %v283_v15  ;;  %286 = vst [vmem:[%s2219_s23 + $0x280] sm:$0xff] %v285_v16  ;;  %v293_v20 = vld [vmem:[%s2211_s22 + $0x520] sm:$0xff]  ;;  %v295_v21 = vld [vmem:[%s2211_s22 + $0x528] sm:$0xff] }
  0x3b   : > { %288 = vst [vmem:[%s2219_s23 + $0x288] sm:$0xff] %v287_v17  ;;  %290 = vst [vmem:[%s2219_s23 + $0x290] sm:$0xff] %v289_v18  ;;  %v297_v22 = vld [vmem:[%s2211_s22 + $0x530] sm:$0xff]  ;;  %v299_v23 = vld [vmem:[%s2211_s22 + $0x538] sm:$0xff] }
  0x3c   : > { %292 = vst [vmem:[%s2219_s23 + $0x298] sm:$0xff] %v291_v19  ;;  %294 = vst [vmem:[%s2219_s23 + $0x2a0] sm:$0xff] %v293_v20  ;;  %v301_v24 = vld [vmem:[%s2211_s22 + $0x540] sm:$0xff]  ;;  %v303_v25 = vld [vmem:[%s2211_s22 + $0x548] sm:$0xff] }
  0x3d   : > { %296 = vst [vmem:[%s2219_s23 + $0x2a8] sm:$0xff] %v295_v21  ;;  %298 = vst [vmem:[%s2219_s23 + $0x2b0] sm:$0xff] %v297_v22  ;;  %v305_v26 = vld [vmem:[%s2211_s22 + $0x550] sm:$0xff]  ;;  %v307_v27 = vld [vmem:[%s2211_s22 + $0x558] sm:$0xff] }
  0x3e   : > { %300 = vst [vmem:[%s2219_s23 + $0x2b8] sm:$0xff] %v299_v23  ;;  %302 = vst [vmem:[%s2219_s23 + $0x2c0] sm:$0xff] %v301_v24  ;;  %v309_v28 = vld [vmem:[%s2211_s22 + $0x560] sm:$0xff]  ;;  %v311_v29 = vld [vmem:[%s2211_s22 + $0x568] sm:$0xff] }
  0x3f   : > { %304 = vst [vmem:[%s2219_s23 + $0x2c8] sm:$0xff] %v303_v25  ;;  %306 = vst [vmem:[%s2219_s23 + $0x2d0] sm:$0xff] %v305_v26  ;;  %v313_v30 = vld [vmem:[%s2211_s22 + $0x570] sm:$0xff]  ;;  %v315_v31 = vld [vmem:[%s2211_s22 + $0x578] sm:$0xff] }
  0x40   : > { %308 = vst [vmem:[%s2219_s23 + $0x2d8] sm:$0xff] %v307_v27  ;;  %310 = vst [vmem:[%s2219_s23 + $0x2e0] sm:$0xff] %v309_v28 }
  0x41   : > { %312 = vst [vmem:[%s2219_s23 + $0x2e8] sm:$0xff] %v311_v29  ;;  %314 = vst [vmem:[%s2219_s23 + $0x2f0] sm:$0xff] %v313_v30 }
  0x42   : > { %316 = vst [vmem:[%s2219_s23 + $0x2f8] sm:$0xff] %v315_v31 }
  0x43 PF: > { %p1974_p5 = scmp.ge.s32.totalorder %s2158_s11, 1  ;;  %p321_p6 = scmp.lt.s32.totalorder %s2158_s11, 3 }
  0x45   : > { %p322_p7 = pnand %p1974_p5, %p321_p6 }
  0x46   : > { %s328_s24 = sand.u32 (!%p322_p7), 1, %s2150_s9   ;;  %v2160_v32 = vmov (!%p322_p7), 0   ;;  %v2437_v3 = vld [vmem:[%s2605_s1] sm:$0x3] (!%p322_p7)  ;;  %vm934_vm0 = vcmask (!%p322_p7), 392192   ;;  %s1975_s29 = sshll.u32 (!%p322_p7), %s1968_s12, 5 }
  0x47   : > { %325 = sbr.rel (%p322_p7) target bundleno = 399 (0x18f), region = 47  ;;  %970 = vmatprep.mubr.bf16.mxu0 (!%p322_p7), %v2160_v32  ;;  %1011 = vmatprep.mubr.bf16.mxu1 (!%p322_p7), %v2160_v32  ;;  %p351_p8 = scmp.lt.s32.totalorder (!%p322_p7), %s1975_s29, 63 }
  0x48   : > { %s2109_s25 = smul.u32 (!%p322_p7), 768, %s328_s24 }
  0x4a   : > { %s2412_s26 = scalar_lea.vmem (!%p322_p7), [#allocation2], %s2109_s25 }
  0x4b   : > { %v358_v33 = vld [vmem:[%s2412_s26] sm:$0xff] (!%p322_p7)  ;;  %v359_v35 = vld [vmem:[%s2412_s26 + $0x8] sm:$0xff] (!%p322_p7)  ;;  %v360_v55 = vld [vmem:[%s2412_s26 + $0x10] sm:$0xff] (!%p322_p7) }
  0x4c   : > { %v374_v34 = vld [vmem:[%s2412_s26 + $0x80] sm:$0xff] (!%p322_p7)  ;;  %v375_v37 = vld [vmem:[%s2412_s26 + $0x88] sm:$0xff] (!%p322_p7)  ;;  %v376_v56 = vld [vmem:[%s2412_s26 + $0x90] sm:$0xff] (!%p322_p7) }
  0x4d   : > { %v1978_v36 = vcombine.high (!%p322_p7), %v358_v33, %v374_v34  ;;  %v1977_v38 = vcombine.low (!%p322_p7), %v358_v33, %v374_v34  ;;  %v390_v39 = vld [vmem:[%s2412_s26 + $0x100] sm:$0xff] (!%p322_p7)  ;;  %v1980_v41 = vcombine.high (!%p322_p7), %v359_v35, %v375_v37  ;;  %v1979_v42 = vcombine.low (!%p322_p7), %v359_v35, %v375_v37  ;;  %v391_v44 = vld [vmem:[%s2412_s26 + $0x108] sm:$0xff] (!%p322_p7)  ;;  %v361_v57 = vld [vmem:[%s2412_s26 + $0x18] sm:$0xff] (!%p322_p7) }
  0x4e   : > { %v406_v40 = vld [vmem:[%s2412_s26 + $0x180] sm:$0xff]  ;;  %v407_v45 = vld [vmem:[%s2412_s26 + $0x188] sm:$0xff]  ;;  %v377_v58 = vld [vmem:[%s2412_s26 + $0x98] sm:$0xff]  ;;  %v1982_v61 = vcombine.high %v360_v55, %v376_v56  ;;  %v1981_v4 = vcombine.low %v360_v55, %v376_v56  ;;  %s2611_s29 = smov (!%p351_p8, %s1975_s29), 63 }
  0x4f   : > { %v2010_v43 = vcombine.high %v390_v39, %v406_v40  ;;  %v422_v46 = vld [vmem:[%s2412_s26 + $0x200] sm:$0xff]  ;;  %938 = vmatprep.subr.bf16.mxu0 %v1978_v36  ;;  %v2012_v47 = vcombine.high %v391_v44, %v407_v45  ;;  %v423_v49 = vld [vmem:[%s2412_s26 + $0x208] sm:$0xff]  ;;  %979 = vmatprep.subr.bf16.mxu1 %v1980_v41  ;;  %v2009_v51 = vcombine.low %v390_v39, %v406_v40  ;;  %v392_v63 = vld [vmem:[%s2412_s26 + $0x110] sm:$0xff]  ;;  %s1976_s30 = sshll.u32 %s2611_s29, 1 }
  0x50   : > { %v438_v48 = vld [vmem:[%s2412_s26 + $0x280] sm:$0xff]  ;;  %v439_v50 = vld [vmem:[%s2412_s26 + $0x288] sm:$0xff]  ;;  %939 = vmatpush1.bf16.msra.mxu0 %v1977_v38  ;;  %980 = vmatpush1.bf16.msra.mxu1 %v1979_v42  ;;  %v2011_v52 = vcombine.low %v391_v44, %v407_v45  ;;  %v1984_v62 = vcombine.high %v361_v57, %v377_v58  ;;  %v408_v0 = vld [vmem:[%s2412_s26 + $0x190] sm:$0xff]  ;;  %v1983_v5 = vcombine.low %v361_v57, %v377_v58  ;;  %s2570_s5 = scalar_lea.vmem %s2606_s2, %s1976_s30 }
  0x51   : > { %940 = vmatprep.subr.bf16.mxu0 %v2010_v43  ;;  %v2042_v53 = vcombine.high %v422_v46, %v438_v48  ;;  %981 = vmatprep.subr.bf16.mxu1 %v2012_v47  ;;  %v2044_v54 = vcombine.high %v423_v49, %v439_v50  ;;  %v2041_v59 = vcombine.low %v422_v46, %v438_v48  ;;  %v393_v1 = vld [vmem:[%s2412_s26 + $0x118] sm:$0xff]  ;;  %v424_v8 = vld [vmem:[%s2412_s26 + $0x210] sm:$0xff]  ;;  %v362_v16 = vld [vmem:[%s2412_s26 + $0x20] sm:$0xff] }
  0x52   : > { %v2043_v60 = vcombine.low %v423_v49, %v439_v50  ;;  %v409_v2 = vld [vmem:[%s2412_s26 + $0x198] sm:$0xff]  ;;  %v2014_v6 = vcombine.high %v392_v63, %v408_v0  ;;  %v440_v9 = vld [vmem:[%s2412_s26 + $0x290] sm:$0xff]  ;;  %v2013_v12 = vcombine.low %v392_v63, %v408_v0  ;;  %v378_v17 = vld [vmem:[%s2412_s26 + $0xa0] sm:$0xff] }
  0x53   : > { %v2016_v7 = vcombine.high %v393_v1, %v409_v2  ;;  %v425_v10 = vld [vmem:[%s2412_s26 + $0x218] sm:$0xff]  ;;  %v2015_v13 = vcombine.low %v393_v1, %v409_v2  ;;  %v2046_v14 = vcombine.high %v424_v8, %v440_v9  ;;  %v363_v18 = vld [vmem:[%s2412_s26 + $0x28] sm:$0xff]  ;;  %v2045_v20 = vcombine.low %v424_v8, %v440_v9  ;;  %v394_v24 = vld [vmem:[%s2412_s26 + $0x120] sm:$0xff] }
  0x54   : > { %941 = vmatpush1.bf16.msra.mxu0 %v2009_v51  ;;  %982 = vmatpush1.bf16.msra.mxu1 %v2011_v52  ;;  %v441_v11 = vld [vmem:[%s2412_s26 + $0x298] sm:$0xff]  ;;  %v379_v19 = vld [vmem:[%s2412_s26 + $0xa8] sm:$0xff]  ;;  %v1986_v22 = vcombine.high %v362_v16, %v378_v17  ;;  %v410_v25 = vld [vmem:[%s2412_s26 + $0x1a0] sm:$0xff]  ;;  %v1985_v28 = vcombine.low %v362_v16, %v378_v17 }
  0x55   : > { %942 = vmatprep.subr.bf16.mxu0 %v2042_v53  ;;  %983 = vmatprep.subr.bf16.mxu1 %v2044_v54  ;;  %v2048_v15 = vcombine.high %v425_v10, %v441_v11  ;;  %v2047_v21 = vcombine.low %v425_v10, %v441_v11  ;;  %v1988_v23 = vcombine.high %v363_v18, %v379_v19  ;;  %v395_v26 = vld [vmem:[%s2412_s26 + $0x128] sm:$0xff]  ;;  %v426_v33 = vld [vmem:[%s2412_s26 + $0x220] sm:$0xff]  ;;  %v364_v41 = vld [vmem:[%s2412_s26 + $0x30] sm:$0xff] }
  0x56   : > { %v411_v27 = vld [vmem:[%s2412_s26 + $0x1a8] sm:$0xff]  ;;  %v1987_v29 = vcombine.low %v363_v18, %v379_v19  ;;  %v2018_v30 = vcombine.high %v394_v24, %v410_v25  ;;  %v442_v34 = vld [vmem:[%s2412_s26 + $0x2a0] sm:$0xff]  ;;  %v2017_v37 = vcombine.low %v394_v24, %v410_v25  ;;  %v380_v42 = vld [vmem:[%s2412_s26 + $0xb0] sm:$0xff] }
  0x57   : > { %v2020_v31 = vcombine.high %v395_v26, %v411_v27  ;;  %v427_v35 = vld [vmem:[%s2412_s26 + $0x228] sm:$0xff]  ;;  %v2019_v38 = vcombine.low %v395_v26, %v411_v27  ;;  %v2050_v39 = vcombine.high %v426_v33, %v442_v34  ;;  %v365_v43 = vld [vmem:[%s2412_s26 + $0x38] sm:$0xff]  ;;  %v2049_v45 = vcombine.low %v426_v33, %v442_v34  ;;  %v396_v49 = vld [vmem:[%s2412_s26 + $0x130] sm:$0xff] }
  0x58   : > { %943 = vmatpush1.bf16.msra.mxu0 %v2041_v59  ;;  %984 = vmatpush1.bf16.msra.mxu1 %v2043_v60  ;;  %v443_v36 = vld [vmem:[%s2412_s26 + $0x2a8] sm:$0xff]  ;;  %v381_v44 = vld [vmem:[%s2412_s26 + $0xb8] sm:$0xff]  ;;  %v1990_v47 = vcombine.high %v364_v41, %v380_v42  ;;  %v412_v50 = vld [vmem:[%s2412_s26 + $0x1b0] sm:$0xff]  ;;  %v1989_v53 = vcombine.low %v364_v41, %v380_v42 }
  0x59   : > { %1020 = vmatprep.subr.bf16.mxu0 %v1982_v61  ;;  %1061 = vmatprep.subr.bf16.mxu1 %v1984_v62  ;;  %v2052_v40 = vcombine.high %v427_v35, %v443_v36  ;;  %v2051_v46 = vcombine.low %v427_v35, %v443_v36  ;;  %v1992_v48 = vcombine.high %v365_v43, %v381_v44  ;;  %v397_v51 = vld [vmem:[%s2412_s26 + $0x138] sm:$0xff]  ;;  %v428_v57 = vld [vmem:[%s2412_s26 + $0x230] sm:$0xff]  ;;  %v366_v1 = vld [vmem:[%s2412_s26 + $0x40] sm:$0xff] }
  0x5a   : > { %v413_v52 = vld [vmem:[%s2412_s26 + $0x1b8] sm:$0xff]  ;;  %v1991_v54 = vcombine.low %v365_v43, %v381_v44  ;;  %v2022_v55 = vcombine.high %v396_v49, %v412_v50  ;;  %v444_v58 = vld [vmem:[%s2412_s26 + $0x2b0] sm:$0xff]  ;;  %v2021_v61 = vcombine.low %v396_v49, %v412_v50  ;;  %v382_v2 = vld [vmem:[%s2412_s26 + $0xc0] sm:$0xff] }
  0x5b   : > { %2073 = vmatmul.mubr.msk.bf16.vlgmr.msra.gmra.mrb[0].mxu0 %vm934_vm0, %v2437_v3  ;;  %2074 = vmatmul.mubr.msk.bf16.vlgmr.msra.gmra.mrb[0].mxu1 %vm934_vm0, %v2437_v3  ;;  %v2024_v56 = vcombine.high %v397_v51, %v413_v52  ;;  %v429_v59 = vld [vmem:[%s2412_s26 + $0x238] sm:$0xff]  ;;  %v2023_v62 = vcombine.low %v397_v51, %v413_v52  ;;  %v2054_v63 = vcombine.high %v428_v57, %v444_v58  ;;  %v398_v10 = vld [vmem:[%s2412_s26 + $0x140] sm:$0xff]  ;;  %v368_v26 = vld [vmem:[%s2412_s26 + $0x50] sm:$0xff] }
  0x5c   : > { %1021 = vmatpush1.bf16.msra.mxu0 %v1981_v4  ;;  %1062 = vmatpush1.bf16.msra.mxu1 %v1983_v5  ;;  %v445_v60 = vld [vmem:[%s2412_s26 + $0x2b8] sm:$0xff]  ;;  %v367_v4 = vld [vmem:[%s2412_s26 + $0x48] sm:$0xff]  ;;  %v1994_v8 = vcombine.high %v366_v1, %v382_v2  ;;  %v414_v11 = vld [vmem:[%s2412_s26 + $0x1c0] sm:$0xff] }
  0x5d   : > { %1022 = vmatprep.subr.bf16.mxu0 %v2014_v6  ;;  %1063 = vmatprep.subr.bf16.mxu1 %v2016_v7  ;;  %v2056_v0 = vcombine.high %v429_v59, %v445_v60  ;;  %v383_v5 = vld [vmem:[%s2412_s26 + $0xc8] sm:$0xff]  ;;  %v2053_v6 = vcombine.low %v428_v57, %v444_v58  ;;  %v2055_v7 = vcombine.low %v429_v59, %v445_v60  ;;  %v430_v18 = vld [vmem:[%s2412_s26 + $0x240] sm:$0xff]  ;;  %v384_v27 = vld [vmem:[%s2412_s26 + $0xd0] sm:$0xff] }
  0x5e   : > { %1052 = vmatprep.mubr.bf16.mxu0 %v2160_v32  ;;  %1093 = vmatprep.mubr.bf16.mxu1 %v2160_v32  ;;  %v1996_v9 = vcombine.high %v367_v4, %v383_v5  ;;  %v2026_v16 = vcombine.high %v398_v10, %v414_v11  ;;  %v446_v19 = vld [vmem:[%s2412_s26 + $0x2c0] sm:$0xff]  ;;  %v1998_v33 = vcombine.high %v368_v26, %v384_v27  ;;  %v400_v35 = vld [vmem:[%s2412_s26 + $0x150] sm:$0xff] }
  0x5f   : > { %v2058_v24 = vcombine.high %v430_v18, %v446_v19  ;;  %v416_v36 = vld [vmem:[%s2412_s26 + $0x1d0] sm:$0xff]  ;;  %v370_v51 = vld [vmem:[%s2412_s26 + $0x60] sm:$0xff] }
  0x60   : > { %1023 = vmatpush1.bf16.msra.mxu0 %v2013_v12  ;;  %1064 = vmatpush1.bf16.msra.mxu1 %v2015_v13  ;;  %v399_v12 = vld [vmem:[%s2412_s26 + $0x148] sm:$0xff]  ;;  %v2030_v41 = vcombine.high %v400_v35, %v416_v36  ;;  %v432_v43 = vld [vmem:[%s2412_s26 + $0x250] sm:$0xff]  ;;  %v386_v52 = vld [vmem:[%s2412_s26 + $0xe0] sm:$0xff] }
  0x61   : > { %1024 = vmatprep.subr.bf16.mxu0 %v2046_v14  ;;  %1065 = vmatprep.subr.bf16.mxu1 %v2048_v15  ;;  %v415_v13 = vld [vmem:[%s2412_s26 + $0x1c8] sm:$0xff]  ;;  %v1993_v14 = vcombine.low %v366_v1, %v382_v2  ;;  %v1995_v15 = vcombine.low %v367_v4, %v383_v5  ;;  %v448_v44 = vld [vmem:[%s2412_s26 + $0x2d0] sm:$0xff]  ;;  %v2002_v57 = vcombine.high %v370_v51, %v386_v52  ;;  %v402_v59 = vld [vmem:[%s2412_s26 + $0x160] sm:$0xff] }
  0x62   : > { %v2028_v17 = vcombine.high %v399_v12, %v415_v13  ;;  %v2062_v49 = vcombine.high %v432_v43, %v448_v44  ;;  %v418_v60 = vld [vmem:[%s2412_s26 + $0x1e0] sm:$0xff] }
  0x63   : > { %v2034_v1 = vcombine.high %v402_v59, %v418_v60  ;;  %v434_v4 = vld [vmem:[%s2412_s26 + $0x260] sm:$0xff] }
  0x64   : > { %1025 = vmatpush1.bf16.msra.mxu0 %v2045_v20  ;;  %1066 = vmatpush1.bf16.msra.mxu1 %v2047_v21  ;;  %v431_v20 = vld [vmem:[%s2412_s26 + $0x248] sm:$0xff]  ;;  %v450_v5 = vld [vmem:[%s2412_s26 + $0x2e0] sm:$0xff] }
  0x65   : > { %1102 = vmatprep.subr.bf16.mxu0 %v1986_v22  ;;  %1143 = vmatprep.subr.bf16.mxu1 %v1988_v23  ;;  %v447_v21 = vld [vmem:[%s2412_s26 + $0x2c8] sm:$0xff]  ;;  %v2025_v22 = vcombine.low %v398_v10, %v414_v11  ;;  %v2027_v23 = vcombine.low %v399_v12, %v415_v13  ;;  %v2066_v10 = vcombine.high %v434_v4, %v450_v5  ;;  %v372_v12 = vld [vmem:[%s2412_s26 + $0x70] sm:$0xff] }
  0x66   : > { %v2060_v25 = vcombine.high %v431_v20, %v447_v21  ;;  %v388_v13 = vld [vmem:[%s2412_s26 + $0xf0] sm:$0xff] }
  0x67   : > { %2075 = vmatmul.mubr.msk.bf16.vlgmr.msra.gmra.mrb[4].mxu0 %vm934_vm0, %v2437_v3  ;;  %2076 = vmatmul.mubr.msk.bf16.vlgmr.msra.gmra.mrb[4].mxu1 %vm934_vm0, %v2437_v3 }
  0x68   : > { %1103 = vmatpush1.bf16.msra.mxu0 %v1985_v28  ;;  %1144 = vmatpush1.bf16.msra.mxu1 %v1987_v29  ;;  %v369_v28 = vld [vmem:[%s2412_s26 + $0x58] sm:$0xff] }
  0x69   : > { %1104 = vmatprep.subr.bf16.mxu0 %v2018_v30  ;;  %1145 = vmatprep.subr.bf16.mxu1 %v2020_v31  ;;  %v385_v29 = vld [vmem:[%s2412_s26 + $0xd8] sm:$0xff]  ;;  %v2057_v30 = vcombine.low %v430_v18, %v446_v19  ;;  %v2059_v31 = vcombine.low %v431_v20, %v447_v21  ;;  %v2006_v18 = vcombine.high %v372_v12, %v388_v13  ;;  %v404_v20 = vld [vmem:[%s2412_s26 + $0x170] sm:$0xff] }
  0x6a   : > { %1134 = vmatprep.mubr.bf16.mxu0 %v2160_v32  ;;  %1175 = vmatprep.mubr.bf16.mxu1 %v2160_v32  ;;  %v2000_v34 = vcombine.high %v369_v28, %v385_v29  ;;  %v420_v21 = vld [vmem:[%s2412_s26 + $0x1f0] sm:$0xff] }
  0x6c   : > { %1105 = vmatpush1.bf16.msra.mxu0 %v2017_v37  ;;  %1146 = vmatpush1.bf16.msra.mxu1 %v2019_v38  ;;  %v401_v37 = vld [vmem:[%s2412_s26 + $0x158] sm:$0xff] }
  0x6d   : > { %1106 = vmatprep.subr.bf16.mxu0 %v2050_v39  ;;  %1147 = vmatprep.subr.bf16.mxu1 %v2052_v40  ;;  %v417_v38 = vld [vmem:[%s2412_s26 + $0x1d8] sm:$0xff]  ;;  %v1997_v39 = vcombine.low %v368_v26, %v384_v27  ;;  %v1999_v40 = vcombine.low %v369_v28, %v385_v29  ;;  %v2038_v26 = vcombine.high %v404_v20, %v420_v21  ;;  %v436_v28 = vld [vmem:[%s2412_s26 + $0x270] sm:$0xff] }
  0x6e   : > { %v2032_v42 = vcombine.high %v401_v37, %v417_v38  ;;  %v452_v29 = vld [vmem:[%s2412_s26 + $0x2f0] sm:$0xff] }
  0x70   : > { %1107 = vmatpush1.bf16.msra.mxu0 %v2049_v45  ;;  %1148 = vmatpush1.bf16.msra.mxu1 %v2051_v46  ;;  %v433_v45 = vld [vmem:[%s2412_s26 + $0x258] sm:$0xff] }
  0x71   : > { %1184 = vmatprep.subr.bf16.mxu0 %v1990_v47  ;;  %1225 = vmatprep.subr.bf16.mxu1 %v1992_v48  ;;  %v449_v46 = vld [vmem:[%s2412_s26 + $0x2d8] sm:$0xff]  ;;  %v2029_v47 = vcombine.low %v400_v35, %v416_v36  ;;  %v2031_v48 = vcombine.low %v401_v37, %v417_v38  ;;  %v2070_v35 = vcombine.high %v436_v28, %v452_v29 }
  0x72   : > { %v2064_v50 = vcombine.high %v433_v45, %v449_v46  ;;  %v2069_v37 = vcombine.low %v436_v28, %v452_v29 }
  0x73   : > { %2077 = vmatmul.mubr.msk.bf16.vlgmr.msra.gmra.mrb[8].mxu0 %vm934_vm0, %v2437_v3  ;;  %2078 = vmatmul.mubr.msk.bf16.vlgmr.msra.gmra.mrb[8].mxu1 %vm934_vm0, %v2437_v3 }
  0x74   : > { %1185 = vmatpush1.bf16.msra.mxu0 %v1989_v53  ;;  %1226 = vmatpush1.bf16.msra.mxu1 %v1991_v54  ;;  %v371_v53 = vld [vmem:[%s2412_s26 + $0x68] sm:$0xff] }
  0x75   : > { %1186 = vmatprep.subr.bf16.mxu0 %v2022_v55  ;;  %1227 = vmatprep.subr.bf16.mxu1 %v2024_v56  ;;  %v387_v54 = vld [vmem:[%s2412_s26 + $0xe8] sm:$0xff]  ;;  %v2061_v55 = vcombine.low %v432_v43, %v448_v44  ;;  %v2063_v56 = vcombine.low %v433_v45, %v449_v46 }
  0x76   : > { %1216 = vmatprep.mubr.bf16.mxu0 %v2160_v32  ;;  %1257 = vmatprep.mubr.bf16.mxu1 %v2160_v32  ;;  %v2004_v58 = vcombine.high %v371_v53, %v387_v54 }
  0x78   : > { %1187 = vmatpush1.bf16.msra.mxu0 %v2021_v61  ;;  %1228 = vmatpush1.bf16.msra.mxu1 %v2023_v62  ;;  %v403_v61 = vld [vmem:[%s2412_s26 + $0x168] sm:$0xff] }
  0x79   : > { %1188 = vmatprep.subr.bf16.mxu0 %v2054_v63  ;;  %1229 = vmatprep.subr.bf16.mxu1 %v2056_v0  ;;  %v419_v62 = vld [vmem:[%s2412_s26 + $0x1e8] sm:$0xff]  ;;  %v2001_v63 = vcombine.low %v370_v51, %v386_v52  ;;  %v2003_v0 = vcombine.low %v371_v53, %v387_v54 }
  0x7a   : > { %v2036_v2 = vcombine.high %v403_v61, %v419_v62 }
  0x7c   : > { %1189 = vmatpush1.bf16.msra.mxu0 %v2053_v6  ;;  %1230 = vmatpush1.bf16.msra.mxu1 %v2055_v7  ;;  %v435_v6 = vld [vmem:[%s2412_s26 + $0x268] sm:$0xff] }
  0x7d   : > { %1266 = vmatprep.subr.bf16.mxu0 %v1994_v8  ;;  %1307 = vmatprep.subr.bf16.mxu1 %v1996_v9  ;;  %v451_v7 = vld [vmem:[%s2412_s26 + $0x2e8] sm:$0xff]  ;;  %v2033_v8 = vcombine.low %v402_v59, %v418_v60  ;;  %v2035_v9 = vcombine.low %v403_v61, %v419_v62 }
  0x7e   : > { %v2068_v11 = vcombine.high %v435_v6, %v451_v7 }
  0x7f   : > { %2079 = vmatmul.mubr.msk.bf16.vlgmr.msra.gmra.mrb[12].mxu0 %vm934_vm0, %v2437_v3  ;;  %2080 = vmatmul.mubr.msk.bf16.vlgmr.msra.gmra.mrb[12].mxu1 %vm934_vm0, %v2437_v3 }
  0x80   : > { %1267 = vmatpush1.bf16.msra.mxu0 %v1993_v14  ;;  %1308 = vmatpush1.bf16.msra.mxu1 %v1995_v15  ;;  %v373_v14 = vld [vmem:[%s2412_s26 + $0x78] sm:$0xff] }
  0x81   : > { %1268 = vmatprep.subr.bf16.mxu0 %v2026_v16  ;;  %1309 = vmatprep.subr.bf16.mxu1 %v2028_v17  ;;  %v389_v15 = vld [vmem:[%s2412_s26 + $0xf8] sm:$0xff]  ;;  %v2065_v16 = vcombine.low %v434_v4, %v450_v5  ;;  %v2067_v17 = vcombine.low %v435_v6, %v451_v7 }
  0x82   : > { %1298 = vmatprep.mubr.bf16.mxu0 %v2160_v32  ;;  %1339 = vmatprep.mubr.bf16.mxu1 %v2160_v32  ;;  %v2008_v19 = vcombine.high %v373_v14, %v389_v15 }
  0x84   : > { %1269 = vmatpush1.bf16.msra.mxu0 %v2025_v22  ;;  %1310 = vmatpush1.bf16.msra.mxu1 %v2027_v23  ;;  %v405_v22 = vld [vmem:[%s2412_s26 + $0x178] sm:$0xff] }
  0x85   : > { %1270 = vmatprep.subr.bf16.mxu0 %v2058_v24  ;;  %1311 = vmatprep.subr.bf16.mxu1 %v2060_v25  ;;  %v421_v23 = vld [vmem:[%s2412_s26 + $0x1f8] sm:$0xff]  ;;  %v2005_v24 = vcombine.low %v372_v12, %v388_v13  ;;  %v2007_v25 = vcombine.low %v373_v14, %v389_v15 }
  0x86   : > { %v2040_v27 = vcombine.high %v405_v22, %v421_v23 }
  0x88   : > { %1271 = vmatpush1.bf16.msra.mxu0 %v2057_v30  ;;  %1312 = vmatpush1.bf16.msra.mxu1 %v2059_v31  ;;  %v437_v30 = vld [vmem:[%s2412_s26 + $0x278] sm:$0xff] }
  0x89   : > { %1348 = vmatprep.subr.bf16.mxu0 %v1998_v33  ;;  %1389 = vmatprep.subr.bf16.mxu1 %v2000_v34  ;;  %v453_v31 = vld [vmem:[%s2412_s26 + $0x2f8] sm:$0xff]  ;;  %v2037_v33 = vcombine.low %v404_v20, %v420_v21  ;;  %v2039_v34 = vcombine.low %v405_v22, %v421_v23 }
  0x8a   : > { %v2072_v36 = vcombine.high %v437_v30, %v453_v31  ;;  %v2071_v38 = vcombine.low %v437_v30, %v453_v31 }
  0x8b   : > { %2081 = vmatmul.mubr.msk.bf16.vlgmr.msra.gmra.mrb[16].mxu0 %vm934_vm0, %v2437_v3  ;;  %2082 = vmatmul.mubr.msk.bf16.vlgmr.msra.gmra.mrb[16].mxu1 %vm934_vm0, %v2437_v3 }
  0x8c   : > { %1349 = vmatpush1.bf16.msra.mxu0 %v1997_v39  ;;  %1390 = vmatpush1.bf16.msra.mxu1 %v1999_v40  ;;  %v2161_v39 = vmov 1983009808  }
  0x8d   : > { %1350 = vmatprep.subr.bf16.mxu0 %v2030_v41  ;;  %1391 = vmatprep.subr.bf16.mxu1 %v2032_v42  ;;  %v1757_v40 = vunpack.c.l.s4 %v2161_v39  ;;  %v1759_v41 = vlaneseq }
  0x8e   : > { %1380 = vmatprep.mubr.bf16.mxu0 %v2160_v32  ;;  %1421 = vmatprep.mubr.bf16.mxu1 %v2160_v32 }
  0x8f   : > { %v1760_v42 = vshrl.u32 %v1759_v41, 7 }
  0x90   : > { %1351 = vmatpush1.bf16.msra.mxu0 %v2029_v47  ;;  %1392 = vmatpush1.bf16.msra.mxu1 %v2031_v48 }
  0x91   : > { %1352 = vmatprep.subr.bf16.mxu0 %v2062_v49  ;;  %1393 = vmatprep.subr.bf16.mxu1 %v2064_v50 }
  0x94   : > { %1353 = vmatpush1.bf16.msra.mxu0 %v2061_v55  ;;  %1394 = vmatpush1.bf16.msra.mxu1 %v2063_v56 }
  0x95   : > { %1430 = vmatprep.subr.bf16.mxu0 %v2002_v57  ;;  %1471 = vmatprep.subr.bf16.mxu1 %v2004_v58 }
  0x97   : > { %2083 = vmatmul.mubr.msk.bf16.vlgmr.msra.gmra.mrb[20].mxu0 %vm934_vm0, %v2437_v3  ;;  %2084 = vmatmul.mubr.msk.bf16.vlgmr.msra.gmra.mrb[20].mxu1 %vm934_vm0, %v2437_v3 }
  0x98   : > { %1431 = vmatpush1.bf16.msra.mxu0 %v2001_v63  ;;  %1472 = vmatpush1.bf16.msra.mxu1 %v2003_v0 }
  0x99   : > { %1432 = vmatprep.subr.bf16.mxu0 %v2034_v1  ;;  %1473 = vmatprep.subr.bf16.mxu1 %v2036_v2 }
  0x9a   : > { %1462 = vmatprep.mubr.bf16.mxu0 %v2160_v32  ;;  %1503 = vmatprep.mubr.bf16.mxu1 %v2160_v32 }
  0x9c   : > { %1433 = vmatpush1.bf16.msra.mxu0 %v2033_v8  ;;  %1474 = vmatpush1.bf16.msra.mxu1 %v2035_v9 }
  0x9d   : > { %1434 = vmatprep.subr.bf16.mxu0 %v2066_v10  ;;  %1475 = vmatprep.subr.bf16.mxu1 %v2068_v11 }
  0xa0   : > { %1435 = vmatpush1.bf16.msra.mxu0 %v2065_v16  ;;  %1476 = vmatpush1.bf16.msra.mxu1 %v2067_v17 }
  0xa1   : > { %1512 = vmatprep.subr.bf16.mxu0 %v2006_v18  ;;  %1553 = vmatprep.subr.bf16.mxu1 %v2008_v19 }
  0xa3   : > { %2085 = vmatmul.mubr.msk.bf16.vlgmr.msra.gmra.mrb[24].mxu0 %vm934_vm0, %v2437_v3  ;;  %2086 = vmatmul.mubr.msk.bf16.vlgmr.msra.gmra.mrb[24].mxu1 %vm934_vm0, %v2437_v3 }
  0xa4   : > { %1513 = vmatpush1.bf16.msra.mxu0 %v2005_v24  ;;  %1554 = vmatpush1.bf16.msra.mxu1 %v2007_v25 }
  0xa5   : > { %1514 = vmatprep.subr.bf16.mxu0 %v2038_v26  ;;  %1555 = vmatprep.subr.bf16.mxu1 %v2040_v27 }
  0xa6   : > { %1544 = vmatprep.mubr.bf16.mxu0 %v2160_v32  ;;  %1585 = vmatprep.mubr.bf16.mxu1 %v2160_v32  ;;  %v1758_v32 = vunpack.c.0.s8 %v1757_v40 }
  0xa8   : > { %1515 = vmatpush1.bf16.msra.mxu0 %v2037_v33  ;;  %1556 = vmatpush1.bf16.msra.mxu1 %v2039_v34  ;;  %v2563_v50 = vsub.s32 %v1758_v32, %v1760_v42 }
  0xa9   : > { %1516 = vmatprep.subr.bf16.mxu0 %v2070_v35  ;;  %1557 = vmatprep.subr.bf16.mxu1 %v2072_v36 }
  0xac   : > { %1517 = vmatpush1.bf16.msra.mxu0 %v2069_v37  ;;  %1558 = vmatpush1.bf16.msra.mxu1 %v2071_v38 }
  0xaf   : > { %2087 = vmatmul.mubr.msk.bf16.vlgmr.msra.gmra.mrb[28].mxu0 %vm934_vm0, %v2437_v3  ;;  %2088 = vmatmul.mubr.msk.bf16.vlgmr.msra.gmra.mrb[28].mxu1 %vm934_vm0, %v2437_v3 }
 0x12e   : > { %v972_v43 = vpop.f32.mrb[0].mxu0  ;;  %v1013_v45 = vpop.f32.mrb[0].mxu1 }
 0x12f   : > { %vm1594_vm1 = vcmp.gt.f32.partialorder %v972_v43, 0.0  ;;  %v1626_v44 = vmul.f32 0.2, %v972_v43  ;;  %v974_v46 = vpop.f32.mrb[1].mxu0  ;;  %vm1596_vm2 = vcmp.gt.f32.partialorder %v1013_v45, 0.0  ;;  %v1015_v3 = vpop.f32.mrb[1].mxu1 }
 0x130   : > { %v1628_v47 = vmul.f32 0.2, %v1013_v45  ;;  %vm1595_vm3 = vcmp.gt.f32.partialorder %v974_v46, 0.0  ;;  %v1627_v48 = vmul.f32 0.2, %v974_v46  ;;  %v976_v51 = vpop.f32.mrb[2].mxu0 }
 0x131   : > { %v1658_v49 = vsel %vm1594_vm1, %v972_v43, %v1626_v44  ;;  %vm1597_vm4 = vcmp.gt.f32.partialorder %v1015_v3, 0.0  ;;  %v1629_v54 = vmul.f32 0.2, %v1015_v3  ;;  %v1017_v55 = vpop.f32.mrb[2].mxu1  ;;  %v977_v56 = vpop.f32.mrb[3].mxu0 }
 0x132   : > { %v1660_v52 = vsel %vm1596_vm2, %v1013_v45, %v1628_v47  ;;  %v1659_v53 = vsel %vm1595_vm3, %v974_v46, %v1627_v48  ;;  %v1018_v58 = vpop.f32.mrb[3].mxu1 }
 0x133   : > { %v2089_v57 = vpack.c.bf16 %v1659_v53, %v1658_v49  ;;  %v1661_v59 = vsel %vm1597_vm4, %v1015_v3, %v1629_v54 }
 0x134   : > { %v2090_v61 = vpack.c.bf16 %v1661_v59, %v1660_v52 }
 0x135   : > { %v1762_v60 = vrot.slane %v2089_v57, %v2563_v50 }
 0x136   : > { %v1769_v62 = vrot.slane %v2090_v61, %v2563_v50 }
 0x138   : > { %v1770_v63 = vcombine.low %v1762_v60, %v1769_v62 }
 0x13a   : > { %v1054_v0 = vpop.f32.mrb[4].mxu0  ;;  %1898 = vst [vmem:[%s2570_s5] sm:$0xff] %v1770_v63  ;;  %v1095_v2 = vpop.f32.mrb[4].mxu1 }
 0x13b   : > { %vm1598_vm5 = vcmp.gt.f32.partialorder %v1054_v0, 0.0  ;;  %v1630_v1 = vmul.f32 0.2, %v1054_v0  ;;  %v1056_v4 = vpop.f32.mrb[5].mxu0  ;;  %vm1600_vm6 = vcmp.gt.f32.partialorder %v1095_v2, 0.0  ;;  %v1097_v8 = vpop.f32.mrb[5].mxu1 }
 0x13c   : > { %v1632_v5 = vmul.f32 0.2, %v1095_v2  ;;  %vm1599_vm7 = vcmp.gt.f32.partialorder %v1056_v4, 0.0  ;;  %v1631_v6 = vmul.f32 0.2, %v1056_v4  ;;  %v1058_v9 = vpop.f32.mrb[6].mxu0 }
 0x13d   : > { %v1662_v7 = vsel %vm1598_vm5, %v1054_v0, %v1630_v1  ;;  %vm1601_vm8 = vcmp.gt.f32.partialorder %v1097_v8, 0.0  ;;  %v1633_v12 = vmul.f32 0.2, %v1097_v8  ;;  %v1099_v13 = vpop.f32.mrb[6].mxu1  ;;  %v1059_v14 = vpop.f32.mrb[7].mxu0 }
 0x13e   : > { %v1664_v10 = vsel %vm1600_vm6, %v1095_v2, %v1632_v5  ;;  %v1663_v11 = vsel %vm1599_vm7, %v1056_v4, %v1631_v6  ;;  %v1100_v16 = vpop.f32.mrb[7].mxu1 }
 0x13f   : > { %v2091_v15 = vpack.c.bf16 %v1663_v11, %v1662_v7  ;;  %v1665_v17 = vsel %vm1601_vm8, %v1097_v8, %v1633_v12 }
 0x140   : > { %v2092_v19 = vpack.c.bf16 %v1665_v17, %v1664_v10 }
 0x141   : > { %v1779_v18 = vrot.slane %v2091_v15, %v2563_v50 }
 0x142   : > { %v1786_v20 = vrot.slane %v2092_v19, %v2563_v50 }
 0x144   : > { %v1787_v21 = vcombine.low %v1779_v18, %v1786_v20 }
 0x146   : > { %v1136_v22 = vpop.f32.mrb[8].mxu0  ;;  %1899 = vst [vmem:[%s2570_s5 + $0x8] sm:$0xff] %v1787_v21  ;;  %v1177_v24 = vpop.f32.mrb[8].mxu1 }
 0x147   : > { %vm1602_vm9 = vcmp.gt.f32.partialorder %v1136_v22, 0.0  ;;  %v1634_v23 = vmul.f32 0.2, %v1136_v22  ;;  %v1138_v25 = vpop.f32.mrb[9].mxu0  ;;  %vm1604_vm10 = vcmp.gt.f32.partialorder %v1177_v24, 0.0  ;;  %v1179_v29 = vpop.f32.mrb[9].mxu1 }
 0x148   : > { %v1636_v26 = vmul.f32 0.2, %v1177_v24  ;;  %vm1603_vm11 = vcmp.gt.f32.partialorder %v1138_v25, 0.0  ;;  %v1635_v27 = vmul.f32 0.2, %v1138_v25  ;;  %v1140_v30 = vpop.f32.mrb[10].mxu0 }
 0x149   : > { %v1666_v28 = vsel %vm1602_vm9, %v1136_v22, %v1634_v23  ;;  %vm1605_vm12 = vcmp.gt.f32.partialorder %v1179_v29, 0.0  ;;  %v1637_v34 = vmul.f32 0.2, %v1179_v29  ;;  %v1181_v35 = vpop.f32.mrb[10].mxu1  ;;  %v1141_v36 = vpop.f32.mrb[11].mxu0 }
 0x14a   : > { %v1668_v31 = vsel %vm1604_vm10, %v1177_v24, %v1636_v26  ;;  %v1667_v33 = vsel %vm1603_vm11, %v1138_v25, %v1635_v27  ;;  %v1182_v38 = vpop.f32.mrb[11].mxu1 }
 0x14b   : > { %v2093_v37 = vpack.c.bf16 %v1667_v33, %v1666_v28  ;;  %v1669_v39 = vsel %vm1605_vm12, %v1179_v29, %v1637_v34 }
 0x14c   : > { %v2094_v41 = vpack.c.bf16 %v1669_v39, %v1668_v31 }
 0x14d   : > { %v1796_v40 = vrot.slane %v2093_v37, %v2563_v50 }
 0x14e   : > { %v1803_v32 = vrot.slane %v2094_v41, %v2563_v50 }
 0x150   : > { %v1804_v42 = vcombine.low %v1796_v40, %v1803_v32 }
 0x152   : > { %v1218_v43 = vpop.f32.mrb[12].mxu0  ;;  %1900 = vst [vmem:[%s2570_s5 + $0x10] sm:$0xff] %v1804_v42  ;;  %v1259_v45 = vpop.f32.mrb[12].mxu1 }
 0x153   : > { %vm1606_vm13 = vcmp.gt.f32.partialorder %v1218_v43, 0.0  ;;  %v1638_v44 = vmul.f32 0.2, %v1218_v43  ;;  %v1220_v46 = vpop.f32.mrb[13].mxu0  ;;  %vm1608_vm14 = vcmp.gt.f32.partialorder %v1259_v45, 0.0  ;;  %v1261_v3 = vpop.f32.mrb[13].mxu1 }
 0x154   : > { %v1640_v47 = vmul.f32 0.2, %v1259_v45  ;;  %vm1607_vm15 = vcmp.gt.f32.partialorder %v1220_v46, 0.0  ;;  %v1639_v48 = vmul.f32 0.2, %v1220_v46  ;;  %v1222_v51 = vpop.f32.mrb[14].mxu0 }
 0x155   : > { %v1670_v49 = vsel %vm1606_vm13, %v1218_v43, %v1638_v44  ;;  %vm1609_vm0 = vcmp.gt.f32.partialorder %v1261_v3, 0.0  ;;  %v1641_v54 = vmul.f32 0.2, %v1261_v3  ;;  %v1263_v55 = vpop.f32.mrb[14].mxu1  ;;  %v1223_v56 = vpop.f32.mrb[15].mxu0 }
 0x156   : > { %v1672_v52 = vsel %vm1608_vm14, %v1259_v45, %v1640_v47  ;;  %v1671_v53 = vsel %vm1607_vm15, %v1220_v46, %v1639_v48  ;;  %v1264_v58 = vpop.f32.mrb[15].mxu1 }
 0x157   : > { %v2095_v57 = vpack.c.bf16 %v1671_v53, %v1670_v49  ;;  %v1673_v59 = vsel %vm1609_vm0, %v1261_v3, %v1641_v54 }
 0x158   : > { %v2096_v61 = vpack.c.bf16 %v1673_v59, %v1672_v52 }
 0x159   : > { %v1813_v60 = vrot.slane %v2095_v57, %v2563_v50 }
 0x15a   : > { %v1820_v62 = vrot.slane %v2096_v61, %v2563_v50 }
 0x15c   : > { %v1821_v63 = vcombine.low %v1813_v60, %v1820_v62 }
 0x15e   : > { %v1300_v0 = vpop.f32.mrb[16].mxu0  ;;  %1901 = vst [vmem:[%s2570_s5 + $0x18] sm:$0xff] %v1821_v63  ;;  %v1341_v2 = vpop.f32.mrb[16].mxu1 }
 0x15f   : > { %vm1610_vm1 = vcmp.gt.f32.partialorder %v1300_v0, 0.0  ;;  %v1642_v1 = vmul.f32 0.2, %v1300_v0  ;;  %v1302_v4 = vpop.f32.mrb[17].mxu0  ;;  %vm1612_vm2 = vcmp.gt.f32.partialorder %v1341_v2, 0.0  ;;  %v1343_v8 = vpop.f32.mrb[17].mxu1 }
 0x160   : > { %v1644_v5 = vmul.f32 0.2, %v1341_v2  ;;  %vm1611_vm3 = vcmp.gt.f32.partialorder %v1302_v4, 0.0  ;;  %v1643_v6 = vmul.f32 0.2, %v1302_v4  ;;  %v1304_v9 = vpop.f32.mrb[18].mxu0 }
 0x161   : > { %v1674_v7 = vsel %vm1610_vm1, %v1300_v0, %v1642_v1  ;;  %vm1613_vm4 = vcmp.gt.f32.partialorder %v1343_v8, 0.0  ;;  %v1645_v12 = vmul.f32 0.2, %v1343_v8  ;;  %v1345_v13 = vpop.f32.mrb[18].mxu1  ;;  %v1305_v14 = vpop.f32.mrb[19].mxu0 }
 0x162   : > { %v1676_v10 = vsel %vm1612_vm2, %v1341_v2, %v1644_v5  ;;  %v1675_v11 = vsel %vm1611_vm3, %v1302_v4, %v1643_v6  ;;  %v1346_v16 = vpop.f32.mrb[19].mxu1 }
 0x163   : > { %v2097_v15 = vpack.c.bf16 %v1675_v11, %v1674_v7  ;;  %v1677_v17 = vsel %vm1613_vm4, %v1343_v8, %v1645_v12 }
 0x164   : > { %v2098_v19 = vpack.c.bf16 %v1677_v17, %v1676_v10 }
 0x165   : > { %v1830_v18 = vrot.slane %v2097_v15, %v2563_v50 }
 0x166   : > { %v1837_v20 = vrot.slane %v2098_v19, %v2563_v50 }
 0x168   : > { %v1838_v21 = vcombine.low %v1830_v18, %v1837_v20 }
 0x16a   : > { %v1382_v22 = vpop.f32.mrb[20].mxu0  ;;  %1902 = vst [vmem:[%s2570_s5 + $0x20] sm:$0xff] %v1838_v21  ;;  %v1423_v24 = vpop.f32.mrb[20].mxu1 }
 0x16b   : > { %vm1614_vm5 = vcmp.gt.f32.partialorder %v1382_v22, 0.0  ;;  %v1646_v23 = vmul.f32 0.2, %v1382_v22  ;;  %v1384_v25 = vpop.f32.mrb[21].mxu0  ;;  %vm1616_vm6 = vcmp.gt.f32.partialorder %v1423_v24, 0.0  ;;  %v1425_v29 = vpop.f32.mrb[21].mxu1 }
 0x16c   : > { %v1648_v26 = vmul.f32 0.2, %v1423_v24  ;;  %vm1615_vm7 = vcmp.gt.f32.partialorder %v1384_v25, 0.0  ;;  %v1647_v27 = vmul.f32 0.2, %v1384_v25  ;;  %v1386_v30 = vpop.f32.mrb[22].mxu0 }
 0x16d   : > { %v1678_v28 = vsel %vm1614_vm5, %v1382_v22, %v1646_v23  ;;  %vm1617_vm8 = vcmp.gt.f32.partialorder %v1425_v29, 0.0  ;;  %v1649_v34 = vmul.f32 0.2, %v1425_v29  ;;  %v1427_v35 = vpop.f32.mrb[22].mxu1  ;;  %v1387_v36 = vpop.f32.mrb[23].mxu0 }
 0x16e   : > { %v1680_v31 = vsel %vm1616_vm6, %v1423_v24, %v1648_v26  ;;  %v1679_v33 = vsel %vm1615_vm7, %v1384_v25, %v1647_v27  ;;  %v1428_v38 = vpop.f32.mrb[23].mxu1 }
 0x16f   : > { %v2099_v37 = vpack.c.bf16 %v1679_v33, %v1678_v28  ;;  %v1681_v39 = vsel %vm1617_vm8, %v1425_v29, %v1649_v34 }
 0x170   : > { %v2100_v41 = vpack.c.bf16 %v1681_v39, %v1680_v31 }
 0x171   : > { %v1847_v40 = vrot.slane %v2099_v37, %v2563_v50 }
 0x172   : > { %v1854_v32 = vrot.slane %v2100_v41, %v2563_v50 }
 0x174   : > { %v1855_v42 = vcombine.low %v1847_v40, %v1854_v32 }
 0x176   : > { %v1464_v43 = vpop.f32.mrb[24].mxu0  ;;  %1903 = vst [vmem:[%s2570_s5 + $0x28] sm:$0xff] %v1855_v42  ;;  %v1505_v45 = vpop.f32.mrb[24].mxu1 }
 0x177   : > { %vm1618_vm9 = vcmp.gt.f32.partialorder %v1464_v43, 0.0  ;;  %v1650_v44 = vmul.f32 0.2, %v1464_v43  ;;  %v1466_v46 = vpop.f32.mrb[25].mxu0  ;;  %vm1620_vm10 = vcmp.gt.f32.partialorder %v1505_v45, 0.0  ;;  %v1507_v3 = vpop.f32.mrb[25].mxu1 }
 0x178   : > { %v1652_v47 = vmul.f32 0.2, %v1505_v45  ;;  %vm1619_vm11 = vcmp.gt.f32.partialorder %v1466_v46, 0.0  ;;  %v1651_v48 = vmul.f32 0.2, %v1466_v46  ;;  %v1468_v51 = vpop.f32.mrb[26].mxu0 }
 0x179   : > { %v1682_v49 = vsel %vm1618_vm9, %v1464_v43, %v1650_v44  ;;  %vm1621_vm12 = vcmp.gt.f32.partialorder %v1507_v3, 0.0  ;;  %v1653_v54 = vmul.f32 0.2, %v1507_v3  ;;  %v1509_v55 = vpop.f32.mrb[26].mxu1  ;;  %v1469_v56 = vpop.f32.mrb[27].mxu0 }
 0x17a   : > { %v1684_v52 = vsel %vm1620_vm10, %v1505_v45, %v1652_v47  ;;  %v1683_v53 = vsel %vm1619_vm11, %v1466_v46, %v1651_v48  ;;  %v1510_v58 = vpop.f32.mrb[27].mxu1 }
 0x17b   : > { %v2101_v57 = vpack.c.bf16 %v1683_v53, %v1682_v49  ;;  %v1685_v59 = vsel %vm1621_vm12, %v1507_v3, %v1653_v54 }
 0x17c   : > { %v2102_v61 = vpack.c.bf16 %v1685_v59, %v1684_v52 }
 0x17d   : > { %v1864_v60 = vrot.slane %v2101_v57, %v2563_v50 }
 0x17e   : > { %v1871_v62 = vrot.slane %v2102_v61, %v2563_v50 }
 0x180   : > { %v1872_v63 = vcombine.low %v1864_v60, %v1871_v62 }
 0x182   : > { %v1546_v0 = vpop.f32.mrb[28].mxu0  ;;  %1904 = vst [vmem:[%s2570_s5 + $0x30] sm:$0xff] %v1872_v63  ;;  %v1587_v2 = vpop.f32.mrb[28].mxu1 }
 0x183   : > { %vm1622_vm13 = vcmp.gt.f32.partialorder %v1546_v0, 0.0  ;;  %v1654_v1 = vmul.f32 0.2, %v1546_v0  ;;  %v1548_v4 = vpop.f32.mrb[29].mxu0  ;;  %vm1624_vm14 = vcmp.gt.f32.partialorder %v1587_v2, 0.0  ;;  %v1589_v8 = vpop.f32.mrb[29].mxu1 }
 0x184   : > { %v1656_v5 = vmul.f32 0.2, %v1587_v2  ;;  %vm1623_vm15 = vcmp.gt.f32.partialorder %v1548_v4, 0.0  ;;  %v1655_v6 = vmul.f32 0.2, %v1548_v4  ;;  %v1550_v9 = vpop.f32.mrb[30].mxu0 }
 0x185   : > { %v1686_v7 = vsel %vm1622_vm13, %v1546_v0, %v1654_v1  ;;  %vm1625_vm0 = vcmp.gt.f32.partialorder %v1589_v8, 0.0  ;;  %v1657_v12 = vmul.f32 0.2, %v1589_v8  ;;  %v1591_v13 = vpop.f32.mrb[30].mxu1  ;;  %v1551_v14 = vpop.f32.mrb[31].mxu0 }
 0x186   : > { %v1688_v10 = vsel %vm1624_vm14, %v1587_v2, %v1656_v5  ;;  %v1687_v11 = vsel %vm1623_vm15, %v1548_v4, %v1655_v6  ;;  %v1592_v16 = vpop.f32.mrb[31].mxu1 }
 0x187   : > { %v2103_v15 = vpack.c.bf16 %v1687_v11, %v1686_v7  ;;  %v1689_v17 = vsel %vm1625_vm0, %v1589_v8, %v1657_v12 }
 0x188   : > { %v2104_v19 = vpack.c.bf16 %v1689_v17, %v1688_v10 }
 0x189   : > { %v1881_v18 = vrot.slane %v2103_v15, %v2563_v50 }
 0x18a   : > { %v1888_v20 = vrot.slane %v2104_v19, %v2563_v50 }
 0x18c   : > { %v1889_v21 = vcombine.low %v1881_v18, %v1888_v20 }
 0x18e   : > { %1905 = vst [vmem:[%s2570_s5 + $0x38] sm:$0xff] %v1889_v21 }
 0x18f PF: > { %p9_p9 = scmp.ge.s32.totalorder %s2194_s13, 4   ;;  %s2607_s9 = smov %s2154_s10 }
 0x190   : > { %s2608_s10 = smov %s2203_s16  ;;  %s2609_s11 = smov %s2194_s13 }
 0x191   :  { %11 = sbr.rel (!%p9_p9) target bundleno = 2 (0x2), region = 86 }

// kernel: _lambda_.6
= control target key start
LH: loop header
LB: loop body
LE: loop exit
PB: predicated region body
PF: predicated region fallthrough
CT: control target
= control target key end

     0   :  { %v1067_v3 = vmov 0   ;;  %vm403_vm0 = vcmask 523264   ;;  %s1362_s0 = inlined_call_operand.vmem [shape: bf16[64,2048], index: 0, kind: input, shape index: {}]   ;;  %s1363_s1 = inlined_call_operand.vmem [shape: bf16[8,64], index: 1, kind: input, shape index: {}]   ;;  %s1364_s2 = inlined_call_operand.vmem [shape: f32[8,1], index: 2, kind: input, shape index: {}]   ;;  %s1365_s3 = inlined_call_operand.vmem [shape: f32[8,1], index: 3, kind: input, shape index: {}]   ;;  %s1366_s4 = inlined_call_operand.vmem [shape: bf16[8,2048], index: 4, kind: output, shape index: {}]  }
   0x1   :  { %v19_v0 = vld [vmem:[%s1362_s0] sm:$0xff]  ;;  %v20_v2 = vld [vmem:[%s1362_s0 + $0x8] sm:$0xff]  ;;  %439 = vmatprep.mubr.bf16.mxu0 %v1067_v3  ;;  %480 = vmatprep.mubr.bf16.mxu1 %v1067_v3  ;;  %v21_v31 = vld [vmem:[%s1362_s0 + $0x10] sm:$0xff] }
   0x2   :  { %v27_v1 = vld [vmem:[%s1362_s0 + $0x40] sm:$0xff]  ;;  %v28_v6 = vld [vmem:[%s1362_s0 + $0x48] sm:$0xff]  ;;  %1063 = vset.pattern.permute.xlu1 %v1067_v3  ;;  %1064 = vset.pattern.permute.xlu0 %v1067_v3  ;;  %v29_v32 = vld [vmem:[%s1362_s0 + $0x50] sm:$0xff] }
   0x3   :  { %v975_v4 = vcombine.high %v19_v0, %v27_v1  ;;  %v974_v5 = vcombine.low %v19_v0, %v27_v1  ;;  %v35_v7 = vld [vmem:[%s1362_s0 + $0x80] sm:$0xff]  ;;  %v977_v9 = vcombine.high %v20_v2, %v28_v6  ;;  %v976_v10 = vcombine.low %v20_v2, %v28_v6  ;;  %v36_v12 = vld [vmem:[%s1362_s0 + $0x88] sm:$0xff]  ;;  %v22_v33 = vld [vmem:[%s1362_s0 + $0x18] sm:$0xff] }
   0x4   :  { %v43_v8 = vld [vmem:[%s1362_s0 + $0xc0] sm:$0xff]  ;;  %v44_v13 = vld [vmem:[%s1362_s0 + $0xc8] sm:$0xff]  ;;  %v30_v34 = vld [vmem:[%s1362_s0 + $0x58] sm:$0xff]  ;;  %v979_v37 = vcombine.high %v21_v31, %v29_v32  ;;  %v978_v44 = vcombine.low %v21_v31, %v29_v32 }
   0x5   :  { %v991_v11 = vcombine.high %v35_v7, %v43_v8  ;;  %v51_v14 = vld [vmem:[%s1362_s0 + $0x100] sm:$0xff]  ;;  %407 = vmatprep.subr.bf16.mxu0 %v975_v4  ;;  %v993_v15 = vcombine.high %v36_v12, %v44_v13  ;;  %v52_v17 = vld [vmem:[%s1362_s0 + $0x108] sm:$0xff]  ;;  %448 = vmatprep.subr.bf16.mxu1 %v977_v9  ;;  %v990_v19 = vcombine.low %v35_v7, %v43_v8  ;;  %v37_v39 = vld [vmem:[%s1362_s0 + $0x90] sm:$0xff] }
   0x6   :  { %v59_v16 = vld [vmem:[%s1362_s0 + $0x140] sm:$0xff]  ;;  %v60_v18 = vld [vmem:[%s1362_s0 + $0x148] sm:$0xff]  ;;  %408 = vmatpush1.bf16.msra.mxu0 %v974_v5  ;;  %449 = vmatpush1.bf16.msra.mxu1 %v976_v10  ;;  %v992_v20 = vcombine.low %v36_v12, %v44_v13  ;;  %v981_v38 = vcombine.high %v22_v33, %v30_v34  ;;  %v45_v40 = vld [vmem:[%s1362_s0 + $0xd0] sm:$0xff]  ;;  %v980_v45 = vcombine.low %v22_v33, %v30_v34 }
   0x7   :  { %409 = vmatprep.subr.bf16.mxu0 %v991_v11  ;;  %v1007_v21 = vcombine.high %v51_v14, %v59_v16  ;;  %450 = vmatprep.subr.bf16.mxu1 %v993_v15  ;;  %v1009_v22 = vcombine.high %v52_v17, %v60_v18  ;;  %v67_v23 = vld [vmem:[%s1362_s0 + $0x180] sm:$0xff]  ;;  %v68_v25 = vld [vmem:[%s1362_s0 + $0x188] sm:$0xff]  ;;  %v1006_v27 = vcombine.low %v51_v14, %v59_v16  ;;  %v38_v41 = vld [vmem:[%s1362_s0 + $0x98] sm:$0xff] }
   0x8   :  { %v75_v24 = vld [vmem:[%s1362_s0 + $0x1c0] sm:$0xff]  ;;  %v76_v26 = vld [vmem:[%s1362_s0 + $0x1c8] sm:$0xff]  ;;  %v1008_v28 = vcombine.low %v52_v17, %v60_v18  ;;  %v46_v42 = vld [vmem:[%s1362_s0 + $0xd8] sm:$0xff]  ;;  %v995_v46 = vcombine.high %v37_v39, %v45_v40  ;;  %v994_v52 = vcombine.low %v37_v39, %v45_v40 }
   0x9   :  { %v1023_v29 = vcombine.high %v67_v23, %v75_v24  ;;  %v1025_v30 = vcombine.high %v68_v25, %v76_v26  ;;  %v1022_v35 = vcombine.low %v67_v23, %v75_v24  ;;  %v1024_v36 = vcombine.low %v68_v25, %v76_v26  ;;  %v1172_v43 = vld [vmem:[%s1363_s1] sm:$0xf]  ;;  %v53_v48 = vld [vmem:[%s1362_s0 + $0x110] sm:$0xff]  ;;  %v54_v50 = vld [vmem:[%s1362_s0 + $0x118] sm:$0xff] }
   0xa   :  { %410 = vmatpush1.bf16.msra.mxu0 %v990_v19  ;;  %451 = vmatpush1.bf16.msra.mxu1 %v992_v20  ;;  %v997_v47 = vcombine.high %v38_v41, %v46_v42  ;;  %v61_v49 = vld [vmem:[%s1362_s0 + $0x150] sm:$0xff]  ;;  %v62_v51 = vld [vmem:[%s1362_s0 + $0x158] sm:$0xff]  ;;  %v996_v53 = vcombine.low %v38_v41, %v46_v42  ;;  %v23_v0 = vld [vmem:[%s1362_s0 + $0x20] sm:$0xff] }
   0xb   :  { %411 = vmatprep.subr.bf16.mxu0 %v1007_v21  ;;  %452 = vmatprep.subr.bf16.mxu1 %v1009_v22  ;;  %v1011_v54 = vcombine.high %v53_v48, %v61_v49  ;;  %v1013_v55 = vcombine.high %v54_v50, %v62_v51  ;;  %v69_v56 = vld [vmem:[%s1362_s0 + $0x190] sm:$0xff]  ;;  %v70_v58 = vld [vmem:[%s1362_s0 + $0x198] sm:$0xff]  ;;  %v1010_v60 = vcombine.low %v53_v48, %v61_v49  ;;  %v31_v1 = vld [vmem:[%s1362_s0 + $0x60] sm:$0xff] }
   0xc   :  { %v77_v57 = vld [vmem:[%s1362_s0 + $0x1d0] sm:$0xff]  ;;  %v78_v59 = vld [vmem:[%s1362_s0 + $0x1d8] sm:$0xff]  ;;  %v1012_v61 = vcombine.low %v54_v50, %v62_v51  ;;  %v24_v2 = vld [vmem:[%s1362_s0 + $0x28] sm:$0xff]  ;;  %v983_v7 = vcombine.high %v23_v0, %v31_v1  ;;  %v982_v13 = vcombine.low %v23_v0, %v31_v1 }
   0xd   :  { %v1027_v62 = vcombine.high %v69_v56, %v77_v57  ;;  %v1029_v63 = vcombine.high %v70_v58, %v78_v59  ;;  %v32_v4 = vld [vmem:[%s1362_s0 + $0x68] sm:$0xff]  ;;  %v1026_v5 = vcombine.low %v69_v56, %v77_v57  ;;  %v1028_v6 = vcombine.low %v70_v58, %v78_v59  ;;  %v39_v9 = vld [vmem:[%s1362_s0 + $0xa0] sm:$0xff]  ;;  %v25_v33 = vld [vmem:[%s1362_s0 + $0x30] sm:$0xff] }
   0xe   :  { %412 = vmatpush1.bf16.msra.mxu0 %v1006_v27  ;;  %453 = vmatpush1.bf16.msra.mxu1 %v1008_v28  ;;  %v985_v8 = vcombine.high %v24_v2, %v32_v4  ;;  %v47_v10 = vld [vmem:[%s1362_s0 + $0xe0] sm:$0xff]  ;;  %v40_v11 = vld [vmem:[%s1362_s0 + $0xa8] sm:$0xff]  ;;  %v984_v14 = vcombine.low %v24_v2, %v32_v4  ;;  %v33_v34 = vld [vmem:[%s1362_s0 + $0x70] sm:$0xff] }
   0xf   :  { %413 = vmatprep.subr.bf16.mxu0 %v1023_v29  ;;  %454 = vmatprep.subr.bf16.mxu1 %v1025_v30  ;;  %v48_v12 = vld [vmem:[%s1362_s0 + $0xe8] sm:$0xff]  ;;  %v999_v15 = vcombine.high %v39_v9, %v47_v10  ;;  %v55_v17 = vld [vmem:[%s1362_s0 + $0x120] sm:$0xff]  ;;  %v998_v21 = vcombine.low %v39_v9, %v47_v10  ;;  %v987_v39 = vcombine.high %v25_v33, %v33_v34  ;;  %v41_v41 = vld [vmem:[%s1362_s0 + $0xb0] sm:$0xff] }
  0x10   :  { %v1001_v16 = vcombine.high %v40_v11, %v48_v12  ;;  %v63_v18 = vld [vmem:[%s1362_s0 + $0x160] sm:$0xff]  ;;  %v56_v19 = vld [vmem:[%s1362_s0 + $0x128] sm:$0xff]  ;;  %v1000_v22 = vcombine.low %v40_v11, %v48_v12  ;;  %v49_v42 = vld [vmem:[%s1362_s0 + $0xf0] sm:$0xff] }
  0x11   :  { %v64_v20 = vld [vmem:[%s1362_s0 + $0x168] sm:$0xff]  ;;  %v1015_v23 = vcombine.high %v55_v17, %v63_v18  ;;  %v71_v25 = vld [vmem:[%s1362_s0 + $0x1a0] sm:$0xff]  ;;  %v1014_v29 = vcombine.low %v55_v17, %v63_v18  ;;  %v1003_v48 = vcombine.high %v41_v41, %v49_v42  ;;  %v57_v50 = vld [vmem:[%s1362_s0 + $0x130] sm:$0xff] }
  0x12   :  { %414 = vmatpush1.bf16.msra.mxu0 %v1022_v35  ;;  %455 = vmatpush1.bf16.msra.mxu1 %v1024_v36  ;;  %v1017_v24 = vcombine.high %v56_v19, %v64_v20  ;;  %v79_v26 = vld [vmem:[%s1362_s0 + $0x1e0] sm:$0xff]  ;;  %v72_v27 = vld [vmem:[%s1362_s0 + $0x1a8] sm:$0xff]  ;;  %v1016_v30 = vcombine.low %v56_v19, %v64_v20  ;;  %v26_v35 = vld [vmem:[%s1362_s0 + $0x38] sm:$0xff] }
  0x13   :  { %489 = vmatprep.subr.bf16.mxu0 %v979_v37  ;;  %530 = vmatprep.subr.bf16.mxu1 %v981_v38  ;;  %v80_v28 = vld [vmem:[%s1362_s0 + $0x1e8] sm:$0xff]  ;;  %v1031_v31 = vcombine.high %v71_v25, %v79_v26  ;;  %v34_v36 = vld [vmem:[%s1362_s0 + $0x78] sm:$0xff]  ;;  %v1030_v37 = vcombine.low %v71_v25, %v79_v26  ;;  %v65_v51 = vld [vmem:[%s1362_s0 + $0x170] sm:$0xff] }
  0x14   :  { %v1033_v32 = vcombine.high %v72_v27, %v80_v28  ;;  %v1032_v38 = vcombine.low %v72_v27, %v80_v28  ;;  %v989_v40 = vcombine.high %v26_v35, %v34_v36  ;;  %v1019_v56 = vcombine.high %v57_v50, %v65_v51  ;;  %v73_v58 = vld [vmem:[%s1362_s0 + $0x1b0] sm:$0xff] }
  0x15   :  { %1038 = vmatmul.mubr.msk.bf16.vlgmr.msra.gmra.mrb[0].mxu0 %vm403_vm0, %v1172_v43  ;;  %1039 = vmatmul.mubr.msk.bf16.vlgmr.msra.gmra.mrb[0].mxu1 %vm403_vm0, %v1172_v43  ;;  %v81_v59 = vld [vmem:[%s1362_s0 + $0x1f0] sm:$0xff] }
  0x16   :  { %490 = vmatpush1.bf16.msra.mxu0 %v978_v44  ;;  %531 = vmatpush1.bf16.msra.mxu1 %v980_v45  ;;  %v42_v44 = vld [vmem:[%s1362_s0 + $0xb8] sm:$0xff]  ;;  %v1035_v0 = vcombine.high %v73_v58, %v81_v59  ;;  %v1034_v2 = vcombine.low %v73_v58, %v81_v59 }
  0x17   :  { %491 = vmatprep.subr.bf16.mxu0 %v995_v46  ;;  %532 = vmatprep.subr.bf16.mxu1 %v997_v47  ;;  %v50_v45 = vld [vmem:[%s1362_s0 + $0xf8] sm:$0xff]  ;;  %v986_v46 = vcombine.low %v25_v33, %v33_v34  ;;  %v988_v47 = vcombine.low %v26_v35, %v34_v36 }
  0x18   :  { %521 = vmatprep.mubr.bf16.mxu0 %v1067_v3  ;;  %562 = vmatprep.mubr.bf16.mxu1 %v1067_v3  ;;  %v1005_v49 = vcombine.high %v42_v44, %v50_v45 }
  0x1a   :  { %492 = vmatpush1.bf16.msra.mxu0 %v994_v52  ;;  %533 = vmatpush1.bf16.msra.mxu1 %v996_v53  ;;  %v58_v52 = vld [vmem:[%s1362_s0 + $0x138] sm:$0xff] }
  0x1b   :  { %493 = vmatprep.subr.bf16.mxu0 %v1011_v54  ;;  %534 = vmatprep.subr.bf16.mxu1 %v1013_v55  ;;  %v66_v53 = vld [vmem:[%s1362_s0 + $0x178] sm:$0xff]  ;;  %v1002_v54 = vcombine.low %v41_v41, %v49_v42  ;;  %v1004_v55 = vcombine.low %v42_v44, %v50_v45 }
  0x1c   :  { %v1021_v57 = vcombine.high %v58_v52, %v66_v53 }
  0x1e   :  { %494 = vmatpush1.bf16.msra.mxu0 %v1010_v60  ;;  %535 = vmatpush1.bf16.msra.mxu1 %v1012_v61  ;;  %v74_v60 = vld [vmem:[%s1362_s0 + $0x1b8] sm:$0xff] }
  0x1f   :  { %495 = vmatprep.subr.bf16.mxu0 %v1027_v62  ;;  %536 = vmatprep.subr.bf16.mxu1 %v1029_v63  ;;  %v82_v61 = vld [vmem:[%s1362_s0 + $0x1f8] sm:$0xff]  ;;  %v1018_v62 = vcombine.low %v57_v50, %v65_v51  ;;  %v1020_v63 = vcombine.low %v58_v52, %v66_v53 }
  0x20   :  { %v1037_v1 = vcombine.high %v74_v60, %v82_v61  ;;  %v1036_v4 = vcombine.low %v74_v60, %v82_v61 }
  0x22   :  { %496 = vmatpush1.bf16.msra.mxu0 %v1026_v5  ;;  %537 = vmatpush1.bf16.msra.mxu1 %v1028_v6 }
  0x23   :  { %571 = vmatprep.subr.bf16.mxu0 %v983_v7  ;;  %612 = vmatprep.subr.bf16.mxu1 %v985_v8 }
  0x25   :  { %1040 = vmatmul.mubr.msk.bf16.vlgmr.msra.gmra.mrb[4].mxu0 %vm403_vm0, %v1172_v43  ;;  %1041 = vmatmul.mubr.msk.bf16.vlgmr.msra.gmra.mrb[4].mxu1 %vm403_vm0, %v1172_v43 }
  0x26   :  { %572 = vmatpush1.bf16.msra.mxu0 %v982_v13  ;;  %613 = vmatpush1.bf16.msra.mxu1 %v984_v14 }
  0x27   :  { %573 = vmatprep.subr.bf16.mxu0 %v999_v15  ;;  %614 = vmatprep.subr.bf16.mxu1 %v1001_v16 }
  0x28   :  { %603 = vmatprep.mubr.bf16.mxu0 %v1067_v3  ;;  %644 = vmatprep.mubr.bf16.mxu1 %v1067_v3 }
  0x2a   :  { %574 = vmatpush1.bf16.msra.mxu0 %v998_v21  ;;  %615 = vmatpush1.bf16.msra.mxu1 %v1000_v22 }
  0x2b   :  { %575 = vmatprep.subr.bf16.mxu0 %v1015_v23  ;;  %616 = vmatprep.subr.bf16.mxu1 %v1017_v24 }
  0x2e   :  { %576 = vmatpush1.bf16.msra.mxu0 %v1014_v29  ;;  %617 = vmatpush1.bf16.msra.mxu1 %v1016_v30 }
  0x2f   :  { %577 = vmatprep.subr.bf16.mxu0 %v1031_v31  ;;  %618 = vmatprep.subr.bf16.mxu1 %v1033_v32 }
  0x32   :  { %578 = vmatpush1.bf16.msra.mxu0 %v1030_v37  ;;  %619 = vmatpush1.bf16.msra.mxu1 %v1032_v38 }
  0x33   :  { %653 = vmatprep.subr.bf16.mxu0 %v987_v39  ;;  %694 = vmatprep.subr.bf16.mxu1 %v989_v40 }
  0x35   :  { %1042 = vmatmul.mubr.msk.bf16.vlgmr.msra.gmra.mrb[8].mxu0 %vm403_vm0, %v1172_v43  ;;  %1043 = vmatmul.mubr.msk.bf16.vlgmr.msra.gmra.mrb[8].mxu1 %vm403_vm0, %v1172_v43 }
  0x36   :  { %654 = vmatpush1.bf16.msra.mxu0 %v986_v46  ;;  %695 = vmatpush1.bf16.msra.mxu1 %v988_v47 }
  0x37   :  { %655 = vmatprep.subr.bf16.mxu0 %v1003_v48  ;;  %696 = vmatprep.subr.bf16.mxu1 %v1005_v49 }
  0x38   :  { %685 = vmatprep.mubr.bf16.mxu0 %v1067_v3  ;;  %726 = vmatprep.mubr.bf16.mxu1 %v1067_v3 }
  0x3a   :  { %656 = vmatpush1.bf16.msra.mxu0 %v1002_v54  ;;  %697 = vmatpush1.bf16.msra.mxu1 %v1004_v55 }
  0x3b   :  { %657 = vmatprep.subr.bf16.mxu0 %v1019_v56  ;;  %698 = vmatprep.subr.bf16.mxu1 %v1021_v57 }
  0x3e   :  { %658 = vmatpush1.bf16.msra.mxu0 %v1018_v62  ;;  %699 = vmatpush1.bf16.msra.mxu1 %v1020_v63 }
  0x3f   :  { %659 = vmatprep.subr.bf16.mxu0 %v1035_v0  ;;  %700 = vmatprep.subr.bf16.mxu1 %v1037_v1 }
  0x42   :  { %660 = vmatpush1.bf16.msra.mxu0 %v1034_v2  ;;  %701 = vmatpush1.bf16.msra.mxu1 %v1036_v4 }
  0x45   :  { %1044 = vmatmul.mubr.msk.bf16.vlgmr.msra.gmra.mrb[12].mxu0 %vm403_vm0, %v1172_v43  ;;  %1045 = vmatmul.mubr.msk.bf16.vlgmr.msra.gmra.mrb[12].mxu1 %vm403_vm0, %v1172_v43 }
  0xe8   :  { %v441_v3 = vpop.f32.mrb[0].mxu0  ;;  %v482_v6 = vpop.f32.mrb[0].mxu1 }
  0xe9   :  { %v443_v5 = vpop.f32.mrb[1].mxu0  ;;  %v484_v9 = vpop.f32.mrb[1].mxu1 }
  0xea   :  { %v735_v7 = vadd.f32 %v443_v5, %v441_v3  ;;  %v445_v8 = vpop.f32.mrb[2].mxu0  ;;  %v486_v11 = vpop.f32.mrb[2].mxu1 }
  0xeb   :  { %v446_v10 = vpop.f32.mrb[3].mxu0  ;;  %v487_v13 = vpop.f32.mrb[3].mxu1 }
  0xec   :  { %v736_v12 = vadd.f32 %v735_v7, %v482_v6 }
  0xee   :  { %v737_v14 = vadd.f32 %v736_v12, %v484_v9 }
  0xf8   :  { %v523_v15 = vpop.f32.mrb[4].mxu0  ;;  %v564_v18 = vpop.f32.mrb[4].mxu1 }
  0xf9   :  { %v738_v16 = vadd.f32 %v737_v14, %v523_v15  ;;  %v525_v17 = vpop.f32.mrb[5].mxu0  ;;  %v566_v20 = vpop.f32.mrb[5].mxu1 }
  0xfa   :  { %v527_v19 = vpop.f32.mrb[6].mxu0  ;;  %v568_v43 = vpop.f32.mrb[6].mxu1 }
  0xfb   :  { %v739_v21 = vadd.f32 %v738_v16, %v525_v17  ;;  %v528_v22 = vpop.f32.mrb[7].mxu0  ;;  %v569_v23 = vpop.f32.mrb[7].mxu1 }
  0xfd   :  { %v740_v24 = vadd.f32 %v739_v21, %v564_v18 }
  0xff   :  { %v741_v25 = vadd.f32 %v740_v24, %v566_v20 }
 0x108   :  { %v605_v26 = vpop.f32.mrb[8].mxu0  ;;  %v646_v29 = vpop.f32.mrb[8].mxu1 }
 0x109   :  { %v742_v27 = vadd.f32 %v741_v25, %v605_v26  ;;  %v607_v28 = vpop.f32.mrb[9].mxu0  ;;  %v648_v31 = vpop.f32.mrb[9].mxu1 }
 0x10a   :  { %v609_v30 = vpop.f32.mrb[10].mxu0  ;;  %v650_v34 = vpop.f32.mrb[10].mxu1 }
 0x10b   :  { %v743_v32 = vadd.f32 %v742_v27, %v607_v28  ;;  %v610_v33 = vpop.f32.mrb[11].mxu0  ;;  %v651_v35 = vpop.f32.mrb[11].mxu1 }
 0x10d   :  { %v744_v36 = vadd.f32 %v743_v32, %v646_v29 }
 0x10f   :  { %v745_v37 = vadd.f32 %v744_v36, %v648_v31 }
 0x118   :  { %v687_v38 = vpop.f32.mrb[12].mxu0  ;;  %v728_v41 = vpop.f32.mrb[12].mxu1 }
 0x119   :  { %v746_v39 = vadd.f32 %v745_v37, %v687_v38  ;;  %v689_v40 = vpop.f32.mrb[13].mxu0  ;;  %v730_v44 = vpop.f32.mrb[13].mxu1 }
 0x11a   :  { %v691_v42 = vpop.f32.mrb[14].mxu0  ;;  %v732_v47 = vpop.f32.mrb[14].mxu1 }
 0x11b   :  { %v747_v45 = vadd.f32 %v746_v39, %v689_v40  ;;  %v692_v46 = vpop.f32.mrb[15].mxu0  ;;  %v733_v48 = vpop.f32.mrb[15].mxu1 }
 0x11d   :  { %v748_v49 = vadd.f32 %v747_v45, %v728_v41 }
 0x11f   :  { %v749_v50 = vadd.f32 %v748_v49, %v730_v44 }
 0x121   :  { %750 = vadd.xlane.f32.xlu0 %v749_v50 }
 0x1ae   :  { %v751_v51 = vpop.xlane.xlu0 %750 }
 0x1af   :  { %v752_v52 = vmul.f32 0.00048828125, %v751_v51 }
 0x1b1   :  { %v753_v53 = vsub.f32 %v441_v3, %v752_v52  ;;  %v754_v54 = vsub.f32 %v443_v5, %v752_v52  ;;  %v755_v55 = vsub.f32 %v482_v6, %v752_v52  ;;  %v756_v58 = vsub.f32 %v484_v9, %v752_v52 }
 0x1b2   :  { %v757_v59 = vsub.f32 %v523_v15, %v752_v52  ;;  %v758_v62 = vsub.f32 %v525_v17, %v752_v52  ;;  %v759_v1 = vsub.f32 %v564_v18, %v752_v52  ;;  %v760_v7 = vsub.f32 %v566_v20, %v752_v52 }
 0x1b3   :  { %v769_v56 = vmul.f32 %v753_v53, %v753_v53  ;;  %v770_v57 = vmul.f32 %v754_v54, %v754_v54  ;;  %v771_v60 = vmul.f32 %v755_v55, %v755_v55  ;;  %v772_v63 = vmul.f32 %v756_v58, %v756_v58 }
 0x1b4   :  { %v773_v2 = vmul.f32 %v757_v59, %v757_v59  ;;  %v774_v8 = vmul.f32 %v758_v62, %v758_v62  ;;  %v761_v11 = vsub.f32 %v605_v26, %v752_v52  ;;  %v775_v12 = vmul.f32 %v759_v1, %v759_v1 }
 0x1b5   :  { %v785_v61 = vadd.f32 %v770_v57, %v769_v56  ;;  %v762_v5 = vsub.f32 %v607_v28, %v752_v52  ;;  %v776_v6 = vmul.f32 %v760_v7, %v760_v7  ;;  %v763_v14 = vsub.f32 %v646_v29, %v752_v52 }
 0x1b6   :  { %v777_v9 = vmul.f32 %v761_v11, %v761_v11  ;;  %v764_v16 = vsub.f32 %v648_v31, %v752_v52  ;;  %v765_v21 = vsub.f32 %v687_v38, %v752_v52  ;;  %v766_v43 = vsub.f32 %v689_v40, %v752_v52  ;;  %v803_v38 = vld [vmem:[%s1364_s2] sm:$0xff] }
 0x1b7   :  { %v786_v0 = vadd.f32 %v785_v61, %v771_v60  ;;  %v778_v19 = vmul.f32 %v762_v5, %v762_v5  ;;  %v779_v22 = vmul.f32 %v763_v14, %v763_v14  ;;  %v767_v24 = vsub.f32 %v728_v41, %v752_v52  ;;  %v828_v41 = vld [vmem:[%s1365_s3] sm:$0xff] }
 0x1b8   :  { %v780_v23 = vmul.f32 %v764_v16, %v764_v16  ;;  %v781_v25 = vmul.f32 %v765_v21, %v765_v21  ;;  %v768_v27 = vsub.f32 %v730_v44, %v752_v52  ;;  %v782_v30 = vmul.f32 %v766_v43, %v766_v43 }
 0x1b9   :  { %v787_v4 = vadd.f32 %v786_v0, %v772_v63  ;;  %v783_v32 = vmul.f32 %v767_v24, %v767_v24 }
 0x1ba   :  { %v784_v29 = vmul.f32 %v768_v27, %v768_v27 }
 0x1bb   :  { %v788_v10 = vadd.f32 %v787_v4, %v773_v2 }
 0x1bd   :  { %v789_v3 = vadd.f32 %v788_v10, %v774_v8 }
 0x1bf   :  { %v790_v13 = vadd.f32 %v789_v3, %v775_v12 }
 0x1c1   :  { %v791_v15 = vadd.f32 %v790_v13, %v776_v6 }
 0x1c3   :  { %v792_v17 = vadd.f32 %v791_v15, %v777_v9 }
 0x1c5   :  { %v793_v18 = vadd.f32 %v792_v17, %v778_v19 }
 0x1c7   :  { %v794_v20 = vadd.f32 %v793_v18, %v779_v22 }
 0x1c9   :  { %v795_v26 = vadd.f32 %v794_v20, %v780_v23 }
 0x1cb   :  { %v796_v28 = vadd.f32 %v795_v26, %v781_v25 }
 0x1cd   :  { %v797_v33 = vadd.f32 %v796_v28, %v782_v30 }
 0x1cf   :  { %v798_v34 = vadd.f32 %v797_v33, %v783_v32 }
 0x1d1   :  { %v799_v35 = vadd.f32 %v798_v34, %v784_v29 }
 0x1d3   :  { %800 = vadd.xlane.f32.xlu0 %v799_v35 }
 0x260   :  { %v801_v31 = vpop.xlane.xlu0 %800 }
 0x261   :  { %v802_v36 = vmul.f32 0.00048828125, %v801_v31 }
 0x263   :  { %v804_v37 = vadd.f32 1e-05, %v802_v36 }
 0x265   :  { %1065 = vrsqrt.f32 %v804_v37 }
 0x26f   :  { %v1066_v39 = vpop.eup %1065 }
 0x270   :  { %v806_v40 = vmul.f32 %v1066_v39, %v803_v38 }
 0x272   :  { %809 = vperm.xlu1 %1063, %v806_v40  }
 0x276   :  { %831 = vperm.xlu1 %1063, %v828_v41  }
 0x2f1   :  { %v810_v42 = vpop.permute.xlu1 %809 }
 0x2f2   :  { %v812_v44 = vmul.f32 %v810_v42, %v753_v53  ;;  %v813_v45 = vmul.f32 %v810_v42, %v754_v54  ;;  %v814_v46 = vmul.f32 %v810_v42, %v755_v55  ;;  %v815_v47 = vmul.f32 %v810_v42, %v756_v58 }
 0x2f3   :  { %v816_v48 = vmul.f32 %v810_v42, %v757_v59  ;;  %v817_v49 = vmul.f32 %v810_v42, %v758_v62  ;;  %v818_v50 = vmul.f32 %v810_v42, %v759_v1  ;;  %v819_v51 = vmul.f32 %v810_v42, %v760_v7 }
 0x2f4   :  { %v820_v52 = vmul.f32 %v810_v42, %v761_v11  ;;  %v821_v56 = vmul.f32 %v810_v42, %v762_v5  ;;  %v822_v57 = vmul.f32 %v810_v42, %v763_v14  ;;  %v823_v60 = vmul.f32 %v810_v42, %v764_v16 }
 0x2f5   :  { %v824_v61 = vmul.f32 %v810_v42, %v765_v21  ;;  %v825_v63 = vmul.f32 %v810_v42, %v766_v43  ;;  %v826_v0 = vmul.f32 %v810_v42, %v767_v24  ;;  %v827_v2 = vmul.f32 %v810_v42, %v768_v27  ;;  %v832_v4 = vpop.permute.xlu1 %831 }
 0x2f6   :  { %v834_v8 = vadd.f32 %v832_v4, %v812_v44  ;;  %v835_v10 = vadd.f32 %v832_v4, %v813_v45  ;;  %v836_v12 = vadd.f32 %v832_v4, %v814_v46  ;;  %v837_v53 = vadd.f32 %v832_v4, %v815_v47 }
 0x2f7   :  { %v838_v54 = vadd.f32 %v832_v4, %v816_v48  ;;  %v839_v55 = vadd.f32 %v832_v4, %v817_v49  ;;  %v840_v58 = vadd.f32 %v832_v4, %v818_v50  ;;  %v841_v59 = vadd.f32 %v832_v4, %v819_v51 }
 0x2f8   :  { %v842_v62 = vadd.f32 %v832_v4, %v820_v52  ;;  %v843_v1 = vadd.f32 %v832_v4, %v821_v56  ;;  %v844_v7 = vadd.f32 %v832_v4, %v822_v57  ;;  %v845_v11 = vadd.f32 %v832_v4, %v823_v60 }
 0x2f9   :  { %v846_v3 = vadd.f32 %v832_v4, %v824_v61  ;;  %v847_v5 = vadd.f32 %v832_v4, %v825_v63  ;;  %v848_v6 = vadd.f32 %v832_v4, %v826_v0  ;;  %v849_v13 = vadd.f32 %v832_v4, %v827_v2 }
 0x2fa   :  { %vm850_vm1 = vcmp.gt.f32.partialorder %v834_v8, 0.0  ;;  %vm851_vm2 = vcmp.gt.f32.partialorder %v835_v10, 0.0  ;;  %vm852_vm3 = vcmp.gt.f32.partialorder %v836_v12, 0.0  ;;  %vm853_vm4 = vcmp.gt.f32.partialorder %v837_v53, 0.0 }
 0x2fb   :  { %vm854_vm5 = vcmp.gt.f32.partialorder %v838_v54, 0.0  ;;  %vm855_vm6 = vcmp.gt.f32.partialorder %v839_v55, 0.0  ;;  %vm856_vm7 = vcmp.gt.f32.partialorder %v840_v58, 0.0  ;;  %vm857_vm8 = vcmp.gt.f32.partialorder %v841_v59, 0.0 }
 0x2fc   :  { %vm858_vm9 = vcmp.gt.f32.partialorder %v842_v62, 0.0  ;;  %vm859_vm10 = vcmp.gt.f32.partialorder %v843_v1, 0.0  ;;  %vm860_vm11 = vcmp.gt.f32.partialorder %v844_v7, 0.0  ;;  %vm861_vm12 = vcmp.gt.f32.partialorder %v845_v11, 0.0 }
 0x2fd   :  { %vm862_vm13 = vcmp.gt.f32.partialorder %v846_v3, 0.0  ;;  %vm863_vm14 = vcmp.gt.f32.partialorder %v847_v5, 0.0  ;;  %vm864_vm15 = vcmp.gt.f32.partialorder %v848_v6, 0.0  ;;  %vm865_vm0 = vcmp.gt.f32.partialorder %v849_v13, 0.0 }
 0x2fe   :  { %v866_v14 = vmul.f32 0.2, %v834_v8  ;;  %v867_v9 = vmul.f32 0.2, %v835_v10  ;;  %v868_v15 = vmul.f32 0.2, %v836_v12 }
 0x2ff   :  { %v869_v16 = vmul.f32 0.2, %v837_v53  ;;  %v870_v19 = vmul.f32 0.2, %v838_v54  ;;  %v871_v17 = vmul.f32 0.2, %v839_v55 }
 0x300   :  { %v872_v21 = vmul.f32 0.2, %v840_v58  ;;  %v873_v22 = vmul.f32 0.2, %v841_v59  ;;  %v874_v18 = vmul.f32 0.2, %v842_v62  ;;  %v882_v43 = vsel %vm850_vm1, %v834_v8, %v866_v14 }
 0x301   :  { %v875_v23 = vmul.f32 0.2, %v843_v1  ;;  %v876_v20 = vmul.f32 0.2, %v844_v7  ;;  %v877_v24 = vmul.f32 0.2, %v845_v11  ;;  %v883_v25 = vsel %vm851_vm2, %v835_v10, %v867_v9 }
 0x302   :  { %v878_v26 = vmul.f32 0.2, %v846_v3  ;;  %v879_v27 = vmul.f32 0.2, %v847_v5  ;;  %v880_v30 = vmul.f32 0.2, %v848_v6  ;;  %v884_v28 = vsel %vm852_vm3, %v836_v12, %v868_v15 }
 0x303   :  { %v881_v32 = vmul.f32 0.2, %v849_v13  ;;  %v885_v33 = vsel %vm853_vm4, %v837_v53, %v869_v16  ;;  %v886_v29 = vsel %vm854_vm5, %v838_v54, %v870_v19  ;;  %v887_v34 = vsel %vm855_vm6, %v839_v55, %v871_v17 }
 0x304   :  { %v888_v35 = vsel %vm856_vm7, %v840_v58, %v872_v21  ;;  %v889_v31 = vsel %vm857_vm8, %v841_v59, %v873_v22  ;;  %v890_v36 = vsel %vm858_vm9, %v842_v62, %v874_v18  ;;  %v891_v37 = vsel %vm859_vm10, %v843_v1, %v875_v23 }
 0x305   :  { %v892_v38 = vsel %vm860_vm11, %v844_v7, %v876_v20  ;;  %v893_v39 = vsel %vm861_vm12, %v845_v11, %v877_v24  ;;  %v894_v40 = vsel %vm862_vm13, %v846_v3, %v878_v26  ;;  %v895_v41 = vsel %vm863_vm14, %v847_v5, %v879_v27 }
 0x306   :  { %v896_v42 = vsel %vm864_vm15, %v848_v6, %v880_v30  ;;  %v897_v44 = vsel %vm865_vm0, %v849_v13, %v881_v32  ;;  %v1054_v45 = vpack.c.bf16 %v883_v25, %v882_v43  ;;  %v1055_v46 = vpack.c.bf16 %v885_v33, %v884_v28 }
 0x307   :  { %v1056_v47 = vpack.c.bf16 %v887_v34, %v886_v29  ;;  %v1057_v48 = vpack.c.bf16 %v889_v31, %v888_v35  ;;  %v1058_v49 = vpack.c.bf16 %v891_v37, %v890_v36  ;;  %v1059_v50 = vpack.c.bf16 %v893_v39, %v892_v38 }
 0x308   :  { %v1060_v51 = vpack.c.bf16 %v895_v41, %v894_v40  ;;  %v1061_v52 = vpack.c.bf16 %v897_v44, %v896_v42  ;;  %962 = vst [vmem:[%s1366_s4] sm:$0xff] %v1054_v45  ;;  %963 = vst [vmem:[%s1366_s4 + $0x8] sm:$0xff] %v1055_v46 }
 0x309   :  { %964 = vst [vmem:[%s1366_s4 + $0x10] sm:$0xff] %v1056_v47  ;;  %965 = vst [vmem:[%s1366_s4 + $0x18] sm:$0xff] %v1057_v48 }
 0x30a   :  { %966 = vst [vmem:[%s1366_s4 + $0x20] sm:$0xff] %v1058_v49  ;;  %967 = vst [vmem:[%s1366_s4 + $0x28] sm:$0xff] %v1059_v50 }
 0x30b   :  { %968 = vst [vmem:[%s1366_s4 + $0x30] sm:$0xff] %v1060_v51  ;;  %969 = vst [vmem:[%s1366_s4 + $0x38] sm:$0xff] %v1061_v52 }

// kernel: _lambda_.7
= control target key start
LH: loop header
LB: loop body
LE: loop exit
PB: predicated region body
PF: predicated region fallthrough
CT: control target
= control target key end

     0   :  { %s801_s15 = smov 0   ;;  %s929_s0 = inlined_call_operand.vmem [shape: bf16[128,512], index: 0, kind: input, shape index: {}]   ;;  %s930_s1 = inlined_call_operand.vmem [shape: bf16[16,128], index: 1, kind: input, shape index: {}]   ;;  %s931_s2 = inlined_call_operand.vmem [shape: f32[16,1], index: 2, kind: input, shape index: {}]   ;;  %s932_s3 = inlined_call_operand.vmem [shape: f32[16,1], index: 3, kind: input, shape index: {}]   ;;  %s933_s4 = inlined_call_operand.vmem [shape: bf16[16,512], index: 4, kind: output, shape index: {}]  }
   0x1 LB: > { %s657_s16 = sadd.s32 4294967295, %s773_s15   ;;  %p661_p0 = scmp.ge.s32.totalorder %s773_s15, 1  ;;  %s773_s15 = sphi %s801_s15, %s14_s15  }
   0x2   : > { %p179_p1 = scmp.lt.s32.totalorder %s773_s15, 3 }
   0x4   : > { %p180_p2 = pnand %p661_p0, %p179_p1 }
   0x5   : > { %v717_v0 = vld [vmem:[%s929_s0 + $0x4] ss:$16 sps:$4 sm:$0xff] (!%p180_p2)   ;;  %v719_v1 = vld [vmem:[%s929_s0 + $0xc] ss:$16 sps:$4 sm:$0xff] (!%p180_p2)   ;;  %v775_v2 = vmov (!%p180_p2), 0   ;;  %p212_p3 = scmp.lt.s32.totalorder (!%p180_p2), %s657_s16, 1 }
   0x6   : > { %183 = sbr.rel (%p180_p2) target bundleno = 714 (0x2ca), region = 36  ;;  %455 = vmatprep.mubr.bf16.mxu0 (!%p180_p2), %v775_v2  ;;  %496 = vmatprep.mubr.bf16.mxu1 (!%p180_p2), %v775_v2  ;;  %v721_v3 = vld [vmem:[%s929_s0] ss:$16 sps:$4 sm:$0xff] (!%p180_p2)   ;;  %v722_v4 = vld [vmem:[%s929_s0 + $0x8] ss:$16 sps:$4 sm:$0xff] (!%p180_p2)  }
   0x7   : > { %423 = vmatprep.subr.bf16.mxu0 (!%p180_p2), %v717_v0  ;;  %715 = vset.pattern.permute.xlu1 (!%p180_p2), %v775_v2  ;;  %v723_v5 = vld [vmem:[%s929_s0 + $0x24] ss:$16 sps:$4 sm:$0xff] (!%p180_p2)   ;;  %v725_v6 = vld [vmem:[%s929_s0 + $0x2c] ss:$16 sps:$4 sm:$0xff] (!%p180_p2)   ;;  %v727_v7 = vld [vmem:[%s929_s0 + $0x20] ss:$16 sps:$4 sm:$0xff] (!%p180_p2)  }
   0x8   : > { %464 = vmatprep.subr.bf16.mxu1 (!%p180_p2), %v719_v1  ;;  %716 = vset.pattern.permute.xlu0 (!%p180_p2), %v775_v2  ;;  %v728_v8 = vld [vmem:[%s929_s0 + $0x28] ss:$16 sps:$4 sm:$0xff] (!%p180_p2)   ;;  %v729_v9 = vld [vmem:[%s929_s0 + $0x44] ss:$16 sps:$4 sm:$0xff] (!%p180_p2)   ;;  %v731_v10 = vld [vmem:[%s929_s0 + $0x4c] ss:$16 sps:$4 sm:$0xff] (!%p180_p2)  }
   0x9   : > { %424 = vmatpush1.bf16.msra.mxu0 (!%p180_p2), %v721_v3  ;;  %465 = vmatpush1.bf16.msra.mxu1 (!%p180_p2), %v722_v4  ;;  %v733_v11 = vld [vmem:[%s929_s0 + $0x40] ss:$16 sps:$4 sm:$0xff] (!%p180_p2)   ;;  %v734_v12 = vld [vmem:[%s929_s0 + $0x48] ss:$16 sps:$4 sm:$0xff] (!%p180_p2)   ;;  %v735_v13 = vld [vmem:[%s929_s0 + $0x64] ss:$16 sps:$4 sm:$0xff] (!%p180_p2)  }
   0xa   : > { %425 = vmatprep.subr.bf16.mxu0 (!%p180_p2), %v723_v5  ;;  %466 = vmatprep.subr.bf16.mxu1 (!%p180_p2), %v725_v6  ;;  %v737_v14 = vld [vmem:[%s929_s0 + $0x6c] ss:$16 sps:$4 sm:$0xff] (!%p180_p2)   ;;  %v739_v15 = vld [vmem:[%s929_s0 + $0x60] ss:$16 sps:$4 sm:$0xff] (!%p180_p2)   ;;  %v740_v16 = vld [vmem:[%s929_s0 + $0x68] ss:$16 sps:$4 sm:$0xff] (!%p180_p2)  }
   0xb   : > { %v741_v17 = vld [vmem:[%s929_s0 + $0x84] ss:$16 sps:$4 sm:$0xff] (!%p180_p2)   ;;  %v743_v18 = vld [vmem:[%s929_s0 + $0x8c] ss:$16 sps:$4 sm:$0xff] (!%p180_p2)   ;;  %v745_v19 = vld [vmem:[%s929_s0 + $0x80] ss:$16 sps:$4 sm:$0xff] (!%p180_p2)  }
   0xc   : > { %v746_v20 = vld [vmem:[%s929_s0 + $0x88] ss:$16 sps:$4 sm:$0xff] (!%p180_p2)   ;;  %v747_v21 = vld [vmem:[%s929_s0 + $0xa4] ss:$16 sps:$4 sm:$0xff] (!%p180_p2)   ;;  %v749_v22 = vld [vmem:[%s929_s0 + $0xac] ss:$16 sps:$4 sm:$0xff] (!%p180_p2)  }
   0xd   : > { %426 = vmatpush1.bf16.msra.mxu0 %v727_v7  ;;  %467 = vmatpush1.bf16.msra.mxu1 %v728_v8  ;;  %v751_v23 = vld [vmem:[%s929_s0 + $0xa0] ss:$16 sps:$4 sm:$0xff]   ;;  %v752_v24 = vld [vmem:[%s929_s0 + $0xa8] ss:$16 sps:$4 sm:$0xff]   ;;  %v753_v25 = vld [vmem:[%s929_s0 + $0xc4] ss:$16 sps:$4 sm:$0xff]  }
   0xe   : > { %427 = vmatprep.subr.bf16.mxu0 %v729_v9  ;;  %468 = vmatprep.subr.bf16.mxu1 %v731_v10  ;;  %v755_v26 = vld [vmem:[%s929_s0 + $0xcc] ss:$16 sps:$4 sm:$0xff]   ;;  %s935_s16 = smov (!%p212_p3, %s657_s16), 1  ;;  %v757_v27 = vld [vmem:[%s929_s0 + $0xc0] ss:$16 sps:$4 sm:$0xff]  }
   0xf   : > { %v758_v28 = vld [vmem:[%s929_s0 + $0xc8] ss:$16 sps:$4 sm:$0xff]   ;;  %v759_v29 = vld [vmem:[%s929_s0 + $0xe4] ss:$16 sps:$4 sm:$0xff]   ;;  %v761_v30 = vld [vmem:[%s929_s0 + $0xec] ss:$16 sps:$4 sm:$0xff]  }
  0x10   : > { %s662_s29 = sshll.u32 %s935_s16, 2  ;;  %v763_v31 = vld [vmem:[%s929_s0 + $0xe0] ss:$16 sps:$4 sm:$0xff]   ;;  %v764_v32 = vld [vmem:[%s929_s0 + $0xe8] ss:$16 sps:$4 sm:$0xff]   ;;  %s663_s11 = sshll.u32 %s935_s16, 3 }
  0x11   : > { %428 = vmatpush1.bf16.msra.mxu0 %v733_v11  ;;  %469 = vmatpush1.bf16.msra.mxu1 %v734_v12  ;;  %s215_s10 = scalar_lea.vmem %s930_s1, %s662_s29  ;;  %s219_s14 = scalar_lea.vmem %s931_s2, %s663_s11 }
  0x12   : > { %429 = vmatprep.subr.bf16.mxu0 %v735_v13  ;;  %470 = vmatprep.subr.bf16.mxu1 %v737_v14  ;;  %v230_v33 = vld [vmem:[%s215_s10] sm:$0xf]  ;;  %s223_s19 = scalar_lea.vmem %s932_s3, %s663_s11  ;;  %s703_s20 = sshll.u32 %s935_s16, 4 }
  0x13   : > { %v525_v61 = vld [vmem:[%s219_s14] sm:$0xff]  ;;  %s228_s23 = scalar_lea.vmem %s933_s4, %s703_s20 }
  0x14   : > { %v538_v0 = vld [vmem:[%s223_s19] sm:$0xff] }
  0x15   : > { %430 = vmatpush1.bf16.msra.mxu0 %v739_v15  ;;  %471 = vmatpush1.bf16.msra.mxu1 %v740_v16 }
  0x16   : > { %431 = vmatprep.subr.bf16.mxu0 %v741_v17  ;;  %472 = vmatprep.subr.bf16.mxu1 %v743_v18 }
  0x19   : > { %432 = vmatpush1.bf16.msra.mxu0 %v745_v19  ;;  %473 = vmatpush1.bf16.msra.mxu1 %v746_v20 }
  0x1a   : > { %433 = vmatprep.subr.bf16.mxu0 %v747_v21  ;;  %474 = vmatprep.subr.bf16.mxu1 %v749_v22 }
  0x1d   : > { %434 = vmatpush1.bf16.msra.mxu0 %v751_v23  ;;  %475 = vmatpush1.bf16.msra.mxu1 %v752_v24 }
  0x1e   : > { %435 = vmatprep.subr.bf16.mxu0 %v753_v25  ;;  %476 = vmatprep.subr.bf16.mxu1 %v755_v26 }
  0x21   : > { %436 = vmatpush1.bf16.msra.mxu0 %v757_v27  ;;  %477 = vmatpush1.bf16.msra.mxu1 %v758_v28 }
  0x22   : > { %437 = vmatprep.subr.bf16.mxu0 %v759_v29  ;;  %478 = vmatprep.subr.bf16.mxu1 %v761_v30 }
  0x25   : > { %438 = vmatpush1.bf16.msra.mxu0 %v763_v31  ;;  %479 = vmatpush1.bf16.msra.mxu1 %v764_v32 }
  0x28   : > { %456 = vmatmul.mubr.bf16.vlgmr.msra.gmra.mrb[0].mxu0 %v230_v33  ;;  %497 = vmatmul.mubr.bf16.vlgmr.msra.gmra.mrb[0].mxu1 %v230_v33 }
  0xfb   : > { %v457_v34 = vpop.f32.mrb[0].mxu0  ;;  %v498_v35 = vpop.f32.mrb[0].mxu1 }
  0xfc   : > { %v459_v36 = vpop.f32.mrb[1].mxu0  ;;  %v500_v37 = vpop.f32.mrb[1].mxu1 }
  0xfd   : > { %v505_v38 = vadd.f32 %v459_v36, %v457_v34  ;;  %v461_v39 = vpop.f32.mrb[2].mxu0  ;;  %v502_v40 = vpop.f32.mrb[2].mxu1 }
  0xfe   : > { %v462_v41 = vpop.f32.mrb[3].mxu0  ;;  %v503_v42 = vpop.f32.mrb[3].mxu1 }
  0xff   : > { %v506_v43 = vadd.f32 %v505_v38, %v498_v35 }
 0x101   : > { %v507_v44 = vadd.f32 %v506_v43, %v500_v37 }
 0x103   : > { %508 = vadd.xlane.f32.xlu0 %v507_v44 }
 0x190   : > { %v509_v45 = vpop.xlane.xlu0 %508 }
 0x191   : > { %v510_v46 = vmul.f32 0.001953125, %v509_v45 }
 0x193   : > { %v511_v47 = vsub.f32 %v457_v34, %v510_v46  ;;  %v512_v48 = vsub.f32 %v459_v36, %v510_v46  ;;  %v513_v49 = vsub.f32 %v498_v35, %v510_v46  ;;  %v514_v50 = vsub.f32 %v500_v37, %v510_v46 }
 0x195   : > { %v515_v51 = vmul.f32 %v511_v47, %v511_v47  ;;  %v516_v52 = vmul.f32 %v512_v48, %v512_v48  ;;  %v517_v53 = vmul.f32 %v513_v49, %v513_v49  ;;  %v518_v55 = vmul.f32 %v514_v50, %v514_v50 }
 0x197   : > { %v519_v54 = vadd.f32 %v516_v52, %v515_v51 }
 0x199   : > { %v520_v56 = vadd.f32 %v519_v54, %v517_v53 }
 0x19b   : > { %v521_v57 = vadd.f32 %v520_v56, %v518_v55 }
 0x19d   : > { %522 = vadd.xlane.f32.xlu0 %v521_v57 }
 0x22a   : > { %v523_v58 = vpop.xlane.xlu0 %522 }
 0x22b   : > { %v524_v59 = vmul.f32 0.001953125, %v523_v58 }
 0x22d   : > { %v526_v60 = vadd.f32 1e-05, %v524_v59 }
 0x22f   : > { %765 = vrsqrt.f32 %v526_v60 }
 0x239   : > { %v766_v62 = vpop.eup %765 }
 0x23a   : > { %v528_v63 = vmul.f32 %v766_v62, %v525_v61 }
 0x23c   : > { %531 = vperm.xlu1 %715, %v528_v63  }
 0x240   : > { %541 = vperm.xlu1 %715, %v538_v0  }
 0x2bb   : > { %v532_v1 = vpop.permute.xlu1 %531 }
 0x2bc   : > { %v534_v2 = vmul.f32 %v532_v1, %v511_v47  ;;  %v535_v3 = vmul.f32 %v532_v1, %v512_v48  ;;  %v536_v4 = vmul.f32 %v532_v1, %v513_v49  ;;  %v537_v5 = vmul.f32 %v532_v1, %v514_v50 }
 0x2bf   : > { %v542_v6 = vpop.permute.xlu1 %541 }
 0x2c0   : > { %v544_v7 = vadd.f32 %v542_v6, %v534_v2  ;;  %v545_v8 = vadd.f32 %v542_v6, %v535_v3  ;;  %v546_v9 = vadd.f32 %v542_v6, %v536_v4  ;;  %v547_v10 = vadd.f32 %v542_v6, %v537_v5 }
 0x2c2   : > { %vm548_vm0 = vcmp.gt.f32.partialorder %v544_v7, 0.0  ;;  %vm549_vm1 = vcmp.gt.f32.partialorder %v545_v8, 0.0  ;;  %vm550_vm2 = vcmp.gt.f32.partialorder %v546_v9, 0.0  ;;  %vm551_vm3 = vcmp.gt.f32.partialorder %v547_v10, 0.0 }
 0x2c3   : > { %v552_v11 = vmul.f32 0.2, %v544_v7  ;;  %v553_v12 = vmul.f32 0.2, %v545_v8  ;;  %v554_v13 = vmul.f32 0.2, %v546_v9 }
 0x2c4   : > { %v555_v14 = vmul.f32 0.2, %v547_v10 }
 0x2c5   : > { %v556_v15 = vsel %vm548_vm0, %v544_v7, %v552_v11  ;;  %v557_v16 = vsel %vm549_vm1, %v545_v8, %v553_v12  ;;  %v558_v17 = vsel %vm550_vm2, %v546_v9, %v554_v13 }
 0x2c6   : > { %v559_v18 = vsel %vm551_vm3, %v547_v10, %v555_v14  ;;  %v704_v19 = vpack.c.bf16 %v557_v16, %v556_v15 }
 0x2c7   : > { %v705_v20 = vpack.c.bf16 %v559_v18, %v558_v17 }
 0x2c8   : > { %576 = vst [vmem:[%s228_s23] sm:$0xff] %v704_v19 }
 0x2c9   : > { %577 = vst [vmem:[%s228_s23 + $0x8] sm:$0xff] %v705_v20 }
 0x2ca PF: > { %s14_s15 = sadd.s32 1, %s773_s15  }
 0x2cb   : > { %p11_p4 = scmp.ge.s32.totalorder %s14_s15, 4  }
 0x2cd   :  { %13 = sbr.rel (!%p11_p4) target bundleno = 1 (0x1), region = 72 }

// kernel: _lambda_.8
= control target key start
LH: loop header
LB: loop body
LE: loop exit
PB: predicated region body
PF: predicated region fallthrough
CT: control target
= control target key end

     0   :  { %s710_s15 = smov 0   ;;  %s790_s0 = inlined_call_operand.vmem [shape: bf16[256,128], index: 0, kind: input, shape index: {}]   ;;  %s791_s1 = inlined_call_operand.vmem [shape: bf16[32,256], index: 1, kind: input, shape index: {}]   ;;  %s792_s2 = inlined_call_operand.vmem [shape: f32[32,1], index: 2, kind: input, shape index: {}]   ;;  %s793_s3 = inlined_call_operand.vmem [shape: f32[32,1], index: 3, kind: input, shape index: {}]   ;;  %s794_s4 = inlined_call_operand.vmem [shape: bf16[32,128], index: 4, kind: output, shape index: {}]  }
   0x1 LB: > { %s576_s16 = sadd.s32 4294967295, %s682_s15   ;;  %p580_p0 = scmp.ge.s32.totalorder %s682_s15, 1  ;;  %s682_s15 = sphi %s710_s15, %s14_s15  }
   0x2   : > { %p186_p1 = scmp.lt.s32.totalorder %s682_s15, 3 }
   0x4   : > { %p187_p2 = pnand %p580_p0, %p186_p1 }
   0x5   : > { %v653_v0 = vld [vmem:[%s790_s0 + $0x40] sm:$0xff] (!%p187_p2)   ;;  %s581_s19 = sshll.u32 (!%p187_p2), %s576_s16, 1  ;;  %v655_v2 = vld [vmem:[%s790_s0 + $0x48] sm:$0xff] (!%p187_p2)   ;;  %v657_v4 = vld [vmem:[%s790_s0 + $0x50] sm:$0xff] (!%p187_p2)   ;;  %v684_v32 = vmov (!%p187_p2), 0  }
   0x6   : > { %190 = sbr.rel (%p187_p2) target bundleno = 704 (0x2c0), region = 36  ;;  %v654_v1 = vld [vmem:[%s790_s0] sm:$0xff] (!%p187_p2)   ;;  %620 = vmatprep.subr.bf16.mxu0 (!%p187_p2), %v653_v0  ;;  %v656_v3 = vld [vmem:[%s790_s0 + $0x8] sm:$0xff] (!%p187_p2)   ;;  %p224_p3 = scmp.lt.s32.totalorder (!%p187_p2), %s581_s19, 3  ;;  %v658_v5 = vld [vmem:[%s790_s0 + $0x10] sm:$0xff] (!%p187_p2)   ;;  %652 = vset.pattern.permute.xlu1 (!%p187_p2), %v684_v32 }
   0x7   : > { %621 = vmatpush3.bf16.msra.mxu0 (!%p187_p2), %v654_v1  ;;  %v659_v6 = vld [vmem:[%s790_s0 + $0x58] sm:$0xff] (!%p187_p2)   ;;  %v661_v8 = vld [vmem:[%s790_s0 + $0x60] sm:$0xff] (!%p187_p2)   ;;  %v663_v10 = vld [vmem:[%s790_s0 + $0x68] sm:$0xff] (!%p187_p2)   ;;  %651 = vset.pattern.permute.xlu0 (!%p187_p2), %v684_v32 }
   0x8   : > { %622 = vmatprep.subr.bf16.mxu0 (!%p187_p2), %v655_v2  ;;  %v660_v7 = vld [vmem:[%s790_s0 + $0x18] sm:$0xff] (!%p187_p2)   ;;  %v662_v9 = vld [vmem:[%s790_s0 + $0x20] sm:$0xff] (!%p187_p2)   ;;  %v664_v12 = vld [vmem:[%s790_s0 + $0x28] sm:$0xff] (!%p187_p2)  }
   0x9   : > { %v665_v13 = vld [vmem:[%s790_s0 + $0x70] sm:$0xff] (!%p187_p2)   ;;  %v667_v15 = vld [vmem:[%s790_s0 + $0x78] sm:$0xff] (!%p187_p2)  }
   0xa   : > { %v666_v14 = vld [vmem:[%s790_s0 + $0x30] sm:$0xff] (!%p187_p2)   ;;  %v668_v16 = vld [vmem:[%s790_s0 + $0x38] sm:$0xff] (!%p187_p2)  }
   0xb   : > { %623 = vmatpush3.bf16.msra.mxu0 (!%p187_p2), %v656_v3 }
   0xc   : > { %624 = vmatprep.subr.bf16.mxu0 (!%p187_p2), %v657_v4 }
   0xd   : > { %s796_s19 = smov (!%p224_p3, %s581_s19), 3 }
   0xe   : > { %s745_s8 = sshll.u32 %s796_s19, 3 }
   0xf   : > { %625 = vmatpush3.bf16.msra.mxu0 %v658_v5  ;;  %s228_s13 = scalar_lea.vmem %s791_s1, %s745_s8  ;;  %s240_s6 = scalar_lea.vmem %s793_s3, %s745_s8 }
  0x10   : > { %626 = vmatprep.subr.bf16.mxu0 %v659_v6  ;;  %v671_v11 = vld [vmem:[%s228_s13 + $0x4] ss:$8 sps:$4 sm:$0xff]   ;;  %v669_v17 = vld [vmem:[%s228_s13] ss:$8 sps:$4 sm:$0xff]   ;;  %s234_s10 = scalar_lea.vmem %s792_s2, %s745_s8  ;;  %s589_s8 = sshll.u32 %s796_s19, 2 }
  0x11   : > { %421 = vmatprep.mubr.bf16.mxu0 %v671_v11  ;;  %v466_v33 = vld [vmem:[%s240_s6] sm:$0xff]  ;;  %v447_v43 = vld [vmem:[%s234_s10 + $0x8] sm:$0xff]  ;;  %s246_s13 = scalar_lea.vmem %s794_s4, %s589_s8 }
  0x12   : > { %v446_v40 = vld [vmem:[%s234_s10] sm:$0xff]  ;;  %v467_v46 = vld [vmem:[%s240_s6 + $0x8] sm:$0xff] }
  0x13   : > { %627 = vmatpush3.bf16.msra.mxu0 %v660_v7 }
  0x14   : > { %628 = vmatprep.subr.bf16.mxu0 %v661_v8 }
  0x17   : > { %629 = vmatpush3.bf16.msra.mxu0 %v662_v9 }
  0x18   : > { %630 = vmatprep.subr.bf16.mxu0 %v663_v10 }
  0x1b   : > { %631 = vmatpush3.bf16.msra.mxu0 %v664_v12 }
  0x1c   : > { %632 = vmatprep.subr.bf16.mxu0 %v665_v13 }
  0x1f   : > { %633 = vmatpush3.bf16.msra.mxu0 %v666_v14 }
  0x20   : > { %634 = vmatprep.subr.bf16.mxu0 %v667_v15 }
  0x23   : > { %635 = vmatpush3.bf16.msra.mxu0 %v668_v16 }
  0x26   : > { %422 = vmatmul.mubr.bf16.vlgmr.msra.gmra.mrb[0].mxu0 %v669_v17 }
  0xf9   : > { %v636_v18 = vpop.f32.mrb[0].mxu0 }
  0xfa   : > { %v637_v19 = vpop.f32.mrb[1].mxu0 }
  0xfb   : > { %v638_v20 = vadd.f32 %v637_v19, %v636_v18  ;;  %v639_v21 = vpop.f32.mrb[2].mxu0 }
  0xfc   : > { %v640_v22 = vpop.f32.mrb[3].mxu0 }
  0xfd   : > { %v641_v23 = vadd.f32 %v640_v22, %v639_v21  ;;  %430 = vadd.xlane.f32.xlu0 %v638_v20 }
 0x101   : > { %432 = vadd.xlane.f32.xlu0 %v641_v23 }
 0x18a   : > { %v431_v24 = vpop.xlane.xlu0 %430 }
 0x18b   : > { %v434_v25 = vmul.f32 0.0078125, %v431_v24 }
 0x18d   : > { %v436_v26 = vsub.f32 %v638_v20, %v434_v25 }
 0x18e   : > { %v433_v27 = vpop.xlane.xlu0 %432 }
 0x18f   : > { %v435_v28 = vmul.f32 0.0078125, %v433_v27  ;;  %v438_v29 = vmul.f32 %v436_v26, %v436_v26 }
 0x191   : > { %v437_v30 = vsub.f32 %v641_v23, %v435_v28  ;;  %440 = vadd.xlane.f32.xlu1 %v438_v29 }
 0x193   : > { %v439_v31 = vmul.f32 %v437_v30, %v437_v30 }
 0x195   : > { %442 = vadd.xlane.f32.xlu1 %v439_v31 }
 0x1a6   : > { %470 = vperm.xlu1 %652, %v466_v33  }
 0x21e   : > { %v441_v34 = vpop.xlane.xlu1 %440 }
 0x21f   : > { %v444_v35 = vmul.f32 0.0078125, %v441_v34 }
 0x221   : > { %v448_v36 = vadd.f32 1e-05, %v444_v35 }
 0x222   : > { %v443_v37 = vpop.xlane.xlu1 %442 }
 0x223   : > { %672 = vrsqrt.f32 %v448_v36  ;;  %v445_v38 = vmul.f32 0.0078125, %v443_v37 }
 0x225   : > { %v449_v39 = vadd.f32 1e-05, %v445_v38 }
 0x226   : > { %v471_v47 = vpop.permute.xlu1 %470 }
 0x227   : > { %674 = vrsqrt.f32 %v449_v39 }
 0x22d   : > { %v673_v41 = vpop.eup %672 }
 0x22e   : > { %v452_v42 = vmul.f32 %v673_v41, %v446_v40 }
 0x230   : > { %456 = vperm.xlu0 %651, %v452_v42  }
 0x231   : > { %v675_v44 = vpop.eup %674 }
 0x232   : > { %v453_v45 = vmul.f32 %v675_v44, %v447_v43 }
 0x234   : > { %461 = vperm.xlu1 %652, %v453_v45  }
 0x238   : > { %475 = vperm.xlu1 %652, %v467_v46  }
 0x2af   : > { %v457_v48 = vpop.permute.xlu0 %456 }
 0x2b0   : > { %v464_v49 = vmul.f32 %v457_v48, %v436_v26 }
 0x2b2   : > { %v478_v51 = vadd.f32 %v471_v47, %v464_v49 }
 0x2b3   : > { %v462_v50 = vpop.permute.xlu1 %461 }
 0x2b4   : > { %v465_v52 = vmul.f32 %v462_v50, %v437_v30  ;;  %v482_v54 = vmul.f32 0.2, %v478_v51  ;;  %vm480_vm0 = vcmp.gt.f32.partialorder %v478_v51, 0.0 }
 0x2b6   : > { %v484_v57 = vsel %vm480_vm0, %v478_v51, %v482_v54 }
 0x2b7   : > { %v476_v53 = vpop.permute.xlu1 %475 }
 0x2b8   : > { %v479_v55 = vadd.f32 %v476_v53, %v465_v52 }
 0x2ba   : > { %vm481_vm1 = vcmp.gt.f32.partialorder %v479_v55, 0.0  ;;  %v483_v56 = vmul.f32 0.2, %v479_v55 }
 0x2bc   : > { %v485_v58 = vsel %vm481_vm1, %v479_v55, %v483_v56 }
 0x2bd   : > { %v618_v59 = vpack.c.bf16 %v485_v58, %v484_v57 }
 0x2bf   : > { %619 = vst [vmem:[%s246_s13] sm:$0xff] %v618_v59  }
 0x2c0 PF: > { %s14_s15 = sadd.s32 1, %s682_s15  }
 0x2c1   : > { %p11_p4 = scmp.ge.s32.totalorder %s14_s15, 4  }
 0x2c3   :  { %13 = sbr.rel (!%p11_p4) target bundleno = 1 (0x1), region = 72 }

// kernel: _lambda_.9
= control target key start
LH: loop header
LB: loop body
LE: loop exit
PB: predicated region body
PF: predicated region fallthrough
CT: control target
= control target key end

     0   :  { %s1495_s0 = inlined_call_operand.vmem [shape: bf16[512,32], index: 0, kind: input, shape index: {}]   ;;  %s1496_s1 = inlined_call_operand.vmem [shape: bf16[64,512], index: 1, kind: input, shape index: {}]   ;;  %s1497_s2 = inlined_call_operand.vmem [shape: f32[64,1], index: 2, kind: input, shape index: {}]   ;;  %s1498_s3 = inlined_call_operand.vmem [shape: f32[64,1], index: 3, kind: input, shape index: {}]   ;;  %s1499_s4 = inlined_call_operand.vmem [shape: f32[64,32], index: 4, kind: input, shape index: {}]   ;;  %s1500_s5 = inlined_call_operand.vmem [shape: f32[32,2], index: 5, kind: input, shape index: {}]   ;;  %s1501_s6 = inlined_call_operand.hbm [shape: f32[1,2], index: 6, kind: output, shape index: {}]  }
   0x1   :  { %v1042_v0 = vld [vmem:[%s1495_s0 + $0x40] sm:$0xff]   ;;  %v1046_v4 = vld [vmem:[%s1495_s0 + $0x48] sm:$0xff]   ;;  %v1050_v8 = vld [vmem:[%s1495_s0 + $0x50] sm:$0xff]  }
   0x2   :  { %v1043_v1 = vld [vmem:[%s1495_s0 + $0xc0] sm:$0xff]   ;;  %933 = vmatprep.subr.bf16.mxu0 %v1042_v0  ;;  %v1047_v5 = vld [vmem:[%s1495_s0 + $0xc8] sm:$0xff]   ;;  %v1051_v9 = vld [vmem:[%s1495_s0 + $0xd0] sm:$0xff]  }
   0x3   :  { %v1044_v2 = vld [vmem:[%s1495_s0] sm:$0xff]   ;;  %973 = vmatprep.subr.bf16.mxu1 %v1043_v1  ;;  %v1048_v6 = vld [vmem:[%s1495_s0 + $0x8] sm:$0xff]   ;;  %v1052_v10 = vld [vmem:[%s1495_s0 + $0x10] sm:$0xff]  }
   0x4   :  { %v1045_v3 = vld [vmem:[%s1495_s0 + $0x80] sm:$0xff]   ;;  %934 = vmatpush3.bf16.msra.mxu0 %v1044_v2  ;;  %v1049_v7 = vld [vmem:[%s1495_s0 + $0x88] sm:$0xff]   ;;  %v1053_v11 = vld [vmem:[%s1495_s0 + $0x90] sm:$0xff]  }
   0x5   :  { %974 = vmatpush3.bf16.msra.mxu1 %v1045_v3  ;;  %935 = vmatprep.subr.bf16.mxu0 %v1046_v4  ;;  %v1054_v12 = vld [vmem:[%s1495_s0 + $0x58] sm:$0xff]   ;;  %v1058_v16 = vld [vmem:[%s1495_s0 + $0x60] sm:$0xff]   ;;  %v1062_v20 = vld [vmem:[%s1495_s0 + $0x68] sm:$0xff]  }
   0x6   :  { %975 = vmatprep.subr.bf16.mxu1 %v1047_v5  ;;  %v1055_v13 = vld [vmem:[%s1495_s0 + $0xd8] sm:$0xff]   ;;  %v1059_v17 = vld [vmem:[%s1495_s0 + $0xe0] sm:$0xff]   ;;  %v1063_v21 = vld [vmem:[%s1495_s0 + $0xe8] sm:$0xff]  }
   0x7   :  { %v1056_v14 = vld [vmem:[%s1495_s0 + $0x18] sm:$0xff]   ;;  %v1060_v18 = vld [vmem:[%s1495_s0 + $0x20] sm:$0xff]   ;;  %v1064_v22 = vld [vmem:[%s1495_s0 + $0x28] sm:$0xff]  }
   0x8   :  { %936 = vmatpush3.bf16.msra.mxu0 %v1048_v6  ;;  %v1057_v15 = vld [vmem:[%s1495_s0 + $0x98] sm:$0xff]   ;;  %v1061_v19 = vld [vmem:[%s1495_s0 + $0xa0] sm:$0xff]   ;;  %v1065_v23 = vld [vmem:[%s1495_s0 + $0xa8] sm:$0xff]  }
   0x9   :  { %976 = vmatpush3.bf16.msra.mxu1 %v1049_v7  ;;  %937 = vmatprep.subr.bf16.mxu0 %v1050_v8  ;;  %v1066_v24 = vld [vmem:[%s1495_s0 + $0x70] sm:$0xff]   ;;  %v1070_v28 = vld [vmem:[%s1495_s0 + $0x78] sm:$0xff]  }
   0xa   :  { %977 = vmatprep.subr.bf16.mxu1 %v1051_v9  ;;  %v1067_v25 = vld [vmem:[%s1495_s0 + $0xf0] sm:$0xff]   ;;  %v1071_v29 = vld [vmem:[%s1495_s0 + $0xf8] sm:$0xff]  }
   0xb   :  { %v1068_v26 = vld [vmem:[%s1495_s0 + $0x30] sm:$0xff]   ;;  %v1072_v30 = vld [vmem:[%s1495_s0 + $0x38] sm:$0xff]  }
   0xc   :  { %938 = vmatpush3.bf16.msra.mxu0 %v1052_v10  ;;  %v1069_v27 = vld [vmem:[%s1495_s0 + $0xb0] sm:$0xff]   ;;  %v1073_v31 = vld [vmem:[%s1495_s0 + $0xb8] sm:$0xff]  }
   0xd   :  { %978 = vmatpush3.bf16.msra.mxu1 %v1053_v11  ;;  %939 = vmatprep.subr.bf16.mxu0 %v1054_v12  ;;  %v1074_v32 = vld [vmem:[%s1496_s1] ss:$16 sps:$4 sm:$0xff]   ;;  %v1076_v33 = vld [vmem:[%s1496_s1 + $0x4] ss:$16 sps:$4 sm:$0xff]   ;;  %v1077_v34 = vld [vmem:[%s1496_s1 + $0x8] ss:$16 sps:$4 sm:$0xff]  }
   0xe   :  { %979 = vmatprep.subr.bf16.mxu1 %v1055_v13  ;;  %v1079_v35 = vld [vmem:[%s1496_s1 + $0xc] ss:$16 sps:$4 sm:$0xff]   ;;  %409 = vmatprep.mubr.bf16.mxu0 %v1076_v33  ;;  %v1080_v36 = vld [vmem:[%s1496_s1 + $0x24] ss:$16 sps:$4 sm:$0xff]   ;;  %v1084_v38 = vld [vmem:[%s1496_s1 + $0x20] ss:$16 sps:$4 sm:$0xff]  }
   0xf   :  { %474 = vmatprep.mubr.bf16.mxu1 %v1079_v35  ;;  %v1082_v37 = vld [vmem:[%s1496_s1 + $0x2c] ss:$16 sps:$4 sm:$0xff]   ;;  %v1085_v39 = vld [vmem:[%s1496_s1 + $0x28] ss:$16 sps:$4 sm:$0xff]   ;;  %v1086_v40 = vld [vmem:[%s1496_s1 + $0x44] ss:$16 sps:$4 sm:$0xff]  }
  0x10   :  { %940 = vmatpush3.bf16.msra.mxu0 %v1056_v14  ;;  %v1088_v41 = vld [vmem:[%s1496_s1 + $0x4c] ss:$16 sps:$4 sm:$0xff]  }
  0x11   :  { %980 = vmatpush3.bf16.msra.mxu1 %v1057_v15  ;;  %941 = vmatprep.subr.bf16.mxu0 %v1058_v16 }
  0x12   :  { %981 = vmatprep.subr.bf16.mxu1 %v1059_v17 }
  0x14   :  { %942 = vmatpush3.bf16.msra.mxu0 %v1060_v18 }
  0x15   :  { %982 = vmatpush3.bf16.msra.mxu1 %v1061_v19  ;;  %943 = vmatprep.subr.bf16.mxu0 %v1062_v20 }
  0x16   :  { %983 = vmatprep.subr.bf16.mxu1 %v1063_v21 }
  0x18   :  { %944 = vmatpush3.bf16.msra.mxu0 %v1064_v22 }
  0x19   :  { %984 = vmatpush3.bf16.msra.mxu1 %v1065_v23  ;;  %945 = vmatprep.subr.bf16.mxu0 %v1066_v24 }
  0x1a   :  { %985 = vmatprep.subr.bf16.mxu1 %v1067_v25 }
  0x1c   :  { %946 = vmatpush3.bf16.msra.mxu0 %v1068_v26 }
  0x1d   :  { %986 = vmatpush3.bf16.msra.mxu1 %v1069_v27  ;;  %947 = vmatprep.subr.bf16.mxu0 %v1070_v28 }
  0x1e   :  { %987 = vmatprep.subr.bf16.mxu1 %v1071_v29 }
  0x20   :  { %948 = vmatpush3.bf16.msra.mxu0 %v1072_v30 }
  0x21   :  { %988 = vmatpush3.bf16.msra.mxu1 %v1073_v31 }
  0x23   :  { %410 = vmatmul.mubr.bf16.vlgmr.msra.gmra.mrb[0].mxu0 %v1074_v32 }
  0x24   :  { %475 = vmatmul.mubr.bf16.vlgmr.msra.gmra.mrb[0].mxu1 %v1077_v34  ;;  %417 = vmatprep.mubr.bf16.mxu0 %v1080_v36 }
  0x25   :  { %482 = vmatprep.mubr.bf16.mxu1 %v1082_v37 }
  0x26   :  { %11 = vsyncpa [#allocation3], 0  ;;  %v1090_v42 = vld [vmem:[%s1496_s1 + $0x40] ss:$16 sps:$4 sm:$0xff]   ;;  %v1091_v43 = vld [vmem:[%s1496_s1 + $0x48] ss:$16 sps:$4 sm:$0xff]  }
  0x27   :  { %v1092_v44 = vld [vmem:[%s1496_s1 + $0x64] ss:$16 sps:$4 sm:$0xff]   ;;  %v1094_v45 = vld [vmem:[%s1496_s1 + $0x6c] ss:$16 sps:$4 sm:$0xff]   ;;  %v1096_v46 = vld [vmem:[%s1496_s1 + $0x60] ss:$16 sps:$4 sm:$0xff]  }
  0x28   :  { %v1097_v47 = vld [vmem:[%s1496_s1 + $0x68] ss:$16 sps:$4 sm:$0xff]   ;;  %vm507_vm0 = vcmask 261120   ;;  %vm1144_vm1 = vmmov 0   ;;  %vm868_vm10 = vcmask 8192  }
  0x2b   :  { %418 = vmatmul.mubr.bf16.gmra.mrb[4].mxu0 %v1084_v38 }
  0x2c   :  { %483 = vmatmul.mubr.bf16.gmra.mrb[4].mxu1 %v1085_v39  ;;  %425 = vmatprep.mubr.bf16.mxu0 %v1086_v40 }
  0x2d   :  { %490 = vmatprep.mubr.bf16.mxu1 %v1088_v41 }
  0x33   :  { %426 = vmatmul.mubr.bf16.gmra.mrb[8].mxu0 %v1090_v42 }
  0x34   :  { %491 = vmatmul.mubr.bf16.gmra.mrb[8].mxu1 %v1091_v43  ;;  %433 = vmatprep.mubr.bf16.mxu0 %v1092_v44 }
  0x35   :  { %498 = vmatprep.mubr.bf16.mxu1 %v1094_v45 }
  0x3b   :  { %434 = vmatmul.mubr.bf16.gmra.mrb[12].mxu0 %v1096_v46 }
  0x3c   :  { %499 = vmatmul.mubr.bf16.gmra.mrb[12].mxu1 %v1097_v47 }
  0xf6   :  { %v949_v48 = vpop.f32.mrb[0].mxu0 }
  0xf7   :  { %v989_v49 = vpop.f32.mrb[0].mxu1  ;;  %v950_v50 = vpop.f32.mrb[1].mxu0 }
  0xf8   :  { %v951_v51 = vadd.f32 %v950_v50, %v949_v48  ;;  %v990_v52 = vpop.f32.mrb[1].mxu1  ;;  %v952_v53 = vpop.f32.mrb[2].mxu0  ;;  %v1142_v48 = vmov 0  }
  0xf9   :  { %v991_v54 = vadd.f32 %v990_v52, %v989_v49  ;;  %v992_v55 = vpop.f32.mrb[2].mxu1  ;;  %v953_v56 = vpop.f32.mrb[3].mxu0  ;;  %1040 = vset.pattern.permute.xlu1 %v1142_v48  ;;  %1041 = vset.pattern.permute.xlu0 %v1142_v48 }
  0xfa   :  { %v954_v57 = vadd.f32 %v953_v56, %v952_v53  ;;  %v993_v58 = vpop.f32.mrb[3].mxu1 }
  0xfb   :  { %v994_v59 = vadd.f32 %v993_v58, %v992_v55  ;;  %v1326_v60 = vadd.f32 %v991_v54, %v951_v51 }
  0xfd   :  { %v508_v61 = vsel %vm507_vm0, %v1326_v60, 0.0  ;;  %v1330_v62 = vadd.f32 %v994_v59, %v954_v57 }
  0xfe   :  { %509 = vadd.xlane.f32.xlu0 %v508_v61  ;;  %v955_v63 = vpop.f32.mrb[4].mxu0 }
  0xff   :  { %v995_v0 = vpop.f32.mrb[4].mxu1  ;;  %v956_v1 = vpop.f32.mrb[5].mxu0  ;;  %v511_v8 = vsel %vm507_vm0, %v1330_v62, 0.0 }
 0x100   :  { %v957_v2 = vadd.f32 %v956_v1, %v955_v63  ;;  %v996_v3 = vpop.f32.mrb[5].mxu1  ;;  %v958_v4 = vpop.f32.mrb[6].mxu0 }
 0x101   :  { %v997_v5 = vadd.f32 %v996_v3, %v995_v0  ;;  %v998_v6 = vpop.f32.mrb[6].mxu1  ;;  %v959_v7 = vpop.f32.mrb[7].mxu0 }
 0x102   :  { %v960_v9 = vadd.f32 %v959_v7, %v958_v4  ;;  %v999_v10 = vpop.f32.mrb[7].mxu1  ;;  %512 = vadd.xlane.f32.xlu0 %v511_v8 }
 0x103   :  { %v1000_v11 = vadd.f32 %v999_v10, %v998_v6  ;;  %v485_v12 = vadd.f32 %v997_v5, %v957_v2 }
 0x105   :  { %v514_v13 = vsel %vm507_vm0, %v485_v12, 0.0  ;;  %v488_v14 = vadd.f32 %v1000_v11, %v960_v9 }
 0x106   :  { %515 = vadd.xlane.f32.xlu1 %v514_v13  ;;  %v961_v15 = vpop.f32.mrb[8].mxu0 }
 0x107   :  { %v1001_v16 = vpop.f32.mrb[8].mxu1  ;;  %v962_v17 = vpop.f32.mrb[9].mxu0  ;;  %v517_v24 = vsel %vm507_vm0, %v488_v14, 0.0 }
 0x108   :  { %v963_v18 = vadd.f32 %v962_v17, %v961_v15  ;;  %v1002_v19 = vpop.f32.mrb[9].mxu1  ;;  %v964_v20 = vpop.f32.mrb[10].mxu0 }
 0x109   :  { %v1003_v21 = vadd.f32 %v1002_v19, %v1001_v16  ;;  %v1004_v22 = vpop.f32.mrb[10].mxu1  ;;  %v965_v23 = vpop.f32.mrb[11].mxu0 }
 0x10a   :  { %v966_v25 = vadd.f32 %v965_v23, %v964_v20  ;;  %v1005_v26 = vpop.f32.mrb[11].mxu1  ;;  %518 = vadd.xlane.f32.xlu1 %v517_v24 }
 0x10b   :  { %v1006_v27 = vadd.f32 %v1005_v26, %v1004_v22  ;;  %v493_v28 = vadd.f32 %v1003_v21, %v963_v18  ;;  %v669_v26 = vld [vmem:[%s1498_s3 + $0x8] sm:$0xff] }
 0x10d   :  { %v520_v29 = vsel %vm507_vm0, %v493_v28, 0.0  ;;  %v496_v30 = vadd.f32 %v1006_v27, %v966_v25  ;;  %v668_v25 = vld [vmem:[%s1498_s3] sm:$0xff]  ;;  %v670_v27 = vld [vmem:[%s1498_s3 + $0x10] sm:$0xff] }
 0x10e   :  { %521 = vadd.xlane.f32.xlu0 %v520_v29  ;;  %v967_v31 = vpop.f32.mrb[12].mxu0  ;;  %v672_v29 = vld [vmem:[%s1498_s3 + $0x20] sm:$0xff] }
 0x10f   :  { %v1007_v32 = vpop.f32.mrb[12].mxu1  ;;  %v968_v33 = vpop.f32.mrb[13].mxu0  ;;  %v523_v34 = vsel %vm507_vm0, %v496_v30, 0.0 }
 0x110   :  { %v969_v35 = vadd.f32 %v968_v33, %v967_v31  ;;  %v1008_v36 = vpop.f32.mrb[13].mxu1  ;;  %524 = vadd.xlane.f32.xlu1 %v523_v34  ;;  %v970_v37 = vpop.f32.mrb[14].mxu0 }
 0x111   :  { %v1009_v38 = vadd.f32 %v1008_v36, %v1007_v32  ;;  %v1010_v39 = vpop.f32.mrb[14].mxu1  ;;  %v971_v40 = vpop.f32.mrb[15].mxu0 }
 0x112   :  { %v972_v41 = vadd.f32 %v971_v40, %v970_v37  ;;  %v1011_v42 = vpop.f32.mrb[15].mxu1 }
 0x113   :  { %v1012_v43 = vadd.f32 %v1011_v42, %v1010_v39  ;;  %v501_v44 = vadd.f32 %v1009_v38, %v969_v35 }
 0x115   :  { %v526_v45 = vsel %vm507_vm0, %v501_v44, 0.0  ;;  %v504_v46 = vadd.f32 %v1012_v43, %v972_v41  ;;  %v588_v41 = vld [vmem:[%s1497_s2] sm:$0xff] }
 0x116   :  { %527 = vadd.xlane.f32.xlu0 %v526_v45 }
 0x117   :  { %v529_v47 = vsel %vm507_vm0, %v504_v46, 0.0 }
 0x118   :  { %530 = vadd.xlane.f32.xlu1 %v529_v47  ;;  %v589_v47 = vld [vmem:[%s1497_s2 + $0x8] sm:$0xff] }
 0x18b   :  { %v510_v49 = vpop.xlane.xlu0 %509 }
 0x18c   :  { %v532_v50 = vmul.f32 0.03125, %v510_v49 }
 0x18e   :  { %v1341_v51 = vsub.f32 %v1326_v60, %v532_v50 }
 0x18f   :  { %v513_v52 = vpop.xlane.xlu0 %512 }
 0x190   :  { %v533_v53 = vmul.f32 0.03125, %v513_v52  ;;  %v548_v54 = vmul.f32 %v1341_v51, %v1341_v51 }
 0x192   :  { %v1346_v55 = vsub.f32 %v1330_v62, %v533_v53  ;;  %v556_v56 = vsel %vm507_vm0, %v548_v54, 0.0 }
 0x193   :  { %v516_v57 = vpop.xlane.xlu1 %515  ;;  %557 = vadd.xlane.f32.xlu0 %v556_v56  ;;  %v590_v56 = vld [vmem:[%s1497_s2 + $0x10] sm:$0xff] }
 0x194   :  { %v534_v58 = vmul.f32 0.03125, %v516_v57  ;;  %v549_v59 = vmul.f32 %v1346_v55, %v1346_v55 }
 0x196   :  { %v1351_v61 = vsub.f32 %v485_v12, %v534_v58  ;;  %v559_v60 = vsel %vm507_vm0, %v549_v59, 0.0 }
 0x197   :  { %v519_v63 = vpop.xlane.xlu1 %518  ;;  %560 = vadd.xlane.f32.xlu1 %v559_v60 }
 0x198   :  { %v535_v0 = vmul.f32 0.03125, %v519_v63  ;;  %v550_v1 = vmul.f32 %v1351_v61, %v1351_v61  ;;  %v591_v63 = vld [vmem:[%s1497_s2 + $0x18] sm:$0xff] }
 0x19a   :  { %v1356_v62 = vsub.f32 %v488_v14, %v535_v0  ;;  %v562_v2 = vsel %vm507_vm0, %v550_v1, 0.0 }
 0x19b   :  { %563 = vadd.xlane.f32.xlu0 %v562_v2  ;;  %v522_v3 = vpop.xlane.xlu0 %521 }
 0x19c   :  { %v536_v4 = vmul.f32 0.03125, %v522_v3  ;;  %v551_v5 = vmul.f32 %v1356_v62, %v1356_v62 }
 0x19d   :  { %v525_v6 = vpop.xlane.xlu1 %524 }
 0x19e   :  { %v1361_v7 = vsub.f32 %v493_v28, %v536_v4  ;;  %v537_v8 = vmul.f32 0.03125, %v525_v6  ;;  %v565_v9 = vsel %vm507_vm0, %v551_v5, 0.0  ;;  %v671_v28 = vld [vmem:[%s1498_s3 + $0x18] sm:$0xff]  ;;  %v592_v6 = vld [vmem:[%s1497_s2 + $0x20] sm:$0xff] }
 0x19f   :  { %566 = vadd.xlane.f32.xlu1 %v565_v9  ;;  %v593_v9 = vld [vmem:[%s1497_s2 + $0x28] sm:$0xff] }
 0x1a0   :  { %v1364_v10 = vsub.f32 %v496_v30, %v537_v8  ;;  %v552_v11 = vmul.f32 %v1361_v7, %v1361_v7 }
 0x1a2   :  { %v568_v12 = vsel %vm507_vm0, %v552_v11, 0.0  ;;  %v553_v13 = vmul.f32 %v1364_v10, %v1364_v10 }
 0x1a3   :  { %569 = vadd.xlane.f32.xlu0 %v568_v12  ;;  %v528_v14 = vpop.xlane.xlu0 %527 }
 0x1a4   :  { %v538_v15 = vmul.f32 0.03125, %v528_v14  ;;  %v571_v16 = vsel %vm507_vm0, %v553_v13, 0.0  ;;  %v673_v14 = vld [vmem:[%s1498_s3 + $0x28] sm:$0xff] }
 0x1a5   :  { %v531_v17 = vpop.xlane.xlu1 %530  ;;  %572 = vadd.xlane.f32.xlu1 %v571_v16 }
 0x1a6   :  { %v1372_v18 = vsub.f32 %v501_v44, %v538_v15  ;;  %v539_v19 = vmul.f32 0.03125, %v531_v17  ;;  %v594_v15 = vld [vmem:[%s1497_s2 + $0x30] sm:$0xff] }
 0x1a7   :  { %v674_v17 = vld [vmem:[%s1498_s3 + $0x30] sm:$0xff] }
 0x1a8   :  { %v1374_v20 = vsub.f32 %v504_v46, %v539_v19  ;;  %v554_v21 = vmul.f32 %v1372_v18, %v1372_v18 }
 0x1aa   :  { %v574_v22 = vsel %vm507_vm0, %v554_v21, 0.0  ;;  %v555_v23 = vmul.f32 %v1374_v20, %v1374_v20 }
 0x1ab   :  { %575 = vadd.xlane.f32.xlu0 %v574_v22  ;;  %v595_v22 = vld [vmem:[%s1497_s2 + $0x38] sm:$0xff] }
 0x1ac   :  { %v577_v24 = vsel %vm507_vm0, %v555_v23, 0.0 }
 0x1ad   :  { %578 = vadd.xlane.f32.xlu1 %v577_v24  ;;  %v785_v24 = vld [vmem:[%s1500_s5] sm:$0xff] }
 0x1be   :  { %678 = vperm.xlu1 %1040, %v668_v25   ;;  %v786_v25 = vld [vmem:[%s1500_s5 + $0x8] sm:$0xff] }
 0x1c2   :  { %683 = vperm.xlu1 %1040, %v669_v26   ;;  %v675_v26 = vld [vmem:[%s1498_s3 + $0x38] sm:$0xff] }
 0x1c6   :  { %688 = vperm.xlu1 %1040, %v670_v27   ;;  %v1143_v27 = vmov 0.0|0.0  }
 0x1c7   :  { %1029 = vmatprep.subr.bf16.mxu0 %v1143_v27 }
 0x1ca   :  { %693 = vperm.xlu1 %1040, %v671_v28   ;;  %v1030_v28 = vpack.c.bf16 %v786_v25, %v785_v24 }
 0x1cc   :  { %1031 = vmatpush3.bf16.msra.mxu0 %v1030_v28 }
 0x1cd   :  { %1032 = vmatprep.subr.bf16.mxu0 %v1143_v27 }
 0x1ce   :  { %698 = vperm.xlu1 %1040, %v672_v29   ;;  %v787_v29 = vld [vmem:[%s1500_s5 + $0x10] sm:$0xff] }
 0x220   :  { %v558_v30 = vpop.xlane.xlu0 %557 }
 0x221   :  { %v580_v31 = vmul.f32 0.03125, %v558_v30  ;;  %v788_v30 = vld [vmem:[%s1500_s5 + $0x18] sm:$0xff] }
 0x223   :  { %v596_v32 = vadd.f32 1e-05, %v580_v31  ;;  %v1033_v31 = vpack.c.bf16 %v788_v30, %v787_v29 }
 0x224   :  { %v561_v33 = vpop.xlane.xlu1 %560 }
 0x225   :  { %1098 = vrsqrt.f32 %v596_v32  ;;  %v581_v34 = vmul.f32 0.03125, %v561_v33  ;;  %1034 = vmatpush3.bf16.msra.mxu0 %v1033_v31  ;;  %v1145_v32 = vmov 0.0  }
 0x226   :  { %1026 = vmatprep.mubr.msk.f32.mxu0 %vm1144_vm1, %v1145_v32 }
 0x227   :  { %v597_v35 = vadd.f32 1e-05, %v581_v34 }
 0x228   :  { %v564_v36 = vpop.xlane.xlu0 %563 }
 0x229   :  { %1100 = vrsqrt.f32 %v597_v35  ;;  %v582_v37 = vmul.f32 0.03125, %v564_v36 }
 0x22b   :  { %v598_v38 = vadd.f32 1e-05, %v582_v37 }
 0x22c   :  { %v567_v39 = vpop.xlane.xlu1 %566 }
 0x22d   :  { %1102 = vrsqrt.f32 %v598_v38  ;;  %v583_v40 = vmul.f32 0.03125, %v567_v39 }
 0x22f   :  { %v1099_v42 = vpop.eup %1098  ;;  %v599_v43 = vadd.f32 1e-05, %v583_v40 }
 0x230   :  { %v570_v44 = vpop.xlane.xlu0 %569  ;;  %v612_v45 = vmul.f32 %v1099_v42, %v588_v41 }
 0x231   :  { %1104 = vrsqrt.f32 %v599_v43  ;;  %v584_v46 = vmul.f32 0.03125, %v570_v44 }
 0x232   :  { %v573_v48 = vpop.xlane.xlu1 %572  ;;  %622 = vperm.xlu0 %1041, %v612_v45  }
 0x233   :  { %v1101_v49 = vpop.eup %1100  ;;  %v600_v50 = vadd.f32 1e-05, %v584_v46  ;;  %v585_v52 = vmul.f32 0.03125, %v573_v48 }
 0x234   :  { %v613_v53 = vmul.f32 %v1101_v49, %v589_v47 }
 0x235   :  { %1106 = vrsqrt.f32 %v600_v50  ;;  %v601_v54 = vadd.f32 1e-05, %v585_v52 }
 0x236   :  { %627 = vperm.xlu1 %1040, %v613_v53  }
 0x237   :  { %v1103_v57 = vpop.eup %1102  ;;  %1108 = vrsqrt.f32 %v601_v54 }
 0x238   :  { %v576_v58 = vpop.xlane.xlu0 %575  ;;  %v614_v59 = vmul.f32 %v1103_v57, %v590_v56 }
 0x239   :  { %v586_v60 = vmul.f32 0.03125, %v576_v58 }
 0x23a   :  { %v579_v0 = vpop.xlane.xlu1 %578  ;;  %632 = vperm.xlu1 %1040, %v614_v59   ;;  %v750_v59 = vld [vmem:[%s1499_s4 + $0x10] sm:$0xff] }
 0x23b   :  { %v1105_v1 = vpop.eup %1104  ;;  %v602_v2 = vadd.f32 1e-05, %v586_v60  ;;  %v587_v3 = vmul.f32 0.03125, %v579_v0 }
 0x23c   :  { %v615_v4 = vmul.f32 %v1105_v1, %v591_v63 }
 0x23d   :  { %1110 = vrsqrt.f32 %v602_v2  ;;  %v603_v5 = vadd.f32 1e-05, %v587_v3 }
 0x23e   :  { %637 = vperm.xlu1 %1040, %v615_v4   ;;  %v679_v33 = vpop.permute.xlu1 %678 }
 0x23f   :  { %v1107_v8 = vpop.eup %1106  ;;  %1112 = vrsqrt.f32 %v603_v5 }
 0x240   :  { %v616_v11 = vmul.f32 %v1107_v8, %v592_v6 }
 0x241   :  { %v1109_v12 = vpop.eup %1108 }
 0x242   :  { %642 = vperm.xlu1 %1040, %v616_v11   ;;  %v617_v13 = vmul.f32 %v1109_v12, %v593_v9  ;;  %v684_v34 = vpop.permute.xlu1 %683  ;;  %v752_v9 = vld [vmem:[%s1499_s4 + $0x20] sm:$0xff] }
 0x244   :  { %647 = vperm.xlu0 %1041, %v617_v13  }
 0x246   :  { %703 = vperm.xlu1 %1040, %v673_v14   ;;  %v689_v35 = vpop.permute.xlu1 %688 }
 0x247   :  { %v1111_v16 = vpop.eup %1110 }
 0x248   :  { %v618_v19 = vmul.f32 %v1111_v16, %v594_v15 }
 0x249   :  { %v1113_v21 = vpop.eup %1112 }
 0x24a   :  { %708 = vperm.xlu1 %1040, %v674_v17   ;;  %652 = vperm.xlu0 %1041, %v618_v19   ;;  %v619_v23 = vmul.f32 %v1113_v21, %v595_v22  ;;  %v694_v36 = vpop.permute.xlu1 %693 }
 0x24e   :  { %657 = vperm.xlu0 %1041, %v619_v23   ;;  %v699_v37 = vpop.permute.xlu1 %698  ;;  %v753_v23 = vld [vmem:[%s1499_s4 + $0x28] sm:$0xff] }
 0x252   :  { %713 = vperm.xlu0 %1041, %v675_v26  }
 0x2b1   :  { %v623_v38 = vpop.permute.xlu0 %622 }
 0x2b2   :  { %v660_v41 = vmul.f32 %v623_v38, %v1341_v51  ;;  %v749_v51 = vld [vmem:[%s1499_s4 + $0x8] sm:$0xff] }
 0x2b4   :  { %v716_v45 = vadd.f32 %v679_v33, %v660_v41 }
 0x2b5   :  { %v628_v39 = vpop.permute.xlu1 %627 }
 0x2b6   :  { %v661_v40 = vmul.f32 %v628_v39, %v1346_v55  ;;  %v732_v50 = vmul.f32 0.2, %v716_v45  ;;  %vm724_vm3 = vcmp.gt.f32.partialorder %v716_v45, 0.0 }
 0x2b8   :  { %v717_v43 = vadd.f32 %v684_v34, %v661_v40  ;;  %v740_v58 = vsel %vm724_vm3, %v716_v45, %v732_v50  ;;  %v755_v40 = vld [vmem:[%s1499_s4 + $0x38] sm:$0xff] }
 0x2b9   :  { %v633_v42 = vpop.permute.xlu1 %632 }
 0x2ba   :  { %v662_v44 = vmul.f32 %v633_v42, %v1351_v61  ;;  %v733_v48 = vmul.f32 0.2, %v717_v43  ;;  %vm725_vm2 = vcmp.gt.f32.partialorder %v717_v43, 0.0 }
 0x2bc   :  { %v718_v46 = vadd.f32 %v689_v35, %v662_v44  ;;  %v741_v55 = vsel %vm725_vm2, %v717_v43, %v733_v48 }
 0x2bd   :  { %v638_v47 = vpop.permute.xlu1 %637  ;;  %v757_v1 = vmul.f32 %v749_v51, %v741_v55 }
 0x2be   :  { %v663_v49 = vmul.f32 %v638_v47, %v1356_v62  ;;  %v734_v52 = vmul.f32 0.2, %v718_v46  ;;  %vm726_vm4 = vcmp.gt.f32.partialorder %v718_v46, 0.0  ;;  %v748_v62 = vld [vmem:[%s1499_s4] sm:$0xff] }
 0x2bf   :  { %v756_v6 = vmul.f32 %v748_v62, %v740_v58 }
 0x2c0   :  { %v719_v53 = vadd.f32 %v694_v36, %v663_v49  ;;  %v742_v60 = vsel %vm726_vm4, %v718_v46, %v734_v52 }
 0x2c1   :  { %v643_v54 = vpop.permute.xlu1 %642  ;;  %v758_v8 = vmul.f32 %v750_v59, %v742_v60  ;;  %v764_v16 = vsel %vm507_vm0, %v756_v6, 0.0 }
 0x2c2   :  { %v735_v56 = vmul.f32 0.2, %v719_v53  ;;  %v664_v61 = vmul.f32 %v643_v54, %v1361_v7  ;;  %vm727_vm5 = vcmp.gt.f32.partialorder %v719_v53, 0.0  ;;  %v751_v7 = vld [vmem:[%s1499_s4 + $0x18] sm:$0xff] }
 0x2c3   :  { %v648_v57 = vpop.permute.xlu0 %647  ;;  %v767_v17 = vsel %vm507_vm0, %v758_v8, 0.0 }
 0x2c4   :  { %v720_v63 = vadd.f32 %v699_v37, %v664_v61  ;;  %v665_v0 = vmul.f32 %v648_v57, %v1364_v10  ;;  %v743_v3 = vsel %vm727_vm5, %v719_v53, %v735_v56  ;;  %v765_v10 = vsel %vm507_vm0, %v757_v1, 0.0 }
 0x2c5   :  { %v704_v2 = vpop.permute.xlu1 %703  ;;  %v759_v13 = vmul.f32 %v751_v7, %v743_v3  ;;  %v766_v22 = vadd.f32 %v765_v10, %v764_v16 }
 0x2c6   :  { %vm728_vm6 = vcmp.gt.f32.partialorder %v720_v63, 0.0  ;;  %v736_v4 = vmul.f32 0.2, %v720_v63  ;;  %v721_v5 = vadd.f32 %v704_v2, %v665_v0 }
 0x2c7   :  { %v769_v26 = vsel %vm507_vm0, %v759_v13, 0.0  ;;  %v768_v28 = vadd.f32 %v767_v17, %v766_v22 }
 0x2c8   :  { %v744_v11 = vsel %vm728_vm6, %v720_v63, %v736_v4  ;;  %v737_v12 = vmul.f32 0.2, %v721_v5  ;;  %vm729_vm7 = vcmp.gt.f32.partialorder %v721_v5, 0.0 }
 0x2c9   :  { %v653_v14 = vpop.permute.xlu0 %652  ;;  %v760_v19 = vmul.f32 %v752_v9, %v744_v11  ;;  %v709_v21 = vpop.permute.xlu1 %708  ;;  %v770_v32 = vadd.f32 %v769_v26, %v768_v28 }
 0x2ca   :  { %v666_v15 = vmul.f32 %v653_v14, %v1372_v18  ;;  %v745_v24 = vsel %vm729_vm7, %v721_v5, %v737_v12  ;;  %v754_v18 = vld [vmem:[%s1499_s4 + $0x30] sm:$0xff]  ;;  %s1146_s4 = smov [#allocation2]  }
 0x2cb   :  { %v771_v30 = vsel %vm507_vm0, %v760_v19, 0.0  ;;  %v761_v31 = vmul.f32 %v753_v23, %v745_v24  ;;  %s876_s20 = sshll.u32 %s1146_s4, 4  ;;  %s877_s20 = int_to_ptr.vmem [resolvable:$true] %s876_s20 }
 0x2cc   :  { %v722_v25 = vadd.f32 %v709_v21, %v666_v15  ;;  %v772_v37 = vadd.f32 %v771_v30, %v770_v32  ;;  %s1118_s0 = scalar_lea.vmem %s877_s20, 16  ;;  %s1122_s21 = scalar_lea.vmem %s877_s20, 32 }
 0x2cd   :  { %v658_v27 = vpop.permute.xlu0 %657  ;;  %v773_v39 = vsel %vm507_vm0, %v761_v31, 0.0  ;;  %p1119_p0 = scmp.ne.s32.totalorder %s877_s20, %s1118_s0  ;;  %p1123_p1 = scmp.lt.s32.totalorder %s877_s20, %s877_s20 }
 0x2ce   :  { %vm730_vm8 = vcmp.gt.f32.partialorder %v722_v25, 0.0  ;;  %v738_v29 = vmul.f32 0.2, %v722_v25  ;;  %v667_v34 = vmul.f32 %v658_v27, %v1374_v20  ;;  %v774_v43 = vadd.f32 %v773_v39, %v772_v37  ;;  %p1124_p2 = scmp.lt.s32.totalorder %s1122_s21, %s1118_s0 }
 0x2d0   :  { %v746_v33 = vsel %vm730_vm8, %v722_v25, %v738_v29  ;;  %p1125_p3 = por %p1124_p2, %p1123_p1 }
 0x2d1   :  { %v762_v35 = vmul.f32 %v754_v18, %v746_v33  ;;  %v714_v36 = vpop.permute.xlu0 %713 }
 0x2d2   :  { %v723_v38 = vadd.f32 %v714_v36, %v667_v34  ;;  %p1126_p4 = pnand %p1125_p3, %p1119_p0 }
 0x2d3   :  { %v775_v42 = vsel %vm507_vm0, %v762_v35, 0.0 }
 0x2d4   :  { %vm731_vm9 = vcmp.gt.f32.partialorder %v723_v38, 0.0  ;;  %v739_v41 = vmul.f32 0.2, %v723_v38  ;;  %v776_v46 = vadd.f32 %v775_v42, %v774_v43 }
 0x2d6   :  { %v747_v44 = vsel %vm731_vm9, %v723_v38, %v739_v41 }
 0x2d7   :  { %v763_v45 = vmul.f32 %v755_v40, %v747_v44 }
 0x2d9   :  { %v777_v20 = vsel %vm507_vm0, %v763_v45, 0.0 }
 0x2da   :  { %v778_v47 = vadd.f32 %v777_v20, %v776_v46 }
 0x2dc   :  { %v779_v48 = vrot.slane %v778_v47, 4 }
 0x2de   :  { %v780_v49 = vadd.f32 %v779_v48, %v778_v47 }
 0x2e0   :  { %v781_v50 = vrot.slane %v780_v49, 2 }
 0x2e2   :  { %v782_v52 = vadd.f32 %v781_v50, %v780_v49 }
 0x2e4   :  { %v783_v53 = vrot.slane %v782_v52, 1 }
 0x2e6   :  { %v784_v54 = vadd.f32 %v783_v53, %v782_v52 }
 0x2e8   :  { %1027 = vmatmul.mubr.msk.f32.vlgmr.msra.gmra.mrb[16].mxu0 %vm507_vm0, %v784_v54 }
 0x3bb   :  { %v858_v51 = vpop.f32.mrb[16].mxu0 }
 0x3bc   :  { %v862_v55 = vsub.f32 0.0, %v858_v51  ;;  %v1028_v56 = vpop.f32.mrb[17].mxu0 }
 0x3be   :  { %v863_v61 = vmul.f32 1.442695, %v862_v55 }
 0x3c0   :  { %1114 = vpow2.f32 %v863_v61 }
 0x3ca   :  { %v1115_v57 = vpop.eup %1114 }
 0x3cb   :  { %v865_v62 = vadd.f32 1.0, %v1115_v57 }
 0x3cd   :  { %1116 = vrcp.f32 %v865_v62 }
 0x3d7   :  { %v1117_v58 = vpop.eup %1116 }
 0x3d8   :  { %869 = vst.msk [vmem:[#allocation2] sm:$0x1] %vm868_vm10, %v1117_v58 }
 0x3d9   :  { %1129 = shalt.err (!%p1126_p4)
}
 0x3da   :  { %s1130_s24 = scalar_lea.hbm %s1501_s6, 16 }
 0x3db   :  { %p1131_p5 = scmp.ne.s32.totalorder %s1501_s6, %s1130_s24  ;;  %p1134_p6 = scmp.lt.u32.totalorder %s1130_s24, %s1501_s6 }
 0x3dd   :  { %p1136_p7 = pnand %p1134_p6, %p1131_p5 }
 0x3df   :  { %1139 = shalt.err (!%p1136_p7)
}
 0x3e0   :  { %879 = dma.vmem_to_hbm [thread:$0]  %s877_s20, 16, %s1501_s6, [#allocation3]  }
 0x3e1   :  { %1140 = dma.done.wait [#allocation3], 16  }
 0x3e2   :  { %1141 = vsyncadd [#allocation3], 4294967280 }
 0x3e3   :  { %883 = vsyncpa [#allocation3], 1 }

</bundles_post_ra>
